<compile_context>
chip_gen: v7x
topology: tpu7x:2x2x1
jax: 0.10.0
libtpu: 0.0.40
codegen_flags: <defaults>
</compile_context>

<pallas_src>
import functools

import jax
import jax.numpy as jnp
from jax.experimental import pallas as pl
from jax.experimental.pallas import tpu as pltpu


def _coordconv_kernel(xp_ref, w_ref, b_ref, o_ref, *, B, C1p, Ho, Wo, KH, KW):
    # xp_ref: (B, C1p, Hp, Wp)  zero-padded input, coord channel already added,
    #                           channels zero-padded up to C1p (multiple of 8)
    # w_ref : (Cout, KH*KW*C1p) weights, K axis ordered (ky, kx, c)
    # b_ref : (Cout, 1)         bias
    # o_ref : (B, Cout, Ho*Wo)  channel-major, flattened-spatial output
    HW = Ho * Wo
    x_all = xp_ref[...]                       # (B, C1p, Hp, Wp)
    w2d = w_ref[...]                          # (Cout, KH*KW*C1p)

    # Build the im2col patch matrix (KH*KW*C1p, B*HW).  Each tap piece is
    # (C1p, HW) with C1p a multiple of 8 and HW a multiple of 128, so the
    # concatenations land on native (8, 128) tile boundaries.
    cols = []
    for b in range(B):
        xb = x_all[b]                         # (C1p, Hp, Wp)
        taps = []
        for ky in range(KH):
            for kx in range(KW):
                taps.append(xb[:, ky:ky + Ho, kx:kx + Wo].reshape(C1p, HW))
        cols.append(jnp.concatenate(taps, axis=0))          # (KH*KW*C1p, HW)
    patches = jnp.concatenate(cols, axis=1) if B > 1 else cols[0]

    # Single fused MXU matmul: M=Cout, K=KH*KW*C1p, N=B*Ho*Wo (lane dense).
    acc = jnp.dot(w2d, patches, preferred_element_type=jnp.float32)
    acc = acc + b_ref[...]                                   # (Cout, B*HW)

    # Lane-dense stores: each write is (Cout, 256) at a 128-aligned lane offset.
    for b in range(B):
        o_ref[b] = acc[:, b * HW:(b + 1) * HW].astype(o_ref.dtype)


def coordconv2d(x_nchw, weight, bias, *, padding=1, compute_dtype=None):
    """CoordConv2d forward.

    x_nchw: (B, Cin, H, W); weight: (Cout, Cin+1, KH, KW); bias: (Cout,).
    Assumes stride=1, dilation=1.  compute_dtype=jnp.bfloat16 enables the fast
    MXU path (f32 accumulation is kept either way).
    """
    B, Cin, H, W = x_nchw.shape
    Cout, C1, KH, KW = weight.shape
    assert C1 == Cin + 1
    P = padding
    Hp, Wp = H + 2 * P, W + 2 * P
    Ho, Wo = Hp - KH + 1, Wp - KW + 1          # stride=1, dilation=1
    C1p = ((C1 + 7) // 8) * 8                  # pad channels to sublane tile

    # AddCoords: yy[b, 0, i, j] = i / H  (torch: arange(y_dim)/y_dim, y_dim=H)
    yy = (jnp.arange(H, dtype=jnp.float32) / H).astype(x_nchw.dtype)
    yy = jnp.broadcast_to(yy[None, None, :, None], (B, 1, H, W))
    x_aug = jnp.concatenate([x_nchw, yy], axis=1)            # (B, C1, H, W)

    # Zero-pad channels (to C1p) and spatial halo (conv padding).
    xp = jnp.pad(x_aug, ((0, 0), (0, C1p - C1), (P, P), (P, P)))

    # Weights -> (Cout, KH*KW*C1p), K axis ordered (ky, kx, c), zero-padded chans.
    w4 = jnp.transpose(weight, (0, 2, 3, 1))                 # (Cout, KH, KW, C1)
    w4 = jnp.pad(w4, ((0, 0), (0, 0), (0, 0), (0, C1p - C1)))
    w2d = w4.reshape(Cout, KH * KW * C1p)
    b2d = bias.reshape(Cout, 1).astype(jnp.float32)

    if compute_dtype is not None:
        xp = xp.astype(compute_dtype)
        w2d = w2d.astype(compute_dtype)

    kernel = functools.partial(_coordconv_kernel, B=B, C1p=C1p, Ho=Ho, Wo=Wo,
                               KH=KH, KW=KW)

    out_flat = pl.pallas_call(
        kernel,
        out_shape=jax.ShapeDtypeStruct((B, Cout, Ho * Wo), x_nchw.dtype),
        grid_spec=pltpu.PrefetchScalarGridSpec(
            num_scalar_prefetch=0,
            grid=(1,),                                       # whole batch in one step
            in_specs=[
                pl.BlockSpec((B, C1p, Hp, Wp), lambda i: (0, 0, 0, 0)),
                pl.BlockSpec((Cout, KH * KW * C1p), lambda i: (0, 0)),
                pl.BlockSpec((Cout, 1), lambda i: (0, 0)),
            ],
            out_specs=pl.BlockSpec((B, Cout, Ho * Wo), lambda i: (0, 0, 0)),
        ),
        compiler_params=pltpu.CompilerParams(
            dimension_semantics=("arbitrary",),
            vmem_limit_bytes=32 * 1024 * 1024,
        ),
    )(xp, w2d, b2d)

    # Channel-major output is already NCHW; only a contiguous reshape remains.
    return out_flat.reshape(B, Cout, Ho, Wo)


if __name__ == "__main__":
    key = jax.random.PRNGKey(0)
    kx_, kw_, kb_ = jax.random.split(key, 3)

    B, Cin, H, W = 2, 4, 16, 16
    Cout, K, P = 8, 3, 1

    x = jax.random.normal(kx_, (B, Cin, H, W), jnp.float32)

    # deterministic Conv2d-style init (uniform +/- 1/sqrt(fan_in))
    fan_in = (Cin + 1) * K * K
    bound = 1.0 / (fan_in ** 0.5)
    weight = jax.random.uniform(kw_, (Cout, Cin + 1, K, K), jnp.float32,
                                -bound, bound)
    bias = jax.random.uniform(kb_, (Cout,), jnp.float32, -bound, bound)

    out = coordconv2d(x, weight, bias, padding=P)
    out = jax.block_until_ready(out)

    # pure-JAX reference of the PyTorch forward
    yy = (jnp.arange(H, dtype=jnp.float32) / H)[None, None, :, None]
    yy = jnp.broadcast_to(yy, (B, 1, H, W))
    xc = jnp.concatenate([x, yy], axis=1)
    ref = jax.lax.conv_general_dilated(
        xc, weight, window_strides=(1, 1), padding=((P, P), (P, P)),
        dimension_numbers=("NCHW", "OIHW", "NCHW"),
    ) + bias[None, :, None, None]

    assert out.shape == ref.shape == (B, Cout, H, W)
    assert jnp.allclose(out, ref, atol=2e-4, rtol=2e-4)
    print("KERNEL_OK")
</pallas_src>

<mosaic_0001>
module attributes {stable_mosaic.version = 11 : i64} {
  func.func @_coordconv_kernel(%arg0: i32, %arg1: memref<2x8x18x18xf32, #tpu.memory_space<vmem>>, %arg2: memref<8x72xf32, #tpu.memory_space<vmem>>, %arg3: memref<8x1xf32, #tpu.memory_space<vmem>>, %arg4: memref<2x8x256xf32, #tpu.memory_space<vmem>>) attributes {dimension_semantics = [#tpu.dimension_semantics<arbitrary>], iteration_bounds = array<i64: 1>, scalar_prefetch = 0 : i64, scratch_operands = 0 : i64, tpu.core_type = #tpu.core_type<tc>, window_params = [{pipeline_mode = #tpu.pipeline_mode<synchronous>, transform_indices = @transform_0, window_bounds = array<i64: 2, 8, 18, 18>}, {pipeline_mode = #tpu.pipeline_mode<synchronous>, transform_indices = @transform_1, window_bounds = array<i64: 8, 72>}, {pipeline_mode = #tpu.pipeline_mode<synchronous>, transform_indices = @transform_2, window_bounds = array<i64: 8, 1>}, {pipeline_mode = #tpu.pipeline_mode<synchronous>, transform_indices = @transform_3, window_bounds = array<i64: 2, 8, 256>}]} {
    %c0 = arith.constant 0 : index
    %c0_0 = arith.constant 0 : index
    %c0_1 = arith.constant 0 : index
    %c0_2 = arith.constant 0 : index
    %0 = vector.load %arg1[%c0, %c0_0, %c0_1, %c0_2] : memref<2x8x18x18xf32, #tpu.memory_space<vmem>>, vector<2x8x18x18xf32>
    %c0_3 = arith.constant 0 : index
    %c0_4 = arith.constant 0 : index
    %1 = vector.load %arg2[%c0_3, %c0_4] : memref<8x72xf32, #tpu.memory_space<vmem>>, vector<8x72xf32>
    %2 = vector.extract_strided_slice %0 {offsets = [0, 0, 0, 0], sizes = [1, 8, 18, 18], strides = [1, 1, 1, 1]} : vector<2x8x18x18xf32> to vector<1x8x18x18xf32>
    %3 = vector.shape_cast %2 : vector<1x8x18x18xf32> to vector<8x18x18xf32>
    %4 = vector.extract_strided_slice %3 {offsets = [0, 0, 0], sizes = [8, 16, 16], strides = [1, 1, 1]} : vector<8x18x18xf32> to vector<8x16x16xf32>
    %5 = vector.shape_cast %4 : vector<8x16x16xf32> to vector<8x256xf32>
    %6 = vector.extract_strided_slice %3 {offsets = [0, 0, 1], sizes = [8, 16, 16], strides = [1, 1, 1]} : vector<8x18x18xf32> to vector<8x16x16xf32>
    %7 = vector.shape_cast %6 : vector<8x16x16xf32> to vector<8x256xf32>
    %8 = vector.extract_strided_slice %3 {offsets = [0, 0, 2], sizes = [8, 16, 16], strides = [1, 1, 1]} : vector<8x18x18xf32> to vector<8x16x16xf32>
    %9 = vector.shape_cast %8 : vector<8x16x16xf32> to vector<8x256xf32>
    %10 = vector.extract_strided_slice %3 {offsets = [0, 1, 0], sizes = [8, 16, 16], strides = [1, 1, 1]} : vector<8x18x18xf32> to vector<8x16x16xf32>
    %11 = vector.shape_cast %10 : vector<8x16x16xf32> to vector<8x256xf32>
    %12 = vector.extract_strided_slice %3 {offsets = [0, 1, 1], sizes = [8, 16, 16], strides = [1, 1, 1]} : vector<8x18x18xf32> to vector<8x16x16xf32>
    %13 = vector.shape_cast %12 : vector<8x16x16xf32> to vector<8x256xf32>
    %14 = vector.extract_strided_slice %3 {offsets = [0, 1, 2], sizes = [8, 16, 16], strides = [1, 1, 1]} : vector<8x18x18xf32> to vector<8x16x16xf32>
    %15 = vector.shape_cast %14 : vector<8x16x16xf32> to vector<8x256xf32>
    %16 = vector.extract_strided_slice %3 {offsets = [0, 2, 0], sizes = [8, 16, 16], strides = [1, 1, 1]} : vector<8x18x18xf32> to vector<8x16x16xf32>
    %17 = vector.shape_cast %16 : vector<8x16x16xf32> to vector<8x256xf32>
    %18 = vector.extract_strided_slice %3 {offsets = [0, 2, 1], sizes = [8, 16, 16], strides = [1, 1, 1]} : vector<8x18x18xf32> to vector<8x16x16xf32>
    %19 = vector.shape_cast %18 : vector<8x16x16xf32> to vector<8x256xf32>
    %20 = vector.extract_strided_slice %3 {offsets = [0, 2, 2], sizes = [8, 16, 16], strides = [1, 1, 1]} : vector<8x18x18xf32> to vector<8x16x16xf32>
    %21 = vector.shape_cast %20 : vector<8x16x16xf32> to vector<8x256xf32>
    %22 = tpu.concatenate %5, %7, %9, %11, %13, %15, %17, %19, %21 in 0 : vector<8x256xf32>, vector<8x256xf32>, vector<8x256xf32>, vector<8x256xf32>, vector<8x256xf32>, vector<8x256xf32>, vector<8x256xf32>, vector<8x256xf32>, vector<8x256xf32> -> vector<72x256xf32>
    %23 = vector.extract_strided_slice %0 {offsets = [1, 0, 0, 0], sizes = [1, 8, 18, 18], strides = [1, 1, 1, 1]} : vector<2x8x18x18xf32> to vector<1x8x18x18xf32>
    %24 = vector.shape_cast %23 : vector<1x8x18x18xf32> to vector<8x18x18xf32>
    %25 = vector.extract_strided_slice %24 {offsets = [0, 0, 0], sizes = [8, 16, 16], strides = [1, 1, 1]} : vector<8x18x18xf32> to vector<8x16x16xf32>
    %26 = vector.shape_cast %25 : vector<8x16x16xf32> to vector<8x256xf32>
    %27 = vector.extract_strided_slice %24 {offsets = [0, 0, 1], sizes = [8, 16, 16], strides = [1, 1, 1]} : vector<8x18x18xf32> to vector<8x16x16xf32>
    %28 = vector.shape_cast %27 : vector<8x16x16xf32> to vector<8x256xf32>
    %29 = vector.extract_strided_slice %24 {offsets = [0, 0, 2], sizes = [8, 16, 16], strides = [1, 1, 1]} : vector<8x18x18xf32> to vector<8x16x16xf32>
    %30 = vector.shape_cast %29 : vector<8x16x16xf32> to vector<8x256xf32>
    %31 = vector.extract_strided_slice %24 {offsets = [0, 1, 0], sizes = [8, 16, 16], strides = [1, 1, 1]} : vector<8x18x18xf32> to vector<8x16x16xf32>
    %32 = vector.shape_cast %31 : vector<8x16x16xf32> to vector<8x256xf32>
    %33 = vector.extract_strided_slice %24 {offsets = [0, 1, 1], sizes = [8, 16, 16], strides = [1, 1, 1]} : vector<8x18x18xf32> to vector<8x16x16xf32>
    %34 = vector.shape_cast %33 : vector<8x16x16xf32> to vector<8x256xf32>
    %35 = vector.extract_strided_slice %24 {offsets = [0, 1, 2], sizes = [8, 16, 16], strides = [1, 1, 1]} : vector<8x18x18xf32> to vector<8x16x16xf32>
    %36 = vector.shape_cast %35 : vector<8x16x16xf32> to vector<8x256xf32>
    %37 = vector.extract_strided_slice %24 {offsets = [0, 2, 0], sizes = [8, 16, 16], strides = [1, 1, 1]} : vector<8x18x18xf32> to vector<8x16x16xf32>
    %38 = vector.shape_cast %37 : vector<8x16x16xf32> to vector<8x256xf32>
    %39 = vector.extract_strided_slice %24 {offsets = [0, 2, 1], sizes = [8, 16, 16], strides = [1, 1, 1]} : vector<8x18x18xf32> to vector<8x16x16xf32>
    %40 = vector.shape_cast %39 : vector<8x16x16xf32> to vector<8x256xf32>
    %41 = vector.extract_strided_slice %24 {offsets = [0, 2, 2], sizes = [8, 16, 16], strides = [1, 1, 1]} : vector<8x18x18xf32> to vector<8x16x16xf32>
    %42 = vector.shape_cast %41 : vector<8x16x16xf32> to vector<8x256xf32>
    %43 = tpu.concatenate %26, %28, %30, %32, %34, %36, %38, %40, %42 in 0 : vector<8x256xf32>, vector<8x256xf32>, vector<8x256xf32>, vector<8x256xf32>, vector<8x256xf32>, vector<8x256xf32>, vector<8x256xf32>, vector<8x256xf32>, vector<8x256xf32> -> vector<72x256xf32>
    %44 = tpu.concatenate %22, %43 in 1 : vector<72x256xf32>, vector<72x256xf32> -> vector<72x512xf32>
    %cst = arith.constant dense<0.000000e+00> : vector<8x512xf32>
    %45 = tpu.matmul %1, %44, %cst {dimension_numbers = #tpu.dot_dimension_numbers<[1], [0], [0], [1], [0, 0, 1, 1], [], []>} : vector<8x72xf32>, vector<72x512xf32>, vector<8x512xf32> -> vector<8x512xf32>
    %c0_5 = arith.constant 0 : index
    %c0_6 = arith.constant 0 : index
    %46 = vector.load %arg3[%c0_5, %c0_6] : memref<8x1xf32, #tpu.memory_space<vmem>>, vector<8x1xf32>
    %47 = vector.broadcast %46 : vector<8x1xf32> to vector<8x512xf32>
    %48 = arith.addf %45, %47 : vector<8x512xf32>
    %49 = vector.extract_strided_slice %48 {offsets = [0, 0], sizes = [8, 256], strides = [1, 1]} : vector<8x512xf32> to vector<8x256xf32>
    %c0_7 = arith.constant 0 : index
    %c0_8 = arith.constant 0 : index
    %c0_9 = arith.constant 0 : index
    %50 = vector.load %arg4[%c0_7, %c0_8, %c0_9] : memref<2x8x256xf32, #tpu.memory_space<vmem>>, vector<1x8x256xf32>
    %51 = vector.shape_cast %50 : vector<1x8x256xf32> to vector<8x256xf32>
    %52 = vector.shape_cast %49 : vector<8x256xf32> to vector<1x8x256xf32>
    tpu.vector_store %arg4[%c0_7, %c0_8, %c0_9], %52 {strides = array<i32>} : memref<2x8x256xf32, #tpu.memory_space<vmem>>, vector<1x8x256xf32>,
    %53 = vector.extract_strided_slice %48 {offsets = [0, 256], sizes = [8, 256], strides = [1, 1]} : vector<8x512xf32> to vector<8x256xf32>
    %c1 = arith.constant 1 : index
    %c0_10 = arith.constant 0 : index
    %c0_11 = arith.constant 0 : index
    %54 = vector.load %arg4[%c1, %c0_10, %c0_11] : memref<2x8x256xf32, #tpu.memory_space<vmem>>, vector<1x8x256xf32>
    %55 = vector.shape_cast %54 : vector<1x8x256xf32> to vector<8x256xf32>
    %56 = vector.shape_cast %53 : vector<8x256xf32> to vector<1x8x256xf32>
    tpu.vector_store %arg4[%c1, %c0_10, %c0_11], %56 {strides = array<i32>} : memref<2x8x256xf32, #tpu.memory_space<vmem>>, vector<1x8x256xf32>,
    return
  }
  func.func @transform_0(%arg0: i32) -> (i32, i32, i32, i32) {
    %c0_i32 = arith.constant 0 : i32
    %c0_i32_0 = arith.constant 0 : i32
    %c0_i32_1 = arith.constant 0 : i32
    %c0_i32_2 = arith.constant 0 : i32
    %c0_i32_3 = arith.constant 0 : i32
    return %c0_i32, %c0_i32_0, %c0_i32_1, %c0_i32_2 : i32, i32, i32, i32
  }
  func.func @transform_1(%arg0: i32) -> (i32, i32) {
    %c0_i32 = arith.constant 0 : i32
    %c0_i32_0 = arith.constant 0 : i32
    %c0_i32_1 = arith.constant 0 : i32
    return %c0_i32, %c0_i32_0 : i32, i32
  }
  func.func @transform_2(%arg0: i32) -> (i32, i32) {
    %c0_i32 = arith.constant 0 : i32
    %c0_i32_0 = arith.constant 0 : i32
    %c0_i32_1 = arith.constant 0 : i32
    return %c0_i32, %c0_i32_0 : i32, i32
  }
  func.func @transform_3(%arg0: i32) -> (i32, i32, i32) {
    %c0_i32 = arith.constant 0 : i32
    %c0_i32_0 = arith.constant 0 : i32
    %c0_i32_1 = arith.constant 0 : i32
    %c0_i32_2 = arith.constant 0 : i32
    return %c0_i32, %c0_i32_0, %c0_i32_1 : i32, i32, i32
  }
}

</mosaic_0001>

<bundles_post_ra>
// kernel: tpu_custom_call.1
= control target key start
LH: loop header
LB: loop body
LE: loop exit
PB: predicated region body
PF: predicated region fallthrough
CT: control target
= control target key end

     0   :  { %v69_v3 = vlaneseq  ;;  %s7947_s18 = smov 127   ;;  %v7948_v7 = vmov 1983009808   ;;  %v7949_v20 = vmov 1934713408   ;;  %s11816_s0 = inlined_call_operand.vmem [shape: f32[2,8,18,18], index: 0, kind: input, shape index: {}]   ;;  %s11817_s1 = inlined_call_operand.vmem [shape: f32[8,72], index: 1, kind: input, shape index: {}]   ;;  %s11818_s2 = inlined_call_operand.vmem [shape: f32[8,1], index: 2, kind: input, shape index: {}]   ;;  %s11819_s3 = inlined_call_operand.hbm [shape: f32[2,8,256], index: 3, kind: output, shape index: {}]  }
   0x1   :  { %v7985_v0 = vld [vmem:[%s11816_s0] sm:$0xff]  ;;  %v7990_v1 = vld [vmem:[%s11816_s0 + $0x8] sm:$0xff]  ;;  %v7995_v2 = vld [vmem:[%s11816_s0 + $0x18] sm:$0xff]  ;;  %v67_v8 = vunpack.c.l.s4 %v7948_v7  ;;  %v131_v21 = vunpack.c.l.s4 %v7949_v20 }
   0x2   :  { %429 = vrot.lane.b32.xlu1 %v7985_v0, %s7947_s18  ;;  %v8002_v4 = vld [vmem:[%s11816_s0 + $0x20] sm:$0xff]  ;;  %v8007_v5 = vld [vmem:[%s11816_s0 + $0x30] sm:$0xff]  ;;  %v8012_v6 = vld [vmem:[%s11816_s0 + $0x38] sm:$0xff]  ;;  %v70_v13 = vshrl.u32 %v69_v3, 7 }
   0x3   :  { %v8017_v9 = vld [vmem:[%s11816_s0 + $0x48] sm:$0xff]  ;;  %v8022_v10 = vld [vmem:[%s11816_s0 + $0x50] sm:$0xff]  ;;  %v8027_v11 = vld [vmem:[%s11816_s0 + $0x60] sm:$0xff]  ;;  %v64_v12 = vcombine.low %v7985_v0, %v8007_v5  ;;  %v200_v14 = vcombine.low %v7990_v1, %v8012_v6  ;;  %v68_v18 = vunpack.c.0.s8 %v67_v8  ;;  %v65_v26 = vcombine.high %v7985_v0, %v8007_v5 }
   0x4   :  { %v8036_v15 = vld [vmem:[%s11816_s0 + $0x68] sm:$0xff]  ;;  %v8041_v16 = vld [vmem:[%s11816_s0 + $0x78] sm:$0xff]  ;;  %v8046_v17 = vld [vmem:[%s11816_s0 + $0x80] sm:$0xff]  ;;  %v80_v19 = vcombine.low %v7995_v2, %v8017_v9  ;;  %v216_v22 = vcombine.low %v8002_v4, %v8022_v10  ;;  %v81_v27 = vcombine.high %v7995_v2, %v8017_v9  ;;  %v201_v28 = vcombine.high %v7990_v1, %v8012_v6 }
   0x5   :  { %v8055_v23 = vld [vmem:[%s11816_s0 + $0x90] sm:$0xff]  ;;  %v8060_v24 = vld [vmem:[%s11816_s0 + $0x98] sm:$0xff]  ;;  %v8065_v25 = vld [vmem:[%s11816_s0 + $0xa8] sm:$0xff]  ;;  %v217_v29 = vcombine.high %v8002_v4, %v8022_v10  ;;  %v8080_v31 = vsub.s32 %v68_v18, %v70_v13  ;;  %v132_v34 = vunpack.c.0.s8 %v131_v21 }
   0x6   :  { %v8078_v30 = vld [vmem:[%s11816_s0 + $0xb0] sm:$0xff]  ;;  %v96_v32 = vcombine.low %v8027_v11, %v8055_v23  ;;  %v112_v33 = vcombine.low %v8041_v16, %v8065_v25 }
   0x7   :  { %8 = vsyncpa [#allocation3], 0  ;;  %v232_v35 = vcombine.low %v8036_v15, %v8060_v24  ;;  %v248_v36 = vcombine.low %v8046_v17, %v8078_v30  ;;  %v97_v37 = vcombine.high %v8027_v11, %v8055_v23  ;;  %v113_v38 = vcombine.high %v8041_v16, %v8065_v25  ;;  %s7950_s19 = smov 48   ;;  %s7951_s20 = smov 16  }
   0x8   :  { %v72_v39 = vrot.slane %v64_v12, %v8080_v31  ;;  %v88_v40 = vrot.slane %v80_v19, %v8080_v31  ;;  %v104_v41 = vrot.slane %v96_v32, %v8080_v31  ;;  %v120_v42 = vrot.slane %v112_v33, %v8080_v31  ;;  %s7952_s21 = smov 32   ;;  %s7953_s26 = smov 64  }
   0x9   :  { %v8098_v43 = vsub.s32 %v132_v34, %v70_v13  ;;  %v208_v44 = vrot.slane %v200_v14, %v8080_v31  ;;  %v224_v45 = vrot.slane %v216_v22, %v8080_v31  ;;  %v240_v46 = vrot.slane %v232_v35, %v8080_v31  ;;  %s7954_s27 = smov 80   ;;  %s7955_s7 = smov 96  }
   0xa   :  { %v129_v47 = vcombine.high %v72_v39, %v88_v40  ;;  %v161_v48 = vcombine.high %v104_v41, %v120_v42  ;;  %v256_v49 = vrot.slane %v248_v36, %v8080_v31  ;;  %v128_v50 = vcombine.low %v72_v39, %v88_v40  ;;  %s7956_s8 = smov 112   ;;  %s7957_s15 = smov 126  }
   0xb   :  { %v265_v51 = vcombine.high %v208_v44, %v224_v45  ;;  %v160_v52 = vcombine.low %v104_v41, %v120_v42  ;;  %v264_v53 = vcombine.low %v208_v44, %v224_v45  ;;  %v79_v54 = vrot.slane %v65_v26, %v8080_v31 }
   0xc   :  { %v143_v55 = vrot.slane %v129_v47, %v8098_v43  ;;  %v175_v56 = vrot.slane %v161_v48, %v8098_v43  ;;  %v297_v57 = vcombine.high %v240_v46, %v256_v49  ;;  %v8108_v58 = vrot.slane %v128_v50, %v8098_v43 }
   0xd   :  { %v279_v59 = vrot.slane %v265_v51, %v8098_v43  ;;  %v8112_v60 = vrot.slane %v160_v52, %v8098_v43  ;;  %v8115_v61 = vrot.slane %v264_v53, %v8098_v43  ;;  %v296_v62 = vcombine.low %v240_v46, %v256_v49 }
   0xe   :  { %v195_v63 = vcombine.high %v143_v55, %v175_v56  ;;  %v311_v3 = vrot.slane %v297_v57, %v8098_v43  ;;  %v95_v7 = vrot.slane %v81_v27, %v8080_v31  ;;  %v111_v8 = vrot.slane %v97_v37, %v8080_v31 }
   0xf   :  { %v193_v12 = vcombine.high %v8108_v58, %v8112_v60  ;;  %v8123_v13 = vrot.slane %v296_v62, %v8098_v43  ;;  %v127_v18 = vrot.slane %v113_v38, %v8080_v31  ;;  %v215_v21 = vrot.slane %v201_v28, %v8080_v31 }
  0x10   :  { %v331_v19 = vcombine.high %v279_v59, %v311_v3  ;;  %v144_v20 = vcombine.low %v79_v54, %v95_v7  ;;  %v231_v22 = vrot.slane %v217_v29, %v8080_v31  ;;  %v233_v33 = vcombine.high %v8036_v15, %v8060_v24 }
  0x11   :  { %v329_v27 = vcombine.high %v8115_v61, %v8123_v13  ;;  %v176_v32 = vcombine.low %v111_v8, %v127_v18  ;;  %v249_v35 = vcombine.high %v8046_v17, %v8078_v30  ;;  %v194_v38 = vcombine.low %v143_v55, %v175_v56 }
  0x12   :  { %v7309_v34 = vpack.i.bf16 %v331_v19, %v195_v63  ;;  %v280_v36 = vcombine.low %v215_v21, %v231_v22  ;;  %v152_v28 = vrot.slane %v144_v20, %v8098_v43  ;;  %v247_v29 = vrot.slane %v233_v33, %v8080_v31  ;;  %v17_v19 = vld [vmem:[%s11816_s0 + $0x10] sm:$0x3]  ;;  %v20_v20 = vld [vmem:[%s11816_s0 + $0x28] sm:$0x3]  ;;  %v23_v33 = vld [vmem:[%s11816_s0 + $0x40] sm:$0x3] }
  0x13   :  { %v7299_v37 = vpack.i.bf16 %v329_v27, %v193_v12  ;;  %v184_v39 = vrot.slane %v176_v32, %v8098_v43  ;;  %v263_v40 = vrot.slane %v249_v35, %v8080_v31  ;;  %v330_v41 = vcombine.low %v279_v59, %v311_v3 }
  0x14   :  { %7310 = vrot.lane.b32.xlu1 %v7309_v34, %s7950_s19  ;;  %v145_v42 = vcombine.high %v79_v54, %v95_v7  ;;  %v288_v44 = vrot.slane %v280_v36, %v8098_v43  ;;  %v177_v45 = vcombine.high %v111_v8, %v127_v18  ;;  %v281_v46 = vcombine.high %v215_v21, %v231_v22  ;;  %v26_v34 = vld [vmem:[%s11816_s0 + $0x58] sm:$0x3] }
  0x15   :  { %7300 = vrot.lane.b32.xlu0 %v7299_v37, %s7951_s20  ;;  %v312_v47 = vcombine.low %v247_v29, %v263_v40  ;;  %v7304_v48 = vpack.i.bf16 %v330_v41, %v194_v38  ;;  %v313_v50 = vcombine.high %v247_v29, %v263_v40  ;;  %v196_v53 = vcombine.low %v152_v28, %v184_v39  ;;  %v32_v41 = vld [vmem:[%s11816_s0 + $0x88] sm:$0x3] }
  0x16   :  { %v159_v49 = vrot.slane %v145_v42, %v8098_v43  ;;  %v191_v51 = vrot.slane %v177_v45, %v8098_v43  ;;  %v295_v52 = vrot.slane %v281_v46, %v8098_v43  ;;  %v197_v56 = vcombine.high %v152_v28, %v184_v39  ;;  %v29_v28 = vld [vmem:[%s11816_s0 + $0x70] sm:$0x3] }
  0x17   :  { %v320_v55 = vrot.slane %v312_v47, %v8098_v43  ;;  %v327_v54 = vrot.slane %v313_v50, %v8098_v43  ;;  %v1218_v18 = vrot.slane %v7985_v0, 1  ;;  %v1219_v27 = vrot.slane %v7990_v1, 1 }
  0x18   :  { %v198_v57 = vcombine.low %v159_v49, %v191_v51  ;;  %v199_v59 = vcombine.high %v159_v49, %v191_v51  ;;  %v1221_v32 = vrot.slane %v17_v19, 1  ;;  %vm1217_vm0 = vcmask 1046528   ;;  %v35_v51 = vld [vmem:[%s11816_s0 + $0xa0] sm:$0x3] }
  0x19   :  { %7305 = vrot.lane.b32.xlu0 %v7304_v48, %s7952_s21  ;;  %v332_v62 = vcombine.low %v288_v44, %v320_v55  ;;  %v334_v63 = vcombine.low %v295_v52, %v327_v54  ;;  %v333_v3 = vcombine.high %v288_v44, %v320_v55  ;;  %v335_v7 = vcombine.high %v295_v52, %v327_v54 }
  0x1a   :  { %v1223_v35 = vrot.slane %v7995_v2, 1  ;;  %v1224_v36 = vrot.slane %v8002_v4, 1  ;;  %v1226_v37 = vrot.slane %v20_v20, 1  ;;  %v8173_v29 = vsel %vm1217_vm0, %v1218_v18, %v1219_v27 }
  0x1b   :  { %v7314_v8 = vpack.i.bf16 %v332_v62, %v196_v53  ;;  %v7319_v12 = vpack.i.bf16 %v333_v3, %v197_v56  ;;  %v7324_v21 = vpack.i.bf16 %v334_v63, %v198_v57  ;;  %v7329_v22 = vpack.i.bf16 %v335_v7, %v199_v59  ;;  %11895 = vst [vmem:[#allocation5_spill] sm:$0xff] %v8173_v29  ;;  %v38_v56 = vld [vmem:[%s11816_s0 + $0xb8] sm:$0x3] }
  0x1c   :  { %v8176_v38 = vsel %vm1217_vm0, %v1219_v27, %v1221_v32  ;;  %v1228_v39 = vrot.slane %v8007_v5, 1  ;;  %v1229_v40 = vrot.slane %v8012_v6, 1  ;;  %v8186_v42 = vsel %vm1217_vm0, %v1223_v35, %v1224_v36 }
  0x1d   :  { %7315 = vrot.lane.b32.xlu1 %v7314_v8, %s7953_s26  ;;  %7320 = vrot.lane.b32.xlu0 %v7319_v12, %s7954_s27  ;;  %11896 = vst [vmem:[#allocation6_spill] sm:$0xff] %v8176_v38  ;;  %11897 = vst [vmem:[#allocation7_spill] sm:$0xff] %v8186_v42  ;;  %v8189_v44 = vsel %vm1217_vm0, %v1224_v36, %v1226_v37  ;;  %v1231_v45 = vrot.slane %v23_v33, 1  ;;  %v1233_v46 = vrot.slane %v8017_v9, 1  ;;  %v1234_v48 = vrot.slane %v8022_v10, 1 }
  0x1e   :  { %11898 = vst [vmem:[#allocation8_spill] sm:$0xff] %v8189_v44  ;;  %v8193_v47 = vsel %vm1217_vm0, %v1228_v39, %v1229_v40  ;;  %v1236_v49 = vrot.slane %v26_v34, 1  ;;  %v1238_v50 = vrot.slane %v8027_v11, 1  ;;  %v1239_v53 = vrot.slane %v8036_v15, 1 }
  0x1f   :  { %v8201_v52 = vsel %vm1217_vm0, %v1229_v40, %v1231_v45  ;;  %v1241_v55 = vrot.slane %v29_v28, 1  ;;  %v1243_v54 = vrot.slane %v8041_v16, 1  ;;  %v8209_v57 = vsel %vm1217_vm0, %v1233_v46, %v1234_v48 }
  0x20   :  { %v8212_v59 = vsel %vm1217_vm0, %v1234_v48, %v1236_v49  ;;  %v1244_v62 = vrot.slane %v8046_v17, 1  ;;  %v1246_v63 = vrot.slane %v32_v41, 1  ;;  %v8220_v3 = vsel %vm1217_vm0, %v1238_v50, %v1239_v53 }
  0x21   :  { %7325 = vrot.lane.b32.xlu1 %v7324_v21, %s7955_s7  ;;  %7330 = vrot.lane.b32.xlu0 %v7329_v22, %s7956_s8  ;;  %v8223_v7 = vsel %vm1217_vm0, %v1239_v53, %v1241_v55  ;;  %v1248_v8 = vrot.slane %v8055_v23, 1  ;;  %v1249_v12 = vrot.slane %v8060_v24, 1  ;;  %v1251_v20 = vrot.slane %v35_v51, 1 }
  0x22   :  { %v8228_v18 = vsel %vm1217_vm0, %v1243_v54, %v1244_v62  ;;  %v8231_v19 = vsel %vm1217_vm0, %v1244_v62, %v1246_v63  ;;  %v1253_v21 = vrot.slane %v8065_v25, 1  ;;  %v1254_v27 = vrot.slane %v8078_v30, 1 }
  0x23   :  { %v8235_v22 = vsel %vm1217_vm0, %v1248_v8, %v1249_v12  ;;  %v1256_v32 = vrot.slane %v38_v56, 1  ;;  %v1274_v33 = vcombine.low %v8173_v29, %v8193_v47  ;;  %v8241_v34 = vsel %vm1217_vm0, %v1249_v12, %v1251_v20 }
  0x24   :  { %v1290_v35 = vcombine.low %v8186_v42, %v8209_v57  ;;  %v1306_v36 = vcombine.low %v8220_v3, %v8235_v22  ;;  %v1410_v37 = vcombine.low %v8176_v38, %v8201_v52  ;;  %v8254_v28 = vsel %vm1217_vm0, %v1253_v21, %v1254_v27 }
  0x25   :  { %433 = vrot.lane.b32.xlu1 %v7995_v2, %s7947_s18  ;;  %431 = vrot.lane.b32.xlu0 %v7990_v1, %s7947_s18  ;;  %v8257_v39 = vsel %vm1217_vm0, %v1254_v27, %v1256_v32  ;;  %v8260_v40 = vrot.slane %v1274_v33, %v8080_v31  ;;  %v1322_v46 = vcombine.low %v8228_v18, %v8254_v28  ;;  %vm392_vm1 = vcmask 130048  }
  0x26   :  { %v8263_v41 = vrot.slane %v1290_v35, %v8080_v31  ;;  %v8266_v45 = vrot.slane %v1306_v36, %v8080_v31  ;;  %v8271_v48 = vrot.slane %v1410_v37, %v8080_v31  ;;  %v1426_v49 = vcombine.low %v8189_v44, %v8212_v59 }
  0x27   :  { %v1442_v50 = vcombine.low %v8223_v7, %v8241_v34  ;;  %v1458_v51 = vcombine.low %v8231_v19, %v8257_v39  ;;  %v1330_v53 = vrot.slane %v1322_v46, %v8080_v31  ;;  %v1459_v36 = vcombine.high %v8231_v19, %v8257_v39 }
  0x28   :  { %v1338_v55 = vcombine.low %v8260_v40, %v8263_v41  ;;  %v1434_v54 = vrot.slane %v1426_v49, %v8080_v31  ;;  %v1339_v37 = vcombine.high %v8260_v40, %v8263_v41  ;;  %vm394_vm2 = vcmask 261120  }
  0x29   :  { %437 = vrot.lane.b32.xlu1 %v8007_v5, %s7947_s18  ;;  %435 = vrot.lane.b32.xlu0 %v8002_v4, %s7947_s18  ;;  %v1450_v56 = vrot.slane %v1442_v50, %v8080_v31  ;;  %v1466_v62 = vrot.slane %v1458_v51, %v8080_v31  ;;  %v1370_v63 = vcombine.low %v8266_v45, %v1330_v53  ;;  %vm396_vm3 = vcmask 392192  }
  0x2a   :  { %v1474_v8 = vcombine.low %v8271_v48, %v1434_v54  ;;  %v8292_v20 = vrot.slane %v1338_v55, %v8098_v43  ;;  %v1371_v46 = vcombine.high %v8266_v45, %v1330_v53  ;;  %v1475_v49 = vcombine.high %v8271_v48, %v1434_v54 }
  0x2b   :  { %v1506_v12 = vcombine.low %v1450_v56, %v1466_v62  ;;  %v8295_v21 = vrot.slane %v1370_v63, %v8098_v43  ;;  %v1473_v45 = vrot.slane %v1459_v36, %v8080_v31  ;;  %v1353_v48 = vrot.slane %v1339_v37, %v8098_v43 }
  0x2c   :  { %11899 = vst [vmem:[#allocation9_spill] sm:$0xff] %v8292_v20  ;;  %v8302_v27 = vrot.slane %v1474_v8, %v8098_v43  ;;  %v1385_v53 = vrot.slane %v1371_v46, %v8098_v43  ;;  %v1489_v54 = vrot.slane %v1475_v49, %v8098_v43  ;;  %vm398_vm4 = vcmask 523264  }
  0x2d   :  { %441 = vrot.lane.b32.xlu1 %v8017_v9, %s7947_s18  ;;  %439 = vrot.lane.b32.xlu0 %v8012_v6, %s7947_s18  ;;  %11900 = vst [vmem:[#allocation10_spill] sm:$0xff] %v8295_v21  ;;  %v8305_v32 = vrot.slane %v1506_v12, %v8098_v43  ;;  %vm400_vm5 = vcmask 654336   ;;  %vm402_vm6 = vcmask 785408   ;;  %vm404_vm7 = vcmask 916480  }
  0x2e   :  { %11901 = vst [vmem:[#allocation11_spill] sm:$0xff] %v8302_v27  ;;  %vm2396_vm8 = vcmask 1045504   ;;  %vm7083_vm9 = vcmask 588800  }
  0x2f   :  { %11902 = vst [vmem:[#allocation12_spill] sm:$0xff] %v8305_v32 }
  0x31   :  { %445 = vrot.lane.b32.xlu1 %v8027_v11, %s7947_s18  ;;  %443 = vrot.lane.b32.xlu0 %v8022_v10, %s7947_s18 }
  0x35   :  { %449 = vrot.lane.b32.xlu1 %v8041_v16, %s7947_s18  ;;  %447 = vrot.lane.b32.xlu0 %v8036_v15, %s7947_s18 }
  0x39   :  { %453 = vrot.lane.b32.xlu1 %v8055_v23, %s7947_s18  ;;  %451 = vrot.lane.b32.xlu0 %v8046_v17, %s7947_s18 }
  0x3d   :  { %457 = vrot.lane.b32.xlu1 %v8065_v25, %s7947_s18  ;;  %455 = vrot.lane.b32.xlu0 %v8060_v24, %s7947_s18 }
  0x41   :  { %821 = vrot.lane.b32.xlu1 %v7990_v1, %s7957_s15  ;;  %459 = vrot.lane.b32.xlu0 %v8078_v30, %s7947_s18  ;;  %v1275_v1 = vcombine.high %v8173_v29, %v8193_v47 }
  0x43   :  { %v1289_v50 = vrot.slane %v1275_v1, %v8080_v31 }
  0x45   :  { %825 = vrot.lane.b32.xlu1 %v8002_v4, %s7957_s15  ;;  %819 = vrot.lane.b32.xlu0 %v7985_v0, %s7957_s15  ;;  %v1291_v4 = vcombine.high %v8186_v42, %v8209_v57  ;;  %v1307_v0 = vcombine.high %v8220_v3, %v8235_v22 }
  0x47   :  { %v1321_v51 = vrot.slane %v1307_v0, %v8080_v31  ;;  %v1404_v0 = vcombine.low %v1353_v48, %v1385_v53 }
  0x49   :  { %829 = vrot.lane.b32.xlu1 %v8012_v6, %s7957_s15  ;;  %823 = vrot.lane.b32.xlu0 %v7995_v2, %s7957_s15  ;;  %v1323_v6 = vcombine.high %v8228_v18, %v8254_v28  ;;  %v1411_v2 = vcombine.high %v8176_v38, %v8201_v52 }
  0x4b   :  { %v1337_v55 = vrot.slane %v1323_v6, %v8080_v31  ;;  %v1425_v63 = vrot.slane %v1411_v2, %v8080_v31 }
  0x4d   :  { %833 = vrot.lane.b32.xlu1 %v8022_v10, %s7957_s15  ;;  %827 = vrot.lane.b32.xlu0 %v8007_v5, %s7957_s15  ;;  %v1427_v5 = vcombine.high %v8189_v44, %v8212_v59  ;;  %v1443_v10 = vcombine.high %v8223_v7, %v8241_v34  ;;  %v1386_v8 = vcombine.low %v1321_v51, %v1337_v55 }
  0x4e   :  { %v1387_v37 = vcombine.high %v1321_v51, %v1337_v55 }
  0x4f   :  { %v1441_v40 = vrot.slane %v1427_v5, %v8080_v31  ;;  %v1457_v41 = vrot.slane %v1443_v10, %v8080_v31  ;;  %v1394_v10 = vrot.slane %v1386_v8, %v8098_v43 }
  0x51   :  { %837 = vrot.lane.b32.xlu1 %v8036_v15, %s7957_s15  ;;  %831 = vrot.lane.b32.xlu0 %v8017_v9, %s7957_s15  ;;  %v1507_v15 = vcombine.high %v1450_v56, %v1466_v62  ;;  %v1305_v9 = vrot.slane %v1291_v4, %v8080_v31  ;;  %v1490_v12 = vcombine.low %v1425_v63, %v1441_v40 }
  0x52   :  { %v1522_v1 = vcombine.low %v1457_v41, %v1473_v45  ;;  %v1405_v4 = vcombine.high %v1353_v48, %v1385_v53  ;;  %v1491_v46 = vcombine.high %v1425_v63, %v1441_v40 }
  0x53   :  { %v1521_v56 = vrot.slane %v1507_v15, %v8098_v43  ;;  %v1354_v62 = vcombine.low %v1289_v50, %v1305_v9  ;;  %v1355_v36 = vcombine.high %v1289_v50, %v1305_v9  ;;  %v1498_v49 = vrot.slane %v1490_v12, %v8098_v43 }
  0x54   :  { %v1530_v15 = vrot.slane %v1522_v1, %v8098_v43  ;;  %v1401_v50 = vrot.slane %v1387_v37, %v8098_v43  ;;  %v1505_v9 = vrot.slane %v1491_v46, %v8098_v43 }
  0x55   :  { %841 = vrot.lane.b32.xlu1 %v8046_v17, %s7957_s15  ;;  %835 = vrot.lane.b32.xlu0 %v8027_v11, %s7957_s15  ;;  %v1403_v17 = vcombine.high %v8292_v20, %v8295_v21  ;;  %v1539_v11 = vcombine.high %v8302_v27, %v8305_v32  ;;  %v1541_v6 = vcombine.high %v1489_v54, %v1521_v56 }
  0x56   :  { %v1540_v2 = vcombine.low %v1489_v54, %v1521_v56  ;;  %v1362_v5 = vrot.slane %v1354_v62, %v8098_v43  ;;  %v1369_v56 = vrot.slane %v1355_v36, %v8098_v43  ;;  %v1542_v55 = vcombine.low %v1498_v49, %v1530_v15 }
  0x57   :  { %v7344_v48 = vpack.i.bf16 %v1541_v6, %v1405_v4 }
  0x58   :  { %v7339_v53 = vpack.i.bf16 %v1540_v2, %v1404_v0  ;;  %v1407_v54 = vcombine.high %v1362_v5, %v1394_v10  ;;  %v1409_v63 = vcombine.high %v1369_v56, %v1401_v50 }
  0x59   :  { %845 = vrot.lane.b32.xlu1 %v8060_v24, %s7957_s15  ;;  %839 = vrot.lane.b32.xlu0 %v8041_v16, %s7957_s15  ;;  %v1523_v24 = vcombine.high %v1457_v41, %v1473_v45  ;;  %v7334_v16 = vpack.i.bf16 %v1539_v11, %v1403_v17  ;;  %v1408_v41 = vcombine.low %v1369_v56, %v1401_v50 }
  0x5b   :  { %v1537_v51 = vrot.slane %v1523_v24, %v8098_v43 }
  0x5d   :  { %849 = vrot.lane.b32.xlu1 %v8078_v30, %s7957_s15  ;;  %843 = vrot.lane.b32.xlu0 %v8055_v23, %s7957_s15  ;;  %v1543_v23 = vcombine.high %v1498_v49, %v1530_v15  ;;  %v1406_v30 = vcombine.low %v1362_v5, %v1394_v10  ;;  %v1545_v40 = vcombine.high %v1505_v9, %v1537_v51 }
  0x5e   :  { %v1544_v8 = vcombine.low %v1505_v9, %v1537_v51 }
  0x5f   :  { %v7354_v45 = vpack.i.bf16 %v1543_v23, %v1407_v54  ;;  %v7349_v62 = vpack.i.bf16 %v1542_v55, %v1406_v30 }
  0x60   :  { %v7359_v17 = vpack.i.bf16 %v1544_v8, %v1408_v41 }
  0x61   :  { %847 = vrot.lane.b32.xlu0 %v8065_v25, %s7957_s15  ;;  %7335 = vrot.lane.b32.xlu1 %v7334_v16, %s7951_s20  ;;  %v7364_v25 = vpack.i.bf16 %v1545_v40, %v1409_v63 }
  0x65   :  { %7345 = vrot.lane.b32.xlu1 %v7344_v48, %s7950_s19  ;;  %7340 = vrot.lane.b32.xlu0 %v7339_v53, %s7952_s21 }
  0x69   :  { %7355 = vrot.lane.b32.xlu1 %v7354_v45, %s7954_s27  ;;  %7350 = vrot.lane.b32.xlu0 %v7349_v62, %s7953_s26 }
  0x6d   :  { %7365 = vrot.lane.b32.xlu1 %v7364_v25, %s7956_s8  ;;  %7360 = vrot.lane.b32.xlu0 %v7359_v17, %s7955_s7 }
  0x71   :  { %1618 = vrot.lane.b32.xlu1 %v8176_v38, %s7947_s18  ;;  %1616 = vrot.lane.b32.xlu0 %v8173_v29, %s7947_s18 }
  0x74   :  { %v430_v11 = vpop.permute.xlu1 %429 }
  0x75   :  { %1622 = vrot.lane.b32.xlu1 %v8189_v44, %s7947_s18  ;;  %1620 = vrot.lane.b32.xlu0 %v8186_v42, %s7947_s18 }
  0x86   :  { %v8418_v1 = vpop.permute.xlu1 %7310 }
  0x87   :  { %v8416_v12 = vpop.permute.xlu0 %7300 }
  0x8b   :  { %v8420_v4 = vpop.permute.xlu0 %7305 }
  0x8f   :  { %v8422_v0 = vpop.permute.xlu1 %7315  ;;  %v8424_v6 = vpop.permute.xlu0 %7320 }
  0x93   :  { %v8426_v2 = vpop.permute.xlu1 %7325  ;;  %v8428_v5 = vpop.permute.xlu0 %7330 }
  0x94   :  { %11903 = vst [vmem:[#allocation13_spill] sm:$0xff] %v8428_v5 }
  0x97   :  { %v434_v10 = vpop.permute.xlu1 %433  ;;  %v432_v36 = vpop.permute.xlu0 %431 }
  0x9b   :  { %v438_v37 = vpop.permute.xlu1 %437  ;;  %v436_v46 = vpop.permute.xlu0 %435 }
  0x9c   :  { %v477_v56 = vcombine.low %v430_v11, %v438_v37  ;;  %v478_v51 = vcombine.high %v430_v11, %v438_v37 }
  0x9e   :  { %v485_v40 = vrot.slane %v477_v56, %v8080_v31  ;;  %v8433_v35 = vrot.slane %v478_v51, %v8080_v31 }
  0x9f   :  { %v442_v24 = vpop.permute.xlu1 %441  ;;  %v440_v16 = vpop.permute.xlu0 %439 }
  0xa0   :  { %v493_v54 = vcombine.low %v434_v10, %v442_v24  ;;  %v494_v23 = vcombine.high %v434_v10, %v442_v24  ;;  %v613_v41 = vcombine.low %v432_v36, %v440_v16  ;;  %v614_v45 = vcombine.high %v432_v36, %v440_v16 }
  0xa2   :  { %v501_v30 = vrot.slane %v493_v54, %v8080_v31  ;;  %v8436_v14 = vrot.slane %v494_v23, %v8080_v31  ;;  %v621_v36 = vrot.slane %v613_v41, %v8080_v31 }
  0xa3   :  { %v446_v49 = vpop.permute.xlu1 %445  ;;  %v444_v15 = vpop.permute.xlu0 %443 }
  0xa4   :  { %v629_v55 = vcombine.low %v436_v46, %v444_v15  ;;  %v630_v25 = vcombine.high %v436_v46, %v444_v15  ;;  %v541_v11 = vcombine.low %v485_v40, %v501_v30  ;;  %v628_v46 = vrot.slane %v614_v45, %v8080_v31 }
  0xa6   :  { %v637_v10 = vrot.slane %v629_v55, %v8080_v31  ;;  %v644_v51 = vrot.slane %v630_v25, %v8080_v31 }
  0xa7   :  { %v450_v48 = vpop.permute.xlu1 %449  ;;  %v448_v53 = vpop.permute.xlu0 %447 }
  0xa8   :  { %v677_v41 = vcombine.low %v621_v36, %v637_v10  ;;  %v678_v26 = vcombine.high %v621_v36, %v637_v10  ;;  %v693_v25 = vcombine.low %v628_v46, %v644_v51 }
  0xab   :  { %v454_v50 = vpop.permute.xlu1 %453  ;;  %v452_v9 = vpop.permute.xlu0 %451 }
  0xac   :  { %v509_v63 = vcombine.low %v446_v49, %v454_v50  ;;  %v510_v37 = vcombine.high %v446_v49, %v454_v50  ;;  %v542_v49 = vcombine.high %v485_v40, %v501_v30 }
  0xae   :  { %v517_v24 = vrot.slane %v509_v63, %v8080_v31  ;;  %v524_v45 = vrot.slane %v510_v37, %v8080_v31  ;;  %v8475_v37 = vrot.slane %v677_v41, %v8098_v43 }
  0xaf   :  { %v458_v62 = vpop.permute.xlu1 %457  ;;  %v456_v8 = vpop.permute.xlu0 %455 }
  0xb0   :  { %v525_v17 = vcombine.low %v450_v48, %v458_v62  ;;  %v526_v33 = vcombine.high %v450_v48, %v458_v62  ;;  %v645_v15 = vcombine.low %v448_v53, %v456_v8  ;;  %v646_v48 = vcombine.high %v448_v53, %v456_v8 }
  0xb2   :  { %v533_v54 = vrot.slane %v525_v17, %v8080_v31  ;;  %v540_v23 = vrot.slane %v526_v33, %v8080_v31  ;;  %v8448_v17 = vrot.slane %v541_v11, %v8098_v43  ;;  %v653_v53 = vrot.slane %v645_v15, %v8080_v31 }
  0xb3   :  { %v8443_v16 = vpop.permute.xlu1 %821  ;;  %v460_v56 = vpop.permute.xlu0 %459  ;;  %v660_v8 = vrot.slane %v646_v48, %v8080_v31  ;;  %v694_v48 = vcombine.high %v628_v46, %v644_v51 }
  0xb4   :  { %v573_v62 = vcombine.low %v517_v24, %v533_v54  ;;  %v574_v55 = vcombine.high %v517_v24, %v533_v54  ;;  %v661_v50 = vcombine.low %v452_v9, %v460_v56  ;;  %v662_v63 = vcombine.high %v452_v9, %v460_v56 }
  0xb5   :  { %v589_v11 = vcombine.low %v524_v45, %v540_v23  ;;  %v557_v24 = vcombine.low %v8433_v35, %v8436_v14  ;;  %v590_v46 = vcombine.high %v524_v45, %v540_v23  ;;  %v708_v20 = vrot.slane %v694_v48, %v8098_v43 }
  0xb6   :  { %v8452_v44 = vrot.slane %v573_v62, %v8098_v43  ;;  %v669_v30 = vrot.slane %v661_v50, %v8080_v31  ;;  %v676_v9 = vrot.slane %v662_v63, %v8080_v31  ;;  %v588_v10 = vrot.slane %v574_v55, %v8098_v43 }
  0xb7   :  { %v8456_v33 = vpop.permute.xlu1 %825  ;;  %v8460_v40 = vpop.permute.xlu0 %819  ;;  %v556_v62 = vrot.slane %v542_v49, %v8098_v43  ;;  %v692_v50 = vrot.slane %v678_v26, %v8098_v43  ;;  %v597_v49 = vrot.slane %v589_v11, %v8098_v43  ;;  %v701_v26 = vrot.slane %v693_v25, %v8098_v43 }
  0xb8   :  { %v709_v54 = vcombine.low %v653_v53, %v669_v30  ;;  %v710_v36 = vcombine.high %v653_v53, %v669_v30  ;;  %v725_v15 = vcombine.low %v660_v8, %v676_v9  ;;  %v726_v56 = vcombine.high %v660_v8, %v676_v9 }
  0xb9   :  { %v607_v51 = vcombine.low %v556_v62, %v588_v10  ;;  %v606_v30 = vcombine.high %v8448_v17, %v8452_v44  ;;  %v565_v23 = vrot.slane %v557_v24, %v8098_v43  ;;  %v608_v32 = vcombine.high %v556_v62, %v588_v10 }
  0xba   :  { %v724_v55 = vrot.slane %v710_v36, %v8098_v43  ;;  %v8478_v42 = vrot.slane %v709_v54, %v8098_v43  ;;  %v733_v53 = vrot.slane %v725_v15, %v8098_v43  ;;  %v558_v54 = vcombine.high %v8433_v35, %v8436_v14 }
  0xbb   :  { %v8469_v63 = vpop.permute.xlu1 %829  ;;  %v8471_v38 = vpop.permute.xlu0 %823  ;;  %v740_v45 = vrot.slane %v726_v56, %v8098_v43  ;;  %v609_v41 = vcombine.low %v565_v23, %v597_v49  ;;  %v604_v14 = vrot.slane %v590_v46, %v8098_v43 }
  0xbc   :  { %v743_v8 = vcombine.low %v692_v50, %v724_v55  ;;  %v742_v9 = vcombine.high %v8475_v37, %v8478_v42  ;;  %v745_v29 = vcombine.low %v701_v26, %v733_v53  ;;  %v744_v21 = vcombine.high %v692_v50, %v724_v55 }
  0xbd   :  { %v572_v5 = vrot.slane %v558_v54, %v8098_v43  ;;  %v610_v50 = vcombine.high %v565_v23, %v597_v49  ;;  %v748_v62 = vcombine.high %v708_v20, %v740_v45  ;;  %v1004_v49 = vcombine.high %v8443_v16, %v8469_v63 }
  0xbe   :  { %v7374_v25 = vpack.i.bf16 %v743_v8, %v607_v51  ;;  %v7369_v15 = vpack.i.bf16 %v742_v9, %v606_v30  ;;  %v7384_v27 = vpack.i.bf16 %v745_v29, %v609_v41  ;;  %v7379_v56 = vpack.i.bf16 %v744_v21, %v608_v32 }
  0xbf   :  { %v834_v11 = vpop.permute.xlu1 %833  ;;  %v828_v36 = vpop.permute.xlu0 %827  ;;  %v747_v51 = vcombine.low %v708_v20, %v740_v45  ;;  %v746_v8 = vcombine.high %v701_v26, %v733_v53  ;;  %v611_v48 = vcombine.low %v572_v5, %v604_v14  ;;  %v612_v29 = vcombine.high %v572_v5, %v604_v14 }
  0xc0   :  { %7375 = vrot.lane.b32.xlu0 %v7374_v25, %s7952_s21  ;;  %7370 = vrot.lane.b32.xlu1 %v7369_v15, %s7951_s20  ;;  %v1019_v46 = vcombine.low %v8456_v33, %v834_v11  ;;  %v1003_v21 = vcombine.low %v8443_v16, %v8469_v63  ;;  %v1020_v26 = vcombine.high %v8456_v33, %v834_v11 }
  0xc1   :  { %v7394_v9 = vpack.i.bf16 %v747_v51, %v611_v48  ;;  %v7389_v10 = vpack.i.bf16 %v746_v8, %v610_v50  ;;  %v7399_v53 = vpack.i.bf16 %v748_v62, %v612_v29  ;;  %v867_v23 = vcombine.low %v8460_v40, %v828_v36 }
  0xc2   :  { %v1027_v20 = vrot.slane %v1019_v46, %v8080_v31  ;;  %v1011_v5 = vrot.slane %v1003_v21, %v8080_v31  ;;  %v868_v45 = vcombine.high %v8460_v40, %v828_v36  ;;  %v8516_v33 = vrot.slane %v1004_v49, %v8080_v31 }
  0xc3   :  { %v838_v35 = vpop.permute.xlu1 %837  ;;  %v832_v24 = vpop.permute.xlu0 %831  ;;  %v8519_v11 = vrot.slane %v1020_v26, %v8080_v31  ;;  %v875_v36 = vrot.slane %v867_v23, %v8080_v31 }
  0xc4   :  { %7385 = vrot.lane.b32.xlu0 %v7384_v27, %s7953_s26  ;;  %7380 = vrot.lane.b32.xlu1 %v7379_v56, %s7950_s19  ;;  %v883_v41 = vcombine.low %v8471_v38, %v832_v24  ;;  %v884_v14 = vcombine.high %v8471_v38, %v832_v24  ;;  %v1067_v56 = vcombine.low %v1011_v5, %v1027_v20 }
  0xc5   :  { %v882_v38 = vrot.slane %v868_v45, %v8080_v31  ;;  %v1068_v29 = vcombine.high %v1011_v5, %v1027_v20 }
  0xc6   :  { %v891_v51 = vrot.slane %v883_v41, %v8080_v31 }
  0xc7   :  { %v842_v55 = vpop.permute.xlu1 %841  ;;  %v836_v30 = vpop.permute.xlu0 %835 }
  0xc8   :  { %7395 = vrot.lane.b32.xlu0 %v7394_v9, %s7955_s7  ;;  %7390 = vrot.lane.b32.xlu1 %v7389_v10, %s7954_s27  ;;  %v898_v9 = vrot.slane %v884_v14, %v8080_v31  ;;  %v932_v49 = vcombine.high %v875_v36, %v891_v51 }
  0xca   :  { %v947_v5 = vcombine.low %v882_v38, %v898_v9 }
  0xcb   :  { %v846_v27 = vpop.permute.xlu1 %845  ;;  %v840_v32 = vpop.permute.xlu0 %839 }
  0xcc   :  { %v1035_v54 = vcombine.low %v838_v35, %v846_v27  ;;  %7400 = vrot.lane.b32.xlu1 %v7399_v53, %s7956_s8  ;;  %v1036_v8 = vcombine.high %v838_v35, %v846_v27  ;;  %v8529_v27 = vrot.slane %v1067_v56, %v8098_v43  ;;  %v931_v53 = vcombine.low %v875_v36, %v891_v51 }
  0xcd   :  { %v948_v56 = vcombine.high %v882_v38, %v898_v9 }
  0xce   :  { %v1043_v48 = vrot.slane %v1035_v54, %v8080_v31  ;;  %v1050_v26 = vrot.slane %v1036_v8, %v8080_v31  ;;  %v946_v8 = vrot.slane %v932_v49, %v8098_v43  ;;  %v8548_v36 = vrot.slane %v931_v53, %v8098_v43 }
  0xcf   :  { %v850_v25 = vpop.permute.xlu1 %849  ;;  %v844_v15 = vpop.permute.xlu0 %843  ;;  %v1084_v53 = vcombine.high %v8516_v33, %v8519_v11 }
  0xd0   :  { %v1051_v16 = vcombine.low %v842_v55, %v850_v25  ;;  %v1052_v63 = vcombine.high %v842_v55, %v850_v25  ;;  %v899_v24 = vcombine.low %v836_v30, %v844_v15  ;;  %v900_v50 = vcombine.high %v836_v30, %v844_v15 }
  0xd1   :  { %v1083_v15 = vcombine.low %v8516_v33, %v8519_v11  ;;  %v1098_v33 = vrot.slane %v1084_v53, %v8098_v43 }
  0xd2   :  { %v1059_v40 = vrot.slane %v1051_v16, %v8080_v31  ;;  %v1066_v10 = vrot.slane %v1052_v63, %v8080_v31  ;;  %v907_v30 = vrot.slane %v899_v24, %v8080_v31  ;;  %v914_v54 = vrot.slane %v900_v50, %v8080_v31 }
  0xd3   :  { %v848_v55 = vpop.permute.xlu0 %847 }
  0xd4   :  { %v1099_v62 = vcombine.low %v1043_v48, %v1059_v40  ;;  %v1100_v46 = vcombine.high %v1043_v48, %v1059_v40  ;;  %v915_v21 = vcombine.low %v840_v32, %v848_v55  ;;  %v916_v35 = vcombine.high %v840_v32, %v848_v55 }
  0xd5   :  { %v1115_v32 = vcombine.low %v1050_v26, %v1066_v10  ;;  %v1082_v48 = vrot.slane %v1068_v29, %v8098_v43  ;;  %v1116_v55 = vcombine.high %v1050_v26, %v1066_v10  ;;  %v1091_v10 = vrot.slane %v1083_v15, %v8098_v43 }
  0xd6   :  { %v8533_v41 = vrot.slane %v1099_v62, %v8098_v43  ;;  %v923_v23 = vrot.slane %v915_v21, %v8080_v31  ;;  %v930_v20 = vrot.slane %v916_v35, %v8080_v31  ;;  %v1114_v45 = vrot.slane %v1100_v46, %v8098_v43 }
  0xd7   :  { %v955_v46 = vrot.slane %v947_v5, %v8098_v43  ;;  %v1123_v38 = vrot.slane %v1115_v32, %v8098_v43 }
  0xd8   :  { %v1131_v25 = vcombine.low %v8529_v27, %v8533_v41  ;;  %v963_v14 = vcombine.low %v907_v30, %v923_v23  ;;  %v964_v16 = vcombine.high %v907_v30, %v923_v23  ;;  %v979_v63 = vcombine.low %v914_v54, %v930_v20 }
  0xd9   :  { %v980_v51 = vcombine.high %v914_v54, %v930_v20  ;;  %v1133_v62 = vcombine.low %v1082_v48, %v1114_v45  ;;  %v1132_v21 = vcombine.high %v8529_v27, %v8533_v41  ;;  %v962_v20 = vrot.slane %v948_v56, %v8098_v43 }
  0xda   :  { %v978_v40 = vrot.slane %v964_v16, %v8098_v43  ;;  %v8551_v24 = vrot.slane %v963_v14, %v8098_v43  ;;  %v987_v50 = vrot.slane %v979_v63, %v8098_v43  ;;  %v1135_v5 = vcombine.low %v1091_v10, %v1123_v38 }
  0xdb   :  { %v994_v49 = vrot.slane %v980_v51, %v8098_v43  ;;  %v1134_v32 = vcombine.high %v1082_v48, %v1114_v45  ;;  %v1130_v14 = vrot.slane %v1116_v55, %v8098_v43  ;;  %v1136_v56 = vcombine.high %v1091_v10, %v1123_v38 }
  0xdc   :  { %v997_v9 = vcombine.low %v946_v8, %v978_v40  ;;  %v996_v29 = vcombine.high %v8548_v36, %v8551_v24  ;;  %v995_v35 = vcombine.low %v8548_v36, %v8551_v24  ;;  %v999_v54 = vcombine.low %v955_v46, %v987_v50 }
  0xdd   :  { %v998_v23 = vcombine.high %v946_v8, %v978_v40  ;;  %v1001_v16 = vcombine.low %v962_v20, %v994_v49  ;;  %v1000_v63 = vcombine.high %v955_v46, %v987_v50  ;;  %v1137_v51 = vcombine.low %v1098_v33, %v1130_v14  ;;  %v8600_v50 = vpop.permute.xlu1 %7335  ;;  %v8604_v46 = vpop.permute.xlu0 %7340 }
  0xde   :  { %v7409_v26 = vpack.i.bf16 %v1133_v62, %v997_v9  ;;  %v7404_v30 = vpack.i.bf16 %v1132_v21, %v996_v29  ;;  %v7419_v11 = vpack.i.bf16 %v1135_v5, %v999_v54  ;;  %v1002_v62 = vcombine.high %v962_v20, %v994_v49 }
  0xdf   :  { %v7414_v15 = vpack.i.bf16 %v1134_v32, %v998_v23  ;;  %v7429_v8 = vpack.i.bf16 %v1137_v51, %v1001_v16  ;;  %v7424_v40 = vpack.i.bf16 %v1136_v56, %v1000_v63  ;;  %v1138_v45 = vcombine.high %v1098_v33, %v1130_v14 }
  0xe0   :  { %7410 = vrot.lane.b32.xlu1 %v7409_v26, %s7952_s21  ;;  %7405 = vrot.lane.b32.xlu0 %v7404_v30, %s7951_s20  ;;  %v7303_v30 = vunpack.i.h.bf16 %v8416_v12  ;;  %v7302_v54 = vunpack.i.l.bf16 %v8416_v12  ;;  %v7308_v23 = vunpack.i.h.bf16 %v8420_v4  ;;  %v7307_v20 = vunpack.i.l.bf16 %v8420_v4 }
  0xe1   :  { %v7434_v48 = vpack.i.bf16 %v1138_v45, %v1002_v62  ;;  %v8602_v55 = vpop.permute.xlu1 %7345  ;;  %v8608_v9 = vpop.permute.xlu0 %7350  ;;  %v7313_v5 = vunpack.i.h.bf16 %v8418_v1  ;;  %v7312_v32 = vunpack.i.l.bf16 %v8418_v1  ;;  %v11904_v14 = vcombine.low %v8115_v61, %v8123_v13 }
  0xe2   :  { %v7318_v1 = vunpack.i.h.bf16 %v8422_v0  ;;  %v7317_v61 = vunpack.i.l.bf16 %v8422_v0  ;;  %v11907_v45 = vcombine.low %v8475_v37, %v8478_v42  ;;  %v7323_v0 = vunpack.i.h.bf16 %v8424_v6 }
  0xe3   :  { %v406_v33 = vsel %vm392_vm1, %v11904_v14, %v7303_v30 }
  0xe4   :  { %7420 = vrot.lane.b32.xlu1 %v7419_v11, %s7953_s26  ;;  %7415 = vrot.lane.b32.xlu0 %v7414_v15, %s7950_s19  ;;  %v11905_v11 = vcombine.low %v8108_v58, %v8112_v60  ;;  %v407_v4 = vsel %vm394_vm2, %v406_v33, %v7308_v23  ;;  %v7322_v23 = vunpack.i.l.bf16 %v8424_v6 }
  0xe5   :  { %v8606_v38 = vpop.permute.xlu1 %7355  ;;  %v8612_v21 = vpop.permute.xlu0 %7360  ;;  %v408_v60 = vsel %vm396_vm3, %v407_v4, %v7313_v5 }
  0xe6   :  { %v393_v12 = vsel %vm392_vm1, %v11905_v11, %v7302_v54  ;;  %v409_v5 = vsel %vm398_vm4, %v408_v60, %v7318_v1 }
  0xe7   :  { %v395_v15 = vsel %vm394_vm2, %v393_v12, %v7307_v20  ;;  %v410_v6 = vsel %vm400_vm5, %v409_v5, %v7323_v0 }
  0xe8   :  { %7430 = vrot.lane.b32.xlu1 %v7429_v8, %s7955_s7  ;;  %7425 = vrot.lane.b32.xlu0 %v7424_v40, %s7954_s27  ;;  %v397_v13 = vsel %vm396_vm3, %v395_v15, %v7312_v32  ;;  %v11906_v40 = vcombine.low %v8448_v17, %v8452_v44 }
  0xe9   :  { %v8610_v29 = vpop.permute.xlu1 %7365  ;;  %v8616_v10 = vpop.permute.xlu0 %1616  ;;  %v399_v44 = vsel %vm398_vm4, %v397_v13, %v7317_v61 }
  0xea   :  { %v401_v4 = vsel %vm400_vm5, %v399_v44, %v7322_v23 }
  0xec   :  { %1626 = vrot.lane.b32.xlu1 %v8201_v52, %s7947_s18  ;;  %7435 = vrot.lane.b32.xlu0 %v7434_v48, %s7956_s8 }
  0xed   :  { %v8614_v53 = vpop.permute.xlu1 %1618  ;;  %v8620_v26 = vpop.permute.xlu0 %1620 }
  0xf0   :  { %1630 = vrot.lane.b32.xlu1 %v8212_v59, %s7947_s18  ;;  %1624 = vrot.lane.b32.xlu0 %v8193_v47, %s7947_s18 }
  0xf1   :  { %v8618_v49 = vpop.permute.xlu1 %1622 }
  0xf4   :  { %1634 = vrot.lane.b32.xlu1 %v8223_v7, %s7947_s18  ;;  %1628 = vrot.lane.b32.xlu0 %v8209_v57, %s7947_s18 }
  0xf8   :  { %1638 = vrot.lane.b32.xlu1 %v8231_v19, %s7947_s18  ;;  %1632 = vrot.lane.b32.xlu0 %v8220_v3, %s7947_s18 }
  0xfc   :  { %1642 = vrot.lane.b32.xlu1 %v8241_v34, %s7947_s18  ;;  %1636 = vrot.lane.b32.xlu0 %v8228_v18, %s7947_s18 }
 0x100   :  { %1646 = vrot.lane.b32.xlu1 %v8257_v39, %s7947_s18  ;;  %1640 = vrot.lane.b32.xlu0 %v8235_v22, %s7947_s18 }
 0x104   :  { %1644 = vrot.lane.b32.xlu0 %v8254_v28, %s7947_s18 }
 0x132   :  { %v7371_v16 = vpop.permute.xlu1 %7370  ;;  %v7376_v63 = vpop.permute.xlu0 %7375 }
 0x133   :  { %v7373_v51 = vunpack.i.h.bf16 %v7371_v16  ;;  %v7372_v56 = vunpack.i.l.bf16 %v7371_v16  ;;  %v7378_v8 = vunpack.i.h.bf16 %v7376_v63  ;;  %v7377_v58 = vunpack.i.l.bf16 %v7376_v63 }
 0x134   :  { %v7328_v16 = vunpack.i.h.bf16 %v8426_v2  ;;  %v7327_v63 = vunpack.i.l.bf16 %v8426_v2 }
 0x135   :  { %v805_v62 = vsel %vm392_vm1, %v11906_v40, %v7372_v56  ;;  %v812_v48 = vsel %vm392_vm1, %v11907_v45, %v7373_v51 }
 0x136   :  { %v7381_v30 = vpop.permute.xlu1 %7380  ;;  %v7386_v54 = vpop.permute.xlu0 %7385  ;;  %v813_v17 = vsel %vm394_vm2, %v812_v48, %v7378_v8  ;;  %v806_v14 = vsel %vm394_vm2, %v805_v62, %v7377_v58  ;;  %v11908_v58 = vld [vmem:[#allocation13_spill] sm:$0xff]  ;;  %v403_v23 = vsel %vm402_vm6, %v401_v4, %v7327_v63 }
 0x137   :  { %v7383_v20 = vunpack.i.h.bf16 %v7381_v30  ;;  %v7382_v32 = vunpack.i.l.bf16 %v7381_v30  ;;  %v7388_v42 = vunpack.i.h.bf16 %v7386_v54  ;;  %v7387_v37 = vunpack.i.l.bf16 %v7386_v54  ;;  %v11912_v63 = vld [vmem:[#allocation9_spill] sm:$0xff] }
 0x138   :  { %v7333_v60 = vunpack.i.h.bf16 %v11908_v58  ;;  %v7332_v40 = vunpack.i.l.bf16 %v11908_v58  ;;  %v411_v54 = vsel %vm402_vm6, %v410_v6, %v7328_v16  ;;  %v11910_v6 = vld [vmem:[#allocation12_spill] sm:$0xff] }
 0x139   :  { %v807_v33 = vsel %vm396_vm3, %v806_v14, %v7382_v32  ;;  %v814_v11 = vsel %vm396_vm3, %v813_v17, %v7383_v20 }
 0x13a   :  { %v7396_v12 = vpop.permute.xlu0 %7395  ;;  %v7391_v15 = vpop.permute.xlu1 %7390  ;;  %v808_v1 = vsel %vm398_vm4, %v807_v33, %v7387_v37  ;;  %v815_v8 = vsel %vm398_vm4, %v814_v11, %v7388_v42  ;;  %v412_v32 = vsel %vm404_vm7, %v411_v54, %v7333_v60  ;;  %v405_v44 = vsel %vm404_vm7, %v403_v23, %v7332_v40 }
 0x13b   :  { %v7393_v51 = vunpack.i.h.bf16 %v7391_v15  ;;  %v7392_v56 = vunpack.i.l.bf16 %v7391_v15  ;;  %v7398_v61 = vunpack.i.h.bf16 %v7396_v12  ;;  %v7397_v13 = vunpack.i.l.bf16 %v7396_v12  ;;  %v11909_v15 = vld [vmem:[#allocation11_spill] sm:$0xff] }
 0x13c   :  { %v7338_v37 = vunpack.i.h.bf16 %v8600_v50  ;;  %v7337_v33 = vunpack.i.l.bf16 %v8600_v50  ;;  %v7343_v11 = vunpack.i.h.bf16 %v8604_v46  ;;  %v7342_v12 = vunpack.i.l.bf16 %v8604_v46 }
 0x13d   :  { %v816_v62 = vsel %vm400_vm5, %v815_v8, %v7393_v51  ;;  %v809_v45 = vsel %vm400_vm5, %v808_v1, %v7392_v56  ;;  %v11911_v4 = vcombine.low %v11909_v15, %v11910_v6  ;;  %v11913_v51 = vld [vmem:[#allocation10_spill] sm:$0xff]  ;;  %v7353_v60 = vunpack.i.h.bf16 %v8608_v9 }
 0x13e   :  { %v7401_v48 = vpop.permute.xlu1 %7400  ;;  %v817_v0 = vsel %vm402_vm6, %v816_v62, %v7398_v61  ;;  %v810_v20 = vsel %vm402_vm6, %v809_v45, %v7397_v13  ;;  %v11914_v56 = vcombine.low %v11912_v63, %v11913_v51  ;;  %v7348_v61 = vunpack.i.h.bf16 %v8602_v55 }
 0x13f   :  { %v7403_v30 = vunpack.i.h.bf16 %v7401_v48  ;;  %v7402_v2 = vunpack.i.l.bf16 %v7401_v48  ;;  %v1609_v16 = vsel %vm392_vm1, %v11911_v4, %v7338_v37  ;;  %v7347_v13 = vunpack.i.l.bf16 %v8602_v55 }
 0x140   :  { %v1602_v1 = vsel %vm392_vm1, %v11914_v56, %v7337_v33  ;;  %v1610_v50 = vsel %vm394_vm2, %v1609_v16, %v7343_v11  ;;  %v7352_v40 = vunpack.i.l.bf16 %v8608_v9  ;;  %v7358_v9 = vunpack.i.h.bf16 %v8606_v38 }
 0x141   :  { %v818_v5 = vsel %vm404_vm7, %v817_v0, %v7403_v30  ;;  %v811_v17 = vsel %vm404_vm7, %v810_v20, %v7402_v2  ;;  %v1603_v8 = vsel %vm394_vm2, %v1602_v1, %v7342_v12  ;;  %v1611_v30 = vsel %vm396_vm3, %v1610_v50, %v7348_v61 }
 0x142   :  { %v7252_v14 = vpack.c.bf16 %v818_v5, %v412_v32  ;;  %v7254_v42 = vpack.c.bf16 %v811_v17, %v405_v44  ;;  %v1604_v48 = vsel %vm396_vm3, %v1603_v8, %v7347_v13  ;;  %v7357_v23 = vunpack.i.l.bf16 %v8606_v38 }
 0x143   :  { %v1605_v5 = vsel %vm398_vm4, %v1604_v48, %v7352_v40  ;;  %v1612_v44 = vsel %vm398_vm4, %v1611_v30, %v7353_v60  ;;  %v7363_v38 = vunpack.i.h.bf16 %v8612_v21  ;;  %v7368_v56 = vunpack.i.h.bf16 %v8610_v29 }
 0x144   :  { %7253 = vmatprep.subr.bf16.mxu0 %v7252_v14  ;;  %v1613_v15 = vsel %vm400_vm5, %v1612_v44, %v7358_v9  ;;  %v1606_v6 = vsel %vm400_vm5, %v1605_v5, %v7357_v23  ;;  %v7367_v1 = vunpack.i.l.bf16 %v8610_v29 }
 0x145   :  { %7255 = vmatpush1.bf16.msra.mxu0 %v7254_v42  ;;  %v7362_v42 = vunpack.i.l.bf16 %v8612_v21  ;;  %v1614_v8 = vsel %vm402_vm6, %v1613_v15, %v7363_v38 }
 0x146   :  { %v1615_v29 = vsel %vm404_vm7, %v1614_v8, %v7368_v56 }
 0x152   :  { %v7411_v58 = vpop.permute.xlu1 %7410  ;;  %v7406_v46 = vpop.permute.xlu0 %7405 }
 0x153   :  { %v7408_v62 = vunpack.i.h.bf16 %v7406_v46  ;;  %v7407_v45 = vunpack.i.l.bf16 %v7406_v46  ;;  %v7413_v2 = vunpack.i.h.bf16 %v7411_v58  ;;  %v7412_v54 = vunpack.i.l.bf16 %v7411_v58 }
 0x154   :  { %v1607_v58 = vsel %vm402_vm6, %v1606_v6, %v7362_v42 }
 0x155   :  { %v1202_v55 = vsel %vm392_vm1, %v1131_v25, %v7408_v62  ;;  %v1195_v0 = vsel %vm392_vm1, %v995_v35, %v7407_v45  ;;  %v1608_v30 = vsel %vm404_vm7, %v1607_v58, %v7367_v1 }
 0x156   :  { %v7421_v20 = vpop.permute.xlu1 %7420  ;;  %v7416_v32 = vpop.permute.xlu0 %7415  ;;  %v1196_v25 = vsel %vm394_vm2, %v1195_v0, %v7412_v54  ;;  %v1203_v36 = vsel %vm394_vm2, %v1202_v55, %v7413_v2 }
 0x157   :  { %v7418_v17 = vunpack.i.h.bf16 %v7416_v32  ;;  %v7417_v14 = vunpack.i.l.bf16 %v7416_v32  ;;  %v7423_v27 = vunpack.i.h.bf16 %v7421_v20  ;;  %v7422_v41 = vunpack.i.l.bf16 %v7421_v20 }
 0x159   :  { %v1197_v24 = vsel %vm396_vm3, %v1196_v25, %v7417_v14  ;;  %v1204_v35 = vsel %vm396_vm3, %v1203_v36, %v7418_v17 }
 0x15a   :  { %v7431_v37 = vpop.permute.xlu1 %7430  ;;  %v7426_v33 = vpop.permute.xlu0 %7425  ;;  %v1198_v63 = vsel %vm398_vm4, %v1197_v24, %v7422_v41  ;;  %v1205_v51 = vsel %vm398_vm4, %v1204_v35, %v7423_v27 }
 0x15b   :  { %v7428_v11 = vunpack.i.h.bf16 %v7426_v33  ;;  %v7427_v12 = vunpack.i.l.bf16 %v7426_v33  ;;  %v7433_v4 = vunpack.i.h.bf16 %v7431_v37  ;;  %v7432_v16 = vunpack.i.l.bf16 %v7431_v37 }
 0x15d   :  { %v1199_v21 = vsel %vm400_vm5, %v1198_v63, %v7427_v12  ;;  %v1206_v61 = vsel %vm400_vm5, %v1205_v51, %v7428_v11 }
 0x15e   :  { %v1627_v13 = vpop.permute.xlu1 %1626  ;;  %v7436_v50 = vpop.permute.xlu0 %7435  ;;  %v1207_v40 = vsel %vm402_vm6, %v1206_v61, %v7433_v4  ;;  %v1200_v62 = vsel %vm402_vm6, %v1199_v21, %v7432_v16 }
 0x15f   :  { %v7438_v46 = vunpack.i.h.bf16 %v7436_v50  ;;  %v7437_v60 = vunpack.i.l.bf16 %v7436_v50  ;;  %v1800_v44 = vcombine.low %v8614_v53, %v1627_v13  ;;  %v1801_v27 = vcombine.high %v8614_v53, %v1627_v13 }
 0x161   :  { %v1208_v45 = vsel %vm404_vm7, %v1207_v40, %v7438_v46  ;;  %v1201_v48 = vsel %vm404_vm7, %v1200_v62, %v7437_v60  ;;  %v1808_v35 = vrot.slane %v1800_v44, %v8080_v31  ;;  %v8741_v53 = vrot.slane %v1801_v27, %v8080_v31 }
 0x162   :  { %v1631_v2 = vpop.permute.xlu1 %1630  ;;  %v1625_v54 = vpop.permute.xlu0 %1624  ;;  %v7256_v55 = vpack.c.bf16 %v1615_v29, %v1208_v45  ;;  %v7258_v0 = vpack.c.bf16 %v1608_v30, %v1201_v48 }
 0x163   :  { %v1816_v5 = vcombine.low %v8618_v49, %v1631_v2  ;;  %v1817_v41 = vcombine.high %v8618_v49, %v1631_v2  ;;  %v1664_v38 = vcombine.low %v8616_v10, %v1625_v54  ;;  %v1665_v42 = vcombine.high %v8616_v10, %v1625_v54 }
 0x164   :  { %7257 = vmatprep.subr.bf16.mxu0 %v7256_v55 }
 0x165   :  { %7259 = vmatpush1.bf16.msra.mxu0 %v7258_v0  ;;  %v1824_v25 = vrot.slane %v1816_v5, %v8080_v31  ;;  %v8744_v49 = vrot.slane %v1817_v41, %v8080_v31  ;;  %v1672_v51 = vrot.slane %v1664_v38, %v8080_v31 }
 0x166   :  { %v1635_v9 = vpop.permute.xlu1 %1634  ;;  %v1629_v23 = vpop.permute.xlu0 %1628 }
 0x167   :  { %v1680_v36 = vcombine.low %v8620_v26, %v1629_v23  ;;  %v1681_v11 = vcombine.high %v8620_v26, %v1629_v23  ;;  %v1864_v6 = vcombine.low %v1808_v35, %v1824_v25  ;;  %v1679_v26 = vrot.slane %v1665_v42, %v8080_v31 }
 0x168   :  { %v1865_v58 = vcombine.high %v1808_v35, %v1824_v25 }
 0x169   :  { %v1688_v4 = vrot.slane %v1680_v36, %v8080_v31  ;;  %v1695_v61 = vrot.slane %v1681_v11, %v8080_v31  ;;  %v8754_v40 = vrot.slane %v1864_v6, %v8098_v43 }
 0x16a   :  { %v1639_v20 = vpop.permute.xlu1 %1638  ;;  %v1633_v32 = vpop.permute.xlu0 %1632  ;;  %v1879_v25 = vrot.slane %v1865_v58, %v8098_v43 }
 0x16b   :  { %11915 = vst [vmem:[#allocation13_spill] sm:$0xff] %v8754_v40  ;;  %v1728_v62 = vcombine.low %v1672_v51, %v1688_v4  ;;  %v1729_v45 = vcombine.high %v1672_v51, %v1688_v4  ;;  %v1744_v0 = vcombine.low %v1679_v26, %v1695_v61 }
 0x16d   :  { %v1743_v41 = vrot.slane %v1729_v45, %v8098_v43 }
 0x16e   :  { %v1643_v17 = vpop.permute.xlu1 %1642  ;;  %v1637_v14 = vpop.permute.xlu0 %1636 }
 0x16f   :  { %v1832_v24 = vcombine.low %v1635_v9, %v1643_v17  ;;  %v1833_v16 = vcombine.high %v1635_v9, %v1643_v17 }
 0x171   :  { %v1840_v63 = vrot.slane %v1832_v24, %v8080_v31  ;;  %v1847_v29 = vrot.slane %v1833_v16, %v8080_v31  ;;  %v8773_v24 = vrot.slane %v1728_v62, %v8098_v43  ;;  %v1881_v16 = vcombine.high %v8741_v53, %v8744_v49 }
 0x172   :  { %v1647_v37 = vpop.permute.xlu1 %1646  ;;  %v1641_v33 = vpop.permute.xlu0 %1640 }
 0x173   :  { %v1848_v12 = vcombine.low %v1639_v20, %v1647_v37  ;;  %v1849_v15 = vcombine.high %v1639_v20, %v1647_v37  ;;  %v1696_v56 = vcombine.low %v1633_v32, %v1641_v33  ;;  %v1697_v1 = vcombine.high %v1633_v32, %v1641_v33  ;;  %11917 = vst [vmem:[#allocation12_spill] sm:$0xff] %v8773_v24 }
 0x174   :  { %v1880_v32 = vcombine.low %v8741_v53, %v8744_v49  ;;  %v1752_v33 = vrot.slane %v1744_v0, %v8098_v43  ;;  %v1895_v53 = vrot.slane %v1881_v16, %v8098_v43  ;;  %v11920_v0 = vld [vmem:[#allocation7_spill] sm:$0xff] }
 0x175   :  { %v1856_v10 = vrot.slane %v1848_v12, %v8080_v31  ;;  %v1863_v13 = vrot.slane %v1849_v15, %v8080_v31  ;;  %v1704_v30 = vrot.slane %v1696_v56, %v8080_v31  ;;  %v1711_v2 = vrot.slane %v1697_v1, %v8080_v31 }
 0x176   :  { %v1645_v21 = vpop.permute.xlu0 %1644 }
 0x177   :  { %v1896_v50 = vcombine.low %v1840_v63, %v1856_v10  ;;  %v1897_v8 = vcombine.high %v1840_v63, %v1856_v10  ;;  %v1712_v46 = vcombine.low %v1637_v14, %v1645_v21  ;;  %v1713_v60 = vcombine.high %v1637_v14, %v1645_v21 }
 0x178   :  { %v1912_v9 = vcombine.low %v1847_v29, %v1863_v13  ;;  %v1745_v14 = vcombine.high %v1679_v26, %v1695_v61  ;;  %v1913_v42 = vcombine.high %v1847_v29, %v1863_v13  ;;  %v1888_v63 = vrot.slane %v1880_v32, %v8098_v43  ;;  %v7895_v32 = vld [vmem:[%s11816_s0 + $0x40] sm:$0x3] }
 0x179   :  { %v8758_v48 = vrot.slane %v1896_v50, %v8098_v43  ;;  %v1720_v54 = vrot.slane %v1712_v46, %v8080_v31  ;;  %v1727_v55 = vrot.slane %v1713_v60, %v8080_v31  ;;  %v1911_v23 = vrot.slane %v1897_v8, %v8098_v43 }
 0x17a   :  { %v1920_v11 = vrot.slane %v1912_v9, %v8098_v43  ;;  %v1759_v21 = vrot.slane %v1745_v14, %v8098_v43  ;;  %v1927_v50 = vrot.slane %v1913_v42, %v8098_v43  ;;  %v11921_v9 = vld [vmem:[#allocation6_spill] sm:$0xff]  ;;  %v7899_v42 = vld [vmem:[%s11816_s0 + $0x20] sm:$0xff] }
 0x17b   :  { %11916 = vst [vmem:[#allocation11_spill] sm:$0xff] %v8758_v48  ;;  %v1760_v5 = vcombine.low %v1704_v30, %v1720_v54  ;;  %v1761_v44 = vcombine.high %v1704_v30, %v1720_v54  ;;  %v1776_v17 = vcombine.low %v1711_v2, %v1727_v55  ;;  %v1777_v27 = vcombine.high %v1711_v2, %v1727_v55  ;;  %v11919_v55 = vld [vmem:[#allocation5_spill] sm:$0xff] }
 0x17c   :  { %v1930_v37 = vcombine.low %v1879_v25, %v1911_v23  ;;  %v1929_v6 = vcombine.high %v8754_v40, %v8758_v48  ;;  %v1932_v61 = vcombine.low %v1888_v63, %v1920_v11  ;;  %v1931_v13 = vcombine.high %v1879_v25, %v1911_v23  ;;  %v11922_v23 = vld [vmem:[#allocation8_spill] sm:$0xff] }
 0x17d   :  { %v1775_v36 = vrot.slane %v1761_v44, %v8098_v43  ;;  %v8776_v35 = vrot.slane %v1760_v5, %v8098_v43  ;;  %v1784_v38 = vrot.slane %v1776_v17, %v8098_v43  ;;  %v1791_v10 = vrot.slane %v1777_v27, %v8098_v43  ;;  %v7896_v44 = vld [vmem:[%s11816_s0 + $0x58] sm:$0x3] }
 0x17e   :  { %v1934_v60 = vcombine.low %v1895_v53, %v1927_v50  ;;  %v1933_v62 = vcombine.high %v1888_v63, %v1920_v11  ;;  %v1935_v2 = vcombine.high %v1895_v53, %v1927_v50  ;;  %v2410_v5 = vrot.slane %v7895_v32, 2  ;;  %v7903_v63 = vld [vmem:[%s11816_s0 + $0x50] sm:$0xff] }
 0x17f   :  { %11918 = vst [vmem:[#allocation9_spill] sm:$0xff] %v8776_v35  ;;  %v1794_v12 = vcombine.low %v1743_v41, %v1775_v36  ;;  %v1793_v15 = vcombine.high %v8773_v24, %v8776_v35  ;;  %v1796_v56 = vcombine.low %v1752_v33, %v1784_v38  ;;  %v1795_v1 = vcombine.high %v1743_v41, %v1775_v36  ;;  %v7897_v41 = vld [vmem:[%s11816_s0 + $0x8] sm:$0xff]  ;;  %v7898_v36 = vld [vmem:[%s11816_s0 + $0x18] sm:$0xff] }
 0x180   :  { %v1798_v58 = vcombine.low %v1759_v21, %v1791_v10  ;;  %v1797_v46 = vcombine.high %v1752_v33, %v1784_v38  ;;  %v1799_v30 = vcombine.high %v1759_v21, %v1791_v10  ;;  %v2415_v17 = vrot.slane %v7896_v44, 2  ;;  %v7900_v33 = vld [vmem:[%s11816_s0 + $0x30] sm:$0xff]  ;;  %v7906_v21 = vld [vmem:[%s11816_s0 + $0x78] sm:$0xff] }
 0x181   :  { %v7444_v51 = vpack.i.bf16 %v1930_v37, %v1794_v12  ;;  %v7439_v26 = vpack.i.bf16 %v1929_v6, %v1793_v15  ;;  %v7454_v49 = vpack.i.bf16 %v1932_v61, %v1796_v56  ;;  %v7449_v8 = vpack.i.bf16 %v1931_v13, %v1795_v1  ;;  %v7901_v12 = vld [vmem:[%s11816_s0 + $0x38] sm:$0xff]  ;;  %v7902_v6 = vld [vmem:[%s11816_s0 + $0x48] sm:$0xff]  ;;  %v7907_v13 = vld [vmem:[%s11816_s0 + $0x80] sm:$0xff] }
 0x182   :  { %v7464_v45 = vpack.i.bf16 %v1934_v60, %v1798_v58  ;;  %v7459_v29 = vpack.i.bf16 %v1933_v62, %v1797_v46  ;;  %v7469_v54 = vpack.i.bf16 %v1935_v2, %v1799_v30  ;;  %v2398_v25 = vrot.slane %v7897_v41, 2  ;;  %v7905_v56 = vld [vmem:[%s11816_s0 + $0x68] sm:$0xff]  ;;  %v7909_v46 = vld [vmem:[%s11816_s0 + $0x98] sm:$0xff]  ;;  %v7912_v2 = vld [vmem:[%s11816_s0 + $0x70] sm:$0x3] }
 0x183   :  { %7445 = vrot.lane.b32.xlu1 %v7444_v51, %s7952_s21  ;;  %7440 = vrot.lane.b32.xlu0 %v7439_v26, %s7951_s20  ;;  %v2402_v38 = vrot.slane %v7898_v36, 2  ;;  %v2403_v37 = vrot.slane %v7899_v42, 2  ;;  %v2407_v11 = vrot.slane %v7900_v33, 2  ;;  %v2408_v15 = vrot.slane %v7901_v12, 2  ;;  %v7904_v51 = vld [vmem:[%s11816_s0 + $0x60] sm:$0xff]  ;;  %v7910_v62 = vld [vmem:[%s11816_s0 + $0xa8] sm:$0xff] }
 0x184   :  { %v2412_v16 = vrot.slane %v7902_v6, 2  ;;  %v2413_v10 = vrot.slane %v7903_v63, 2  ;;  %v2417_v26 = vrot.slane %v7904_v51, 2  ;;  %v2418_v1 = vrot.slane %v7905_v56, 2 }
 0x185   :  { %v2422_v61 = vrot.slane %v7906_v21, 2  ;;  %v2423_v50 = vrot.slane %v7907_v13, 2  ;;  %v2428_v60 = vrot.slane %v7909_v46, 2  ;;  %v8932_v44 = vsel %vm2396_vm8, %v2402_v38, %v2403_v37 }
 0x186   :  { %v8938_v36 = vsel %vm2396_vm8, %v2407_v11, %v2408_v15  ;;  %v8941_v42 = vsel %vm2396_vm8, %v2408_v15, %v2410_v5  ;;  %v8944_v33 = vsel %vm2396_vm8, %v2412_v16, %v2413_v10  ;;  %v8954_v38 = vsel %vm2396_vm8, %v2417_v26, %v2418_v1 }
 0x187   :  { %7455 = vrot.lane.b32.xlu1 %v7454_v49, %s7953_s26  ;;  %7450 = vrot.lane.b32.xlu0 %v7449_v8, %s7950_s19  ;;  %v7908_v8 = vld [vmem:[%s11816_s0 + $0x90] sm:$0xff]  ;;  %v2469_v16 = vcombine.low %v8932_v44, %v8944_v33 }
 0x188   :  { %v2427_v58 = vrot.slane %v7908_v8, 2 }
 0x18b   :  { %7465 = vrot.lane.b32.xlu1 %v7464_v45, %s7955_s7  ;;  %7460 = vrot.lane.b32.xlu0 %v7459_v29, %s7954_s27  ;;  %v2432_v45 = vrot.slane %v7910_v62, 2  ;;  %v7911_v29 = vld [vmem:[%s11816_s0 + $0xb0] sm:$0xff] }
 0x18c   :  { %v2433_v30 = vrot.slane %v7911_v29, 2 }
 0x18e   :  { %v8963_v5 = vsel %vm2396_vm8, %v2432_v45, %v2433_v30 }
 0x18f   :  { %2006 = vrot.lane.b32.xlu1 %v11919_v55, %s7957_s15  ;;  %7470 = vrot.lane.b32.xlu0 %v7469_v54, %s7956_s8  ;;  %v2420_v54 = vrot.slane %v7912_v2, 2  ;;  %v7913_v55 = vld [vmem:[%s11816_s0 + $0x88] sm:$0x3] }
 0x191   :  { %v8966_v11 = vsel %vm2396_vm8, %v2418_v1, %v2420_v54 }
 0x193   :  { %2010 = vrot.lane.b32.xlu1 %v11920_v0, %s7957_s15  ;;  %2008 = vrot.lane.b32.xlu0 %v11921_v9, %s7957_s15  ;;  %v2425_v0 = vrot.slane %v7913_v55, 2  ;;  %v7914_v9 = vld [vmem:[%s11816_s0 + $0xa0] sm:$0x3] }
 0x197   :  { %2014 = vrot.lane.b32.xlu1 %v8193_v47, %s7957_s15  ;;  %2012 = vrot.lane.b32.xlu0 %v11922_v23, %s7957_s15  ;;  %v2430_v23 = vrot.slane %v7914_v9, 2 }
 0x199   :  { %v8972_v12 = vsel %vm2396_vm8, %v2428_v60, %v2430_v23 }
 0x19a   :  { %v2621_v21 = vcombine.low %v8966_v11, %v8972_v12 }
 0x19b   :  { %2018 = vrot.lane.b32.xlu1 %v8209_v57, %s7957_s15  ;;  %2016 = vrot.lane.b32.xlu0 %v8201_v52, %s7957_s15 }
 0x19c   :  { %v2629_v29 = vrot.slane %v2621_v21, %v8080_v31 }
 0x19f   :  { %2022 = vrot.lane.b32.xlu1 %v8220_v3, %s7957_s15  ;;  %2020 = vrot.lane.b32.xlu0 %v8212_v59, %s7957_s15 }
 0x1a3   :  { %2026 = vrot.lane.b32.xlu1 %v8228_v18, %s7957_s15  ;;  %2024 = vrot.lane.b32.xlu0 %v8223_v7, %s7957_s15  ;;  %v7892_v18 = vld [vmem:[%s11816_s0] sm:$0xff] }
 0x1a7   :  { %2030 = vrot.lane.b32.xlu1 %v8235_v22, %s7957_s15  ;;  %2028 = vrot.lane.b32.xlu0 %v8231_v19, %s7957_s15  ;;  %v2397_v19 = vrot.slane %v7892_v18, 2  ;;  %v7893_v22 = vld [vmem:[%s11816_s0 + $0x10] sm:$0x3]  ;;  %v7915_v18 = vld [vmem:[%s11816_s0 + $0xb8] sm:$0x3] }
 0x1ab   :  { %2034 = vrot.lane.b32.xlu1 %v8254_v28, %s7957_s15  ;;  %2032 = vrot.lane.b32.xlu0 %v8241_v34, %s7957_s15  ;;  %v2400_v34 = vrot.slane %v7893_v22, 2  ;;  %v7894_v28 = vld [vmem:[%s11816_s0 + $0x28] sm:$0x3]  ;;  %v2435_v22 = vrot.slane %v7915_v18, 2 }
 0x1ad   :  { %v8929_v32 = vsel %vm2396_vm8, %v2398_v25, %v2400_v34  ;;  %v8975_v15 = vsel %vm2396_vm8, %v2433_v30, %v2435_v22 }
 0x1ae   :  { %v2589_v56 = vcombine.low %v8929_v32, %v8941_v42 }
 0x1af   :  { %2036 = vrot.lane.b32.xlu0 %v8257_v39, %s7957_s15  ;;  %v2405_v39 = vrot.slane %v7894_v28, 2  ;;  %v8926_v28 = vsel %vm2396_vm8, %v2397_v19, %v2398_v25  ;;  %v8947_v19 = vsel %vm2396_vm8, %v2413_v10, %v2415_v17  ;;  %v8969_v17 = vsel %vm2396_vm8, %v2423_v50, %v2425_v0 }
 0x1b0   :  { %v2453_v6 = vcombine.low %v8926_v28, %v8938_v36  ;;  %v2597_v62 = vrot.slane %v2589_v56, %v8080_v31 }
 0x1b1   :  { %v8935_v41 = vsel %vm2396_vm8, %v2403_v37, %v2405_v39  ;;  %v8957_v39 = vsel %vm2396_vm8, %v2422_v61, %v2423_v50  ;;  %v8960_v37 = vsel %vm2396_vm8, %v2427_v58, %v2428_v60  ;;  %v2637_v61 = vcombine.low %v8969_v17, %v8975_v15 }
 0x1b2   :  { %v2485_v63 = vcombine.low %v8954_v38, %v8960_v37  ;;  %v2501_v10 = vcombine.low %v8957_v39, %v8963_v5  ;;  %v2605_v1 = vcombine.low %v8935_v41, %v8947_v19  ;;  %v2461_v13 = vrot.slane %v2453_v6, %v8080_v31 }
 0x1b3   :  { %v2477_v50 = vrot.slane %v2469_v16, %v8080_v31  ;;  %v2645_v30 = vrot.slane %v2637_v61, %v8080_v31 }
 0x1b4   :  { %v2493_v8 = vrot.slane %v2485_v63, %v8080_v31  ;;  %v2509_v58 = vrot.slane %v2501_v10, %v8080_v31  ;;  %v2613_v45 = vrot.slane %v2605_v1, %v8080_v31  ;;  %v2454_v63 = vcombine.high %v8926_v28, %v8938_v36 }
 0x1b5   :  { %v2517_v2 = vcombine.low %v2461_v13, %v2477_v50  ;;  %v2518_v55 = vcombine.high %v2461_v13, %v2477_v50  ;;  %v2685_v18 = vcombine.low %v2629_v29, %v2645_v30  ;;  %v2686_v16 = vcombine.high %v2629_v29, %v2645_v30 }
 0x1b6   :  { %v2549_v54 = vcombine.low %v2493_v8, %v2509_v58  ;;  %v2653_v23 = vcombine.low %v2597_v62, %v2613_v45  ;;  %v2550_v22 = vcombine.high %v2493_v8, %v2509_v58  ;;  %v2654_v6 = vcombine.high %v2597_v62, %v2613_v45 }
 0x1b7   :  { %v9016_v56 = vrot.slane %v2517_v2, %v8098_v43  ;;  %v2470_v1 = vcombine.high %v8932_v44, %v8944_v33  ;;  %v9024_v61 = vrot.slane %v2518_v55, %v8098_v43  ;;  %v2486_v13 = vcombine.high %v8954_v38, %v8960_v37 }
 0x1b8   :  { %v9021_v21 = vrot.slane %v2549_v54, %v8098_v43  ;;  %v2502_v50 = vcombine.high %v8957_v39, %v8963_v5  ;;  %v9033_v45 = vrot.slane %v2653_v23, %v8098_v43  ;;  %v9036_v29 = vrot.slane %v2685_v18, %v8098_v43 }
 0x1b9   :  { %v9039_v30 = vrot.slane %v2550_v22, %v8098_v43  ;;  %v9042_v2 = vrot.slane %v2654_v6, %v8098_v43  ;;  %v9045_v54 = vrot.slane %v2686_v16, %v8098_v43  ;;  %v9048_v55 = vrot.slane %v2454_v63, %v8080_v31 }
 0x1ba   :  { %v9058_v6 = vrot.slane %v2470_v1, %v8080_v31  ;;  %v9064_v20 = vrot.slane %v2486_v13, %v8080_v31  ;;  %v9067_v4 = vrot.slane %v2502_v50, %v8080_v31 }
 0x1f5   :  { %v8833_v47 = vpop.permute.xlu1 %7445  ;;  %v8835_v52 = vpop.permute.xlu0 %7440 }
 0x1f9   :  { %v8837_v57 = vpop.permute.xlu1 %7455  ;;  %v8839_v59 = vpop.permute.xlu0 %7450 }
 0x1fa   :  { %11923 = vst [vmem:[#allocation10_spill] sm:$0xff] %v8837_v57  ;;  %11924 = vst [vmem:[#allocation5_spill] sm:$0xff] %v8839_v59 }
 0x1fd   :  { %v8841_v3 = vpop.permute.xlu1 %7465  ;;  %v8843_v7 = vpop.permute.xlu0 %7460 }
 0x1fe   :  { %11925 = vst [vmem:[#allocation7_spill] sm:$0xff] %v8841_v3  ;;  %11926 = vst [vmem:[#allocation6_spill] sm:$0xff] %v8843_v7 }
 0x201   :  { %v8860_v14 = vpop.permute.xlu1 %2006  ;;  %v8862_v27 = vpop.permute.xlu0 %7470 }
 0x202   :  { %11927 = vst [vmem:[#allocation8_spill] sm:$0xff] %v8862_v27 }
 0x205   :  { %v8897_v53 = vpop.permute.xlu1 %2010  ;;  %v8899_v49 = vpop.permute.xlu0 %2008 }
 0x209   :  { %v8949_v34 = vpop.permute.xlu1 %2014  ;;  %v8951_v25 = vpop.permute.xlu0 %2012 }
 0x20a   :  { %v2054_v8 = vcombine.low %v8860_v14, %v8949_v34  ;;  %v2055_v23 = vcombine.high %v8860_v14, %v8949_v34 }
 0x20c   :  { %v2062_v14 = vrot.slane %v2054_v8, %v8080_v31  ;;  %v9081_v8 = vrot.slane %v2055_v23, %v8080_v31 }
 0x20d   :  { %v8985_v51 = vpop.permute.xlu1 %2018  ;;  %v8987_v26 = vpop.permute.xlu0 %2016 }
 0x20e   :  { %v2070_v10 = vcombine.low %v8897_v53, %v8985_v51  ;;  %v2071_v18 = vcombine.high %v8897_v53, %v8985_v51  ;;  %v2190_v53 = vcombine.low %v8899_v49, %v8987_v26  ;;  %v2191_v34 = vcombine.high %v8899_v49, %v8987_v26 }
 0x20f   :  { %v2638_v26 = vcombine.high %v8969_v17, %v8975_v15 }
 0x210   :  { %v2078_v22 = vrot.slane %v2070_v10, %v8080_v31  ;;  %v9084_v7 = vrot.slane %v2071_v18, %v8080_v31  ;;  %v2205_v23 = vrot.slane %v2191_v34, %v8080_v31 }
 0x211   :  { %v9001_v46 = vpop.permute.xlu1 %2022  ;;  %v9003_v60 = vpop.permute.xlu0 %2020 }
 0x212   :  { %v2206_v16 = vcombine.low %v8951_v25, %v9003_v60  ;;  %v2207_v13 = vcombine.high %v8951_v25, %v9003_v60  ;;  %v2118_v49 = vcombine.low %v2062_v14, %v2078_v22 }
 0x214   :  { %v2214_v1 = vrot.slane %v2206_v16, %v8080_v31  ;;  %v2221_v59 = vrot.slane %v2207_v13, %v8080_v31 }
 0x215   :  { %v2027_v0 = vpop.permute.xlu1 %2026  ;;  %v9009_v9 = vpop.permute.xlu0 %2024 }
 0x219   :  { %v2031_v58 = vpop.permute.xlu1 %2030  ;;  %v2029_v62 = vpop.permute.xlu0 %2028 }
 0x21a   :  { %v2086_v63 = vcombine.low %v9001_v46, %v2031_v58  ;;  %v2087_v57 = vcombine.high %v9001_v46, %v2031_v58  ;;  %v2119_v46 = vcombine.high %v2062_v14, %v2078_v22  ;;  %v9099_v58 = vrot.slane %v2118_v49, %v8098_v43 }
 0x21b   :  { %v2270_v14 = vcombine.low %v2205_v23, %v2221_v59 }
 0x21c   :  { %v2094_v25 = vrot.slane %v2086_v63, %v8080_v31  ;;  %v2101_v34 = vrot.slane %v2087_v57, %v8080_v31  ;;  %v2134_v57 = vcombine.low %v9081_v8, %v9084_v7 }
 0x21d   :  { %v2035_v51 = vpop.permute.xlu1 %2034  ;;  %v2033_v10 = vpop.permute.xlu0 %2032 }
 0x21e   :  { %v2102_v27 = vcombine.low %v2027_v0, %v2035_v51  ;;  %v2103_v3 = vcombine.high %v2027_v0, %v2035_v51  ;;  %v2198_v0 = vrot.slane %v2190_v53, %v8080_v31  ;;  %v2222_v51 = vcombine.low %v9009_v9, %v2033_v10 }
 0x21f   :  { %v2223_v18 = vcombine.high %v9009_v9, %v2033_v10 }
 0x220   :  { %v2110_v60 = vrot.slane %v2102_v27, %v8080_v31  ;;  %v2117_v35 = vrot.slane %v2103_v3, %v8080_v31  ;;  %v2254_v53 = vcombine.low %v2198_v0, %v2214_v1  ;;  %v2255_v48 = vcombine.high %v2198_v0, %v2214_v1 }
 0x221   :  { %v2037_v50 = vpop.permute.xlu0 %2036  ;;  %v2230_v9 = vrot.slane %v2222_v51, %v8080_v31  ;;  %v2237_v10 = vrot.slane %v2223_v18, %v8080_v31  ;;  %v2271_v51 = vcombine.high %v2205_v23, %v2221_v59 }
 0x222   :  { %v2150_v16 = vcombine.low %v2094_v25, %v2110_v60  ;;  %v2151_v24 = vcombine.high %v2094_v25, %v2110_v60  ;;  %v2238_v27 = vcombine.low %v2029_v62, %v2037_v50  ;;  %v2239_v63 = vcombine.high %v2029_v62, %v2037_v50 }
 0x223   :  { %v2166_v49 = vcombine.low %v2101_v34, %v2117_v35  ;;  %v2133_v60 = vrot.slane %v2119_v46, %v8098_v43  ;;  %v9116_v0 = vrot.slane %v2254_v53, %v8098_v43  ;;  %v2278_v62 = vrot.slane %v2270_v14, %v8098_v43 }
 0x224   :  { %v9103_v40 = vrot.slane %v2150_v16, %v8098_v43  ;;  %v2246_v3 = vrot.slane %v2238_v27, %v8080_v31  ;;  %v2253_v22 = vrot.slane %v2239_v63, %v8080_v31  ;;  %v2165_v13 = vrot.slane %v2151_v24, %v8098_v43 }
 0x225   :  { %v2269_v16 = vrot.slane %v2255_v48, %v8098_v43  ;;  %v2285_v53 = vrot.slane %v2271_v51, %v8098_v43 }
 0x226   :  { %v2286_v1 = vcombine.low %v2230_v9, %v2246_v3  ;;  %v2287_v50 = vcombine.high %v2230_v9, %v2246_v3  ;;  %v2302_v25 = vcombine.low %v2237_v10, %v2253_v22  ;;  %v2303_v18 = vcombine.high %v2237_v10, %v2253_v22 }
 0x227   :  { %v2167_v9 = vcombine.high %v2101_v34, %v2117_v35  ;;  %v2174_v3 = vrot.slane %v2166_v49, %v8098_v43  ;;  %v2184_v46 = vcombine.low %v2133_v60, %v2165_v13  ;;  %v2183_v48 = vcombine.high %v9099_v58, %v9103_v40 }
 0x228   :  { %v9120_v24 = vrot.slane %v2286_v1, %v8098_v43  ;;  %v2301_v27 = vrot.slane %v2287_v50, %v8098_v43  ;;  %v2310_v63 = vrot.slane %v2302_v25, %v8098_v43  ;;  %v2135_v10 = vcombine.high %v9081_v8, %v9084_v7 }
 0x229   :  { %v2142_v22 = vrot.slane %v2134_v57, %v8098_v43  ;;  %v2317_v35 = vrot.slane %v2303_v18, %v8098_v43  ;;  %v11929_v34 = vcombine.high %v8929_v32, %v8941_v42  ;;  %v11931_v8 = vcombine.high %v8966_v11, %v8972_v12 }
 0x22a   :  { %11928 = vst [vmem:[#allocation14_spill] sm:$0xff] %v9120_v24  ;;  %v2320_v59 = vcombine.low %v2269_v16, %v2301_v27  ;;  %v2319_v23 = vcombine.high %v9116_v0, %v9120_v24  ;;  %v2322_v50 = vcombine.low %v2278_v62, %v2310_v63  ;;  %v2321_v25 = vcombine.high %v2269_v16, %v2301_v27 }
 0x22b   :  { %v2604_v14 = vrot.slane %v11929_v34, %v8080_v31  ;;  %v11930_v24 = vcombine.high %v8935_v41, %v8947_v19  ;;  %v2636_v57 = vrot.slane %v11931_v8, %v8080_v31  ;;  %v2652_v18 = vrot.slane %v2638_v26, %v8080_v31 }
 0x22c   :  { %v7479_v49 = vpack.i.bf16 %v2320_v59, %v2184_v46  ;;  %v7474_v1 = vpack.i.bf16 %v2319_v23, %v2183_v48  ;;  %v2181_v34 = vrot.slane %v2167_v9, %v8098_v43  ;;  %v2186_v16 = vcombine.low %v2142_v22, %v2174_v3 }
 0x22d   :  { %v2620_v7 = vrot.slane %v11930_v24, %v8080_v31  ;;  %v2185_v51 = vcombine.high %v2133_v60, %v2165_v13  ;;  %v2149_v27 = vrot.slane %v2135_v10, %v8098_v43  ;;  %v2582_v24 = vcombine.high %v9016_v56, %v9021_v21 }
 0x22e   :  { %7480 = vrot.lane.b32.xlu0 %v7479_v49, %s7952_s21  ;;  %7475 = vrot.lane.b32.xlu1 %v7474_v1, %s7951_s20  ;;  %v2718_v46 = vcombine.high %v9033_v45, %v9036_v29  ;;  %v2584_v59 = vcombine.high %v9024_v61, %v9039_v30  ;;  %v7489_v26 = vpack.i.bf16 %v2322_v50, %v2186_v16 }
 0x22f   :  { %v7484_v48 = vpack.i.bf16 %v2321_v25, %v2185_v51  ;;  %v2324_v9 = vcombine.low %v2285_v53, %v2317_v35  ;;  %v2323_v23 = vcombine.high %v2278_v62, %v2310_v63  ;;  %v2583_v49 = vcombine.low %v9024_v61, %v9039_v30 }
 0x230   :  { %v2533_v13 = vcombine.low %v9048_v55, %v9058_v6  ;;  %v2565_v60 = vcombine.low %v9064_v20, %v9067_v4  ;;  %v2669_v10 = vcombine.low %v2604_v14, %v2620_v7  ;;  %v2188_v1 = vcombine.low %v2149_v27, %v2181_v34 }
 0x231   :  { %v2187_v8 = vcombine.high %v2142_v22, %v2174_v3  ;;  %v2701_v50 = vcombine.low %v2636_v57, %v2652_v18  ;;  %v7509_v25 = vpack.i.bf16 %v2718_v46, %v2582_v24  ;;  %v2720_v62 = vcombine.high %v9042_v2, %v9045_v54 }
 0x232   :  { %7490 = vrot.lane.b32.xlu0 %v7489_v26, %s7953_s26  ;;  %7485 = vrot.lane.b32.xlu1 %v7484_v48, %s7950_s19  ;;  %v2719_v61 = vcombine.low %v9042_v2, %v9045_v54  ;;  %v2534_v30 = vcombine.high %v9048_v55, %v9058_v6  ;;  %v7499_v63 = vpack.i.bf16 %v2324_v9, %v2188_v1  ;;  %v7443_v1 = vunpack.i.h.bf16 %v8835_v52 }
 0x233   :  { %v7494_v16 = vpack.i.bf16 %v2323_v23, %v2187_v8  ;;  %v2325_v51 = vcombine.high %v2285_v53, %v2317_v35  ;;  %v2566_v26 = vcombine.high %v9064_v20, %v9067_v4  ;;  %v2541_v48 = vrot.slane %v2533_v13, %v8098_v43 }
 0x234   :  { %v2573_v3 = vrot.slane %v2565_v60, %v8098_v43  ;;  %v2670_v22 = vcombine.high %v2604_v14, %v2620_v7  ;;  %v2702_v24 = vcombine.high %v2636_v57, %v2652_v18  ;;  %v2189_v2 = vcombine.high %v2149_v27, %v2181_v34 }
 0x235   :  { %v2677_v54 = vrot.slane %v2669_v10, %v8098_v43  ;;  %v2709_v55 = vrot.slane %v2701_v50, %v8098_v43  ;;  %v7519_v53 = vpack.i.bf16 %v2720_v62, %v2584_v59  ;;  %v7514_v35 = vpack.i.bf16 %v2719_v61, %v2583_v49  ;;  %v11932_v62 = vld [vmem:[#allocation13_spill] sm:$0xff]  ;;  %v11933_v61 = vld [vmem:[#allocation11_spill] sm:$0xff] }
 0x236   :  { %7500 = vrot.lane.b32.xlu0 %v7499_v63, %s7955_s7  ;;  %7495 = vrot.lane.b32.xlu1 %v7494_v16, %s7954_s27  ;;  %v7504_v6 = vpack.i.bf16 %v2325_v51, %v2189_v2  ;;  %v2548_v20 = vrot.slane %v2534_v30, %v8098_v43  ;;  %v2586_v4 = vcombine.high %v2541_v48, %v2573_v3  ;;  %v7442_v8 = vunpack.i.l.bf16 %v8835_v52  ;;  %v11935_v16 = vld [vmem:[#allocation12_spill] sm:$0xff]  ;;  %v11936_v51 = vld [vmem:[#allocation9_spill] sm:$0xff] }
 0x237   :  { %v2580_v46 = vrot.slane %v2566_v26, %v8098_v43  ;;  %v2684_v14 = vrot.slane %v2670_v22, %v8098_v43  ;;  %v2716_v7 = vrot.slane %v2702_v24, %v8098_v43  ;;  %v2722_v57 = vcombine.high %v2677_v54, %v2709_v55 }
 0x238   :  { %v2585_v18 = vcombine.low %v2541_v48, %v2573_v3  ;;  %v2721_v34 = vcombine.low %v2677_v54, %v2709_v55  ;;  %v7448_v50 = vunpack.i.h.bf16 %v8833_v47  ;;  %v11934_v30 = vcombine.low %v11932_v62, %v11933_v61  ;;  %v11938_v3 = vld [vmem:[#allocation5_spill] sm:$0xff]  ;;  %v11944_v62 = vld [vmem:[#allocation7_spill] sm:$0xff] }
 0x239   :  { %v2588_v27 = vcombine.high %v2548_v20, %v2580_v46  ;;  %v2724_v9 = vcombine.high %v2684_v14, %v2716_v7  ;;  %v2587_v59 = vcombine.low %v2548_v20, %v2580_v46  ;;  %v7529_v23 = vpack.i.bf16 %v2722_v57, %v2586_v4  ;;  %v11940_v46 = vld [vmem:[#allocation14_spill] sm:$0xff] }
 0x23a   :  { %7510 = vrot.lane.b32.xlu0 %v7509_v25, %s7951_s20  ;;  %7505 = vrot.lane.b32.xlu1 %v7504_v6, %s7956_s8  ;;  %v7524_v49 = vpack.i.bf16 %v2721_v34, %v2585_v18  ;;  %v2723_v13 = vcombine.low %v2684_v14, %v2716_v7  ;;  %v7447_v25 = vunpack.i.l.bf16 %v8833_v47  ;;  %v1999_v63 = vsel %vm392_vm1, %v11934_v30, %v7443_v1  ;;  %v11942_v57 = vld [vmem:[#allocation10_spill] sm:$0xff] }
 0x23b   :  { %v7539_v60 = vpack.i.bf16 %v2724_v9, %v2588_v27  ;;  %v11937_v26 = vcombine.low %v11935_v16, %v11936_v51  ;;  %v7453_v22 = vunpack.i.h.bf16 %v11938_v3  ;;  %v7452_v24 = vunpack.i.l.bf16 %v11938_v3 }
 0x23c   :  { %v7534_v10 = vpack.i.bf16 %v2723_v13, %v2587_v59  ;;  %v11939_v20 = vcombine.low %v9099_v58, %v9103_v40  ;;  %v11941_v14 = vcombine.low %v9116_v0, %v11940_v46  ;;  %v7458_v18 = vunpack.i.h.bf16 %v11942_v57 }
 0x23d   :  { %v1992_v48 = vsel %vm392_vm1, %v11937_v26, %v7442_v8  ;;  %v7457_v34 = vunpack.i.l.bf16 %v11942_v57  ;;  %v7468_v61 = vunpack.i.h.bf16 %v11944_v62  ;;  %v7467_v30 = vunpack.i.l.bf16 %v11944_v62 }
 0x23e   :  { %7520 = vrot.lane.b32.xlu0 %v7519_v53, %s7950_s19  ;;  %7515 = vrot.lane.b32.xlu1 %v7514_v35, %s7952_s21  ;;  %v1993_v53 = vsel %vm394_vm2, %v1992_v48, %v7447_v25  ;;  %v2000_v35 = vsel %vm394_vm2, %v1999_v63, %v7448_v50 }
 0x23f   :  { %v1994_v27 = vsel %vm396_vm3, %v1993_v53, %v7452_v24  ;;  %v2001_v9 = vsel %vm396_vm3, %v2000_v35, %v7453_v22 }
 0x240   :  { %v1995_v63 = vsel %vm398_vm4, %v1994_v27, %v7457_v34  ;;  %v2002_v16 = vsel %vm398_vm4, %v2001_v9, %v7458_v18 }
 0x242   :  { %7530 = vrot.lane.b32.xlu0 %v7529_v23, %s7954_s27  ;;  %7525 = vrot.lane.b32.xlu1 %v7524_v49, %s7953_s26  ;;  %v11943_v49 = vld [vmem:[#allocation6_spill] sm:$0xff] }
 0x243   :  { %v7463_v13 = vunpack.i.h.bf16 %v11943_v49  ;;  %v7462_v40 = vunpack.i.l.bf16 %v11943_v49 }
 0x245   :  { %v1996_v48 = vsel %vm400_vm5, %v1995_v63, %v7462_v40  ;;  %v2003_v3 = vsel %vm400_vm5, %v2002_v16, %v7463_v13 }
 0x246   :  { %7540 = vrot.lane.b32.xlu0 %v7539_v60, %s7956_s8  ;;  %7535 = vrot.lane.b32.xlu1 %v7534_v10, %s7955_s7  ;;  %v2004_v57 = vsel %vm402_vm6, %v2003_v3, %v7468_v61  ;;  %v1997_v34 = vsel %vm402_vm6, %v1996_v48, %v7467_v30 }
 0x24a   :  { %2797 = vrot.lane.b32.xlu0 %v8929_v32, %s7947_s18  ;;  %2795 = vrot.lane.b32.xlu1 %v8926_v28, %s7947_s18 }
 0x24e   :  { %2801 = vrot.lane.b32.xlu0 %v8935_v41, %s7947_s18  ;;  %2799 = vrot.lane.b32.xlu1 %v8932_v44, %s7947_s18 }
 0x252   :  { %2805 = vrot.lane.b32.xlu0 %v8941_v42, %s7947_s18  ;;  %2803 = vrot.lane.b32.xlu1 %v8938_v36, %s7947_s18 }
 0x256   :  { %2809 = vrot.lane.b32.xlu0 %v8947_v19, %s7947_s18  ;;  %2807 = vrot.lane.b32.xlu1 %v8944_v33, %s7947_s18 }
 0x25a   :  { %2813 = vrot.lane.b32.xlu0 %v8966_v11, %s7947_s18  ;;  %2811 = vrot.lane.b32.xlu1 %v8954_v38, %s7947_s18 }
 0x25e   :  { %2817 = vrot.lane.b32.xlu0 %v8969_v17, %s7947_s18  ;;  %2815 = vrot.lane.b32.xlu1 %v8957_v39, %s7947_s18 }
 0x262   :  { %2821 = vrot.lane.b32.xlu0 %v8972_v12, %s7947_s18  ;;  %2819 = vrot.lane.b32.xlu1 %v8960_v37, %s7947_s18 }
 0x266   :  { %2825 = vrot.lane.b32.xlu0 %v8975_v15, %s7947_s18  ;;  %2823 = vrot.lane.b32.xlu1 %v8963_v5, %s7947_s18 }
 0x2a0   :  { %v7481_v2 = vpop.permute.xlu0 %7480  ;;  %v7476_v52 = vpop.permute.xlu1 %7475 }
 0x2a1   :  { %v7478_v54 = vunpack.i.h.bf16 %v7476_v52  ;;  %v7477_v55 = vunpack.i.l.bf16 %v7476_v52  ;;  %v7483_v6 = vunpack.i.h.bf16 %v7481_v2  ;;  %v7482_v47 = vunpack.i.l.bf16 %v7481_v2 }
 0x2a3   :  { %v2382_v4 = vsel %vm392_vm1, %v11939_v20, %v7477_v55  ;;  %v2389_v7 = vsel %vm392_vm1, %v11941_v14, %v7478_v54 }
 0x2a4   :  { %v7491_v59 = vpop.permute.xlu0 %7490  ;;  %v7486_v23 = vpop.permute.xlu1 %7485  ;;  %v2383_v1 = vsel %vm394_vm2, %v2382_v4, %v7482_v47  ;;  %v2390_v8 = vsel %vm394_vm2, %v2389_v7, %v7483_v6  ;;  %v11945_v6 = vld [vmem:[#allocation8_spill] sm:$0xff] }
 0x2a5   :  { %v7488_v58 = vunpack.i.h.bf16 %v7486_v23  ;;  %v7487_v60 = vunpack.i.l.bf16 %v7486_v23  ;;  %v7493_v10 = vunpack.i.h.bf16 %v7491_v59  ;;  %v7492_v0 = vunpack.i.l.bf16 %v7491_v59 }
 0x2a6   :  { %v7473_v47 = vunpack.i.h.bf16 %v11945_v6  ;;  %v7472_v53 = vunpack.i.l.bf16 %v11945_v6 }
 0x2a7   :  { %v2384_v50 = vsel %vm396_vm3, %v2383_v1, %v7487_v60  ;;  %v2391_v25 = vsel %vm396_vm3, %v2390_v8, %v7488_v58 }
 0x2a8   :  { %v7501_v51 = vpop.permute.xlu0 %7500  ;;  %v7496_v26 = vpop.permute.xlu1 %7495  ;;  %v2385_v54 = vsel %vm398_vm4, %v2384_v50, %v7492_v0  ;;  %v2392_v55 = vsel %vm398_vm4, %v2391_v25, %v7493_v10  ;;  %v2005_v9 = vsel %vm404_vm7, %v2004_v57, %v7473_v47  ;;  %v1998_v23 = vsel %vm404_vm7, %v1997_v34, %v7472_v53 }
 0x2a9   :  { %v7498_v22 = vunpack.i.h.bf16 %v7496_v26  ;;  %v7497_v24 = vunpack.i.l.bf16 %v7496_v26  ;;  %v7503_v2 = vunpack.i.h.bf16 %v7501_v51  ;;  %v7502_v52 = vunpack.i.l.bf16 %v7501_v51 }
 0x2ab   :  { %v2386_v35 = vsel %vm400_vm5, %v2385_v54, %v7497_v24  ;;  %v2393_v20 = vsel %vm400_vm5, %v2392_v55, %v7498_v22 }
 0x2ac   :  { %v9272_v4 = vpop.permute.xlu0 %7510  ;;  %v7506_v46 = vpop.permute.xlu1 %7505  ;;  %v2394_v18 = vsel %vm402_vm6, %v2393_v20, %v7503_v2  ;;  %v2387_v27 = vsel %vm402_vm6, %v2386_v35, %v7502_v52 }
 0x2ad   :  { %v7508_v14 = vunpack.i.h.bf16 %v7506_v46  ;;  %v7507_v7 = vunpack.i.l.bf16 %v7506_v46 }
 0x2af   :  { %v2395_v59 = vsel %vm404_vm7, %v2394_v18, %v7508_v14  ;;  %v2388_v49 = vsel %vm404_vm7, %v2387_v27, %v7507_v7 }
 0x2b0   :  { %v9282_v13 = vpop.permute.xlu0 %7520  ;;  %v9284_v40 = vpop.permute.xlu1 %7515  ;;  %v7260_v58 = vpack.c.bf16 %v2395_v59, %v2005_v9  ;;  %v7262_v60 = vpack.c.bf16 %v2388_v49, %v1998_v23 }
 0x2b2   :  { %7261 = vmatprep.subr.bf16.mxu0 %v7260_v58 }
 0x2b3   :  { %7263 = vmatpush1.bf16.msra.mxu0 %v7262_v60 }
 0x2b4   :  { %v9286_v10 = vpop.permute.xlu0 %7530  ;;  %v9288_v0 = vpop.permute.xlu1 %7525 }
 0x2b8   :  { %v9290_v1 = vpop.permute.xlu0 %7540  ;;  %v9292_v8 = vpop.permute.xlu1 %7535 }
 0x2bc   :  { %v2798_v50 = vpop.permute.xlu0 %2797  ;;  %v2796_v25 = vpop.permute.xlu1 %2795 }
 0x2c0   :  { %v2802_v62 = vpop.permute.xlu0 %2801  ;;  %v2800_v61 = vpop.permute.xlu1 %2799 }
 0x2c4   :  { %v2806_v30 = vpop.permute.xlu0 %2805  ;;  %v2804_v63 = vpop.permute.xlu1 %2803 }
 0x2c5   :  { %v2979_v2 = vcombine.low %v2798_v50, %v2806_v30  ;;  %v2980_v6 = vcombine.high %v2798_v50, %v2806_v30  ;;  %v2843_v47 = vcombine.low %v2796_v25, %v2804_v63  ;;  %v2844_v53 = vcombine.high %v2796_v25, %v2804_v63 }
 0x2c7   :  { %v2987_v14 = vrot.slane %v2979_v2, %v8080_v31  ;;  %v9304_v34 = vrot.slane %v2980_v6, %v8080_v31  ;;  %v2851_v27 = vrot.slane %v2843_v47, %v8080_v31  ;;  %v9308_v9 = vrot.slane %v2844_v53, %v8080_v31 }
 0x2c8   :  { %v2810_v16 = vpop.permute.xlu0 %2809  ;;  %v2808_v51 = vpop.permute.xlu1 %2807 }
 0x2c9   :  { %v2995_v3 = vcombine.low %v2802_v62, %v2810_v16  ;;  %v2996_v22 = vcombine.high %v2802_v62, %v2810_v16  ;;  %v2859_v24 = vcombine.low %v2800_v61, %v2808_v51  ;;  %v2860_v52 = vcombine.high %v2800_v61, %v2808_v51 }
 0x2cb   :  { %v3003_v35 = vrot.slane %v2995_v3, %v8080_v31  ;;  %v9296_v20 = vrot.slane %v2996_v22, %v8080_v31  ;;  %v2867_v46 = vrot.slane %v2859_v24, %v8080_v31  ;;  %v9301_v7 = vrot.slane %v2860_v52, %v8080_v31 }
 0x2cc   :  { %v2814_v26 = vpop.permute.xlu0 %2813  ;;  %v2812_v48 = vpop.permute.xlu1 %2811 }
 0x2cd   :  { %v3043_v59 = vcombine.low %v2987_v14, %v3003_v35  ;;  %v3044_v58 = vcombine.high %v2987_v14, %v3003_v35  ;;  %v3059_v60 = vcombine.low %v9304_v34, %v9296_v20  ;;  %v3060_v50 = vcombine.high %v9304_v34, %v9296_v20 }
 0x2ce   :  { %v2907_v25 = vcombine.low %v2851_v27, %v2867_v46  ;;  %v2908_v62 = vcombine.high %v2851_v27, %v2867_v46  ;;  %v2923_v61 = vcombine.low %v9308_v9, %v9301_v7  ;;  %v2924_v52 = vcombine.high %v9308_v9, %v9301_v7 }
 0x2cf   :  { %v9317_v2 = vrot.slane %v3043_v59, %v8098_v43  ;;  %v3067_v20 = vrot.slane %v3059_v60, %v8098_v43 }
 0x2d0   :  { %v2818_v54 = vpop.permute.xlu0 %2817  ;;  %v2816_v55 = vpop.permute.xlu1 %2815  ;;  %v9332_v7 = vrot.slane %v2907_v25, %v8098_v43 }
 0x2d4   :  { %v2822_v57 = vpop.permute.xlu0 %2821  ;;  %v2820_v18 = vpop.permute.xlu1 %2819 }
 0x2d5   :  { %v3011_v23 = vcombine.low %v2814_v26, %v2822_v57  ;;  %v3012_v49 = vcombine.high %v2814_v26, %v2822_v57  ;;  %v2875_v30 = vcombine.low %v2812_v48, %v2820_v18  ;;  %v2876_v63 = vcombine.high %v2812_v48, %v2820_v18 }
 0x2d7   :  { %v3019_v6 = vrot.slane %v3011_v23, %v8080_v31  ;;  %v3026_v47 = vrot.slane %v3012_v49, %v8080_v31  ;;  %v2883_v46 = vrot.slane %v2875_v30, %v8080_v31  ;;  %v2890_v14 = vrot.slane %v2876_v63, %v8080_v31 }
 0x2d8   :  { %v2826_v16 = vpop.permute.xlu0 %2825  ;;  %v2824_v51 = vpop.permute.xlu1 %2823  ;;  %v2922_v63 = vrot.slane %v2908_v62, %v8098_v43 }
 0x2d9   :  { %v3027_v3 = vcombine.low %v2818_v54, %v2826_v16  ;;  %v3028_v22 = vcombine.high %v2818_v54, %v2826_v16  ;;  %v2891_v24 = vcombine.low %v2816_v55, %v2824_v51  ;;  %v2892_v26 = vcombine.high %v2816_v55, %v2824_v51 }
 0x2da   :  { %v3058_v55 = vrot.slane %v3044_v58, %v8098_v43 }
 0x2db   :  { %v3035_v53 = vrot.slane %v3027_v3, %v8080_v31  ;;  %v3042_v48 = vrot.slane %v3028_v22, %v8080_v31  ;;  %v2899_v35 = vrot.slane %v2891_v24, %v8080_v31  ;;  %v2906_v54 = vrot.slane %v2892_v26, %v8080_v31 }
 0x2dc   :  { %v2931_v3 = vrot.slane %v2923_v61, %v8098_v43 }
 0x2dd   :  { %v3075_v57 = vcombine.low %v3019_v6, %v3035_v53  ;;  %v3076_v18 = vcombine.high %v3019_v6, %v3035_v53  ;;  %v3091_v34 = vcombine.low %v3026_v47, %v3042_v48  ;;  %v3092_v27 = vcombine.high %v3026_v47, %v3042_v48 }
 0x2de   :  { %v2939_v9 = vcombine.low %v2883_v46, %v2899_v35  ;;  %v2940_v59 = vcombine.high %v2883_v46, %v2899_v35  ;;  %v2955_v23 = vcombine.low %v2890_v14, %v2906_v54  ;;  %v2956_v30 = vcombine.high %v2890_v14, %v2906_v54 }
 0x2df   :  { %v9335_v49 = vrot.slane %v3075_v57, %v8098_v43  ;;  %v3090_v58 = vrot.slane %v3076_v18, %v8098_v43  ;;  %v3099_v60 = vrot.slane %v3091_v34, %v8098_v43  ;;  %v3106_v53 = vrot.slane %v3092_v27, %v8098_v43 }
 0x2e0   :  { %v9341_v25 = vrot.slane %v2939_v9, %v8098_v43  ;;  %v2954_v16 = vrot.slane %v2940_v59, %v8098_v43  ;;  %v2963_v51 = vrot.slane %v2955_v23, %v8098_v43  ;;  %v2970_v48 = vrot.slane %v2956_v30, %v8098_v43 }
 0x2e1   :  { %v3107_v22 = vcombine.low %v9317_v2, %v9335_v49  ;;  %v3109_v24 = vcombine.low %v3058_v55, %v3090_v58  ;;  %v3108_v26 = vcombine.high %v9317_v2, %v9335_v49  ;;  %v3111_v61 = vcombine.low %v3067_v20, %v3099_v60 }
 0x2e2   :  { %v2973_v62 = vcombine.low %v2922_v63, %v2954_v16  ;;  %v2972_v47 = vcombine.high %v9332_v7, %v9341_v25  ;;  %v2975_v35 = vcombine.low %v2931_v3, %v2963_v51  ;;  %v2974_v14 = vcombine.high %v2922_v63, %v2954_v16 }
 0x2e3   :  { %v3110_v57 = vcombine.high %v3058_v55, %v3090_v58  ;;  %v3074_v18 = vrot.slane %v3060_v50, %v8098_v43  ;;  %v2938_v34 = vrot.slane %v2924_v52, %v8098_v43  ;;  %v2976_v6 = vcombine.high %v2931_v3, %v2963_v51 }
 0x2e4   :  { %v7549_v54 = vpack.i.bf16 %v3109_v24, %v2973_v62  ;;  %v7544_v46 = vpack.i.bf16 %v3108_v26, %v2972_v47  ;;  %v7559_v23 = vpack.i.bf16 %v3111_v61, %v2975_v35  ;;  %v3112_v30 = vcombine.high %v3067_v20, %v3099_v60 }
 0x2e5   :  { %v2977_v9 = vcombine.low %v2938_v34, %v2970_v48  ;;  %v3113_v59 = vcombine.low %v3074_v18, %v3106_v53  ;;  %v7554_v27 = vpack.i.bf16 %v3110_v57, %v2974_v14  ;;  %v2978_v58 = vcombine.high %v2938_v34, %v2970_v48 }
 0x2e6   :  { %7550 = vrot.lane.b32.xlu0 %v7549_v54, %s7952_s21  ;;  %7545 = vrot.lane.b32.xlu1 %v7544_v46, %s7951_s20  ;;  %v7564_v55 = vpack.i.bf16 %v3112_v30, %v2976_v6  ;;  %v3114_v50 = vcombine.high %v3074_v18, %v3106_v53  ;;  %v7533_v20 = vunpack.i.h.bf16 %v9286_v10  ;;  %v7532_v60 = vunpack.i.l.bf16 %v9286_v10 }
 0x2e7   :  { %v7569_v63 = vpack.i.bf16 %v3113_v59, %v2977_v9  ;;  %v7538_v47 = vunpack.i.h.bf16 %v9292_v8  ;;  %v7537_v53 = vunpack.i.l.bf16 %v9292_v8  ;;  %v7543_v59 = vunpack.i.h.bf16 %v9290_v1 }
 0x2e8   :  { %v7574_v52 = vpack.i.bf16 %v3114_v50, %v2978_v58 }
 0x2ea   :  { %7560 = vrot.lane.b32.xlu0 %v7559_v23, %s7953_s26  ;;  %7555 = vrot.lane.b32.xlu1 %v7554_v27, %s7950_s19  ;;  %v7542_v23 = vunpack.i.l.bf16 %v9290_v1 }
 0x2ee   :  { %7570 = vrot.lane.b32.xlu0 %v7569_v63, %s7955_s7  ;;  %7565 = vrot.lane.b32.xlu1 %v7564_v55, %s7954_s27 }
 0x2f2   :  { %3185 = vrot.lane.b32.xlu0 %v8926_v28, %s7957_s15  ;;  %7575 = vrot.lane.b32.xlu1 %v7574_v52, %s7956_s8  ;;  %v2581_v28 = vcombine.low %v9016_v56, %v9021_v21 }
 0x2f6   :  { %3189 = vrot.lane.b32.xlu0 %v8932_v44, %s7957_s15  ;;  %3187 = vrot.lane.b32.xlu1 %v8929_v32, %s7957_s15  ;;  %v2717_v32 = vcombine.low %v9033_v45, %v9036_v29  ;;  %v7513_v44 = vunpack.i.h.bf16 %v9272_v4 }
 0x2fa   :  { %3193 = vrot.lane.b32.xlu0 %v8938_v36, %s7957_s15  ;;  %3191 = vrot.lane.b32.xlu1 %v8935_v41, %s7957_s15  ;;  %v7512_v41 = vunpack.i.l.bf16 %v9272_v4  ;;  %v7518_v36 = vunpack.i.h.bf16 %v9284_v40 }
 0x2fe   :  { %3197 = vrot.lane.b32.xlu0 %v8944_v33, %s7957_s15  ;;  %3195 = vrot.lane.b32.xlu1 %v8941_v42, %s7957_s15  ;;  %v7517_v42 = vunpack.i.l.bf16 %v9284_v40  ;;  %v2788_v33 = vsel %vm392_vm1, %v2717_v32, %v7513_v44 }
 0x302   :  { %3201 = vrot.lane.b32.xlu0 %v8954_v38, %s7957_s15  ;;  %3199 = vrot.lane.b32.xlu1 %v8947_v19, %s7957_s15  ;;  %v2781_v19 = vsel %vm392_vm1, %v2581_v28, %v7512_v41  ;;  %v7523_v38 = vunpack.i.h.bf16 %v9282_v13 }
 0x306   :  { %3205 = vrot.lane.b32.xlu0 %v8957_v39, %s7957_s15  ;;  %3203 = vrot.lane.b32.xlu1 %v8966_v11, %s7957_s15  ;;  %v7522_v39 = vunpack.i.l.bf16 %v9282_v13  ;;  %v11946_v13 = vcombine.low %v9332_v7, %v9341_v25 }
 0x30a   :  { %3209 = vrot.lane.b32.xlu0 %v8960_v37, %s7957_s15  ;;  %3207 = vrot.lane.b32.xlu1 %v8969_v17, %s7957_s15  ;;  %v2789_v37 = vsel %vm394_vm2, %v2788_v33, %v7518_v36 }
 0x30b   :  { %v2790_v16 = vsel %vm396_vm3, %v2789_v37, %v7523_v38 }
 0x30e   :  { %3213 = vrot.lane.b32.xlu0 %v8963_v5, %s7957_s15  ;;  %3211 = vrot.lane.b32.xlu1 %v8972_v12, %s7957_s15  ;;  %v2782_v5 = vsel %vm394_vm2, %v2781_v19, %v7517_v42  ;;  %v7528_v12 = vunpack.i.h.bf16 %v9288_v0 }
 0x310   :  { %v2791_v2 = vsel %vm398_vm4, %v2790_v16, %v7528_v12  ;;  %v9511_v16 = vld [vmem:[%s11816_s0 + $0x150] sm:$0xff] }
 0x311   :  { %v2792_v46 = vsel %vm400_vm5, %v2791_v2, %v7533_v20  ;;  %v9525_v2 = vld [vmem:[%s11816_s0 + $0x168] sm:$0xff] }
 0x312   :  { %3215 = vrot.lane.b32.xlu1 %v8975_v15, %s7957_s15  ;;  %v7527_v15 = vunpack.i.l.bf16 %v9288_v0  ;;  %v2783_v0 = vsel %vm396_vm3, %v2782_v5, %v7522_v39  ;;  %v2793_v55 = vsel %vm402_vm6, %v2792_v46, %v7538_v47 }
 0x313   :  { %v2794_v44 = vsel %vm404_vm7, %v2793_v55, %v7543_v59 }
 0x314   :  { %v2784_v24 = vsel %vm398_vm4, %v2783_v0, %v7527_v15  ;;  %v9464_v15 = vld [vmem:[%s11816_s0 + $0xc0] sm:$0xff] }
 0x315   :  { %v2785_v14 = vsel %vm400_vm5, %v2784_v24, %v7532_v60  ;;  %v9506_v0 = vld [vmem:[%s11816_s0 + $0x120] sm:$0xff]  ;;  %v9520_v24 = vld [vmem:[%s11816_s0 + $0x138] sm:$0xff] }
 0x316   :  { %v2786_v58 = vsel %vm402_vm6, %v2785_v14, %v7537_v53 }
 0x317   :  { %v2787_v41 = vsel %vm404_vm7, %v2786_v58, %v7542_v23 }
 0x358   :  { %v7551_v11 = vpop.permute.xlu0 %7550  ;;  %v7546_v17 = vpop.permute.xlu1 %7545 }
 0x359   :  { %v7548_v56 = vunpack.i.h.bf16 %v7546_v17  ;;  %v7547_v21 = vunpack.i.l.bf16 %v7546_v17  ;;  %v7553_v45 = vunpack.i.h.bf16 %v7551_v11  ;;  %v7552_v29 = vunpack.i.l.bf16 %v7551_v11 }
 0x35b   :  { %v3178_v4 = vsel %vm392_vm1, %v3107_v22, %v7548_v56  ;;  %v3171_v40 = vsel %vm392_vm1, %v11946_v13, %v7547_v21  ;;  %v9469_v56 = vld [vmem:[%s11816_s0 + $0xc8] sm:$0xff]  ;;  %v9474_v21 = vld [vmem:[%s11816_s0 + $0xd8] sm:$0xff] }
 0x35c   :  { %v7561_v51 = vpop.permute.xlu0 %7560  ;;  %v7556_v3 = vpop.permute.xlu1 %7555  ;;  %v3172_v25 = vsel %vm394_vm2, %v3171_v40, %v7552_v29  ;;  %v3179_v6 = vsel %vm394_vm2, %v3178_v4, %v7553_v45  ;;  %v9479_v45 = vld [vmem:[%s11816_s0 + $0xf0] sm:$0xff]  ;;  %v9484_v29 = vld [vmem:[%s11816_s0 + $0x108] sm:$0xff]  ;;  %v9489_v4 = vld [vmem:[%s11816_s0 + $0xe0] sm:$0xff] }
 0x35d   :  { %v7558_v49 = vunpack.i.h.bf16 %v7556_v3  ;;  %v7557_v22 = vunpack.i.l.bf16 %v7556_v3  ;;  %v7563_v26 = vunpack.i.h.bf16 %v7561_v51  ;;  %v7562_v7 = vunpack.i.l.bf16 %v7561_v51  ;;  %v9494_v13 = vld [vmem:[%s11816_s0 + $0xf8] sm:$0xff]  ;;  %v9499_v40 = vld [vmem:[%s11816_s0 + $0x110] sm:$0xff] }
 0x35e   :  { %v3575_v51 = vcombine.low %v9464_v15, %v9479_v45  ;;  %v3591_v3 = vcombine.low %v9474_v21, %v9484_v29  ;;  %v3576_v59 = vcombine.high %v9464_v15, %v9479_v45 }
 0x35f   :  { %v3173_v10 = vsel %vm396_vm3, %v3172_v25, %v7557_v22  ;;  %v3180_v62 = vsel %vm396_vm3, %v3179_v6, %v7558_v49  ;;  %v3711_v49 = vcombine.low %v9469_v56, %v9494_v13  ;;  %v3727_v22 = vcombine.low %v9489_v4, %v9499_v40  ;;  %v9539_v25 = vld [vmem:[%s11816_s0 + $0x140] sm:$0xff]  ;;  %v9544_v6 = vld [vmem:[%s11816_s0 + $0x158] sm:$0xff] }
 0x360   :  { %v7571_v48 = vpop.permute.xlu0 %7570  ;;  %v7566_v35 = vpop.permute.xlu1 %7565  ;;  %v3174_v34 = vsel %vm398_vm4, %v3173_v10, %v7562_v7  ;;  %v3181_v9 = vsel %vm398_vm4, %v3180_v62, %v7563_v26  ;;  %v9534_v7 = vld [vmem:[%s11816_s0 + $0x128] sm:$0xff]  ;;  %v9549_v10 = vld [vmem:[%s11816_s0 + $0x170] sm:$0xff]  ;;  %v3607_v62 = vcombine.low %v9506_v0, %v9511_v16 }
 0x361   :  { %v7568_v61 = vunpack.i.h.bf16 %v7566_v35  ;;  %v7567_v54 = vunpack.i.l.bf16 %v7566_v35  ;;  %v7573_v57 = vunpack.i.h.bf16 %v7571_v48  ;;  %v7572_v18 = vunpack.i.l.bf16 %v7571_v48 }
 0x362   :  { %v9558_v35 = vrot.slane %v3575_v51, %v8080_v31  ;;  %v9566_v14 = vrot.slane %v3711_v49, %v8080_v31 }
 0x363   :  { %v3175_v8 = vsel %vm400_vm5, %v3174_v34, %v7567_v54  ;;  %v3182_v27 = vsel %vm400_vm5, %v3181_v9, %v7568_v61  ;;  %v9561_v61 = vrot.slane %v3591_v3, %v8080_v31  ;;  %v3623_v54 = vcombine.low %v9520_v24, %v9525_v2 }
 0x364   :  { %v9441_v30 = vpop.permute.xlu0 %3185  ;;  %v7576_v63 = vpop.permute.xlu1 %7575  ;;  %v3183_v28 = vsel %vm402_vm6, %v3182_v27, %v7573_v57  ;;  %v3176_v32 = vsel %vm402_vm6, %v3175_v8, %v7572_v18  ;;  %v9569_v57 = vrot.slane %v3727_v22, %v8080_v31  ;;  %v3743_v34 = vcombine.low %v9534_v7, %v9544_v6 }
 0x365   :  { %v7578_v50 = vunpack.i.h.bf16 %v7576_v63  ;;  %v7577_v52 = vunpack.i.l.bf16 %v7576_v63  ;;  %v3759_v9 = vcombine.low %v9539_v25, %v9549_v10  ;;  %v9579_v27 = vrot.slane %v3607_v62, %v8080_v31 }
 0x366   :  { %v3592_v63 = vcombine.high %v9474_v21, %v9484_v29 }
 0x367   :  { %v3184_v1 = vsel %vm404_vm7, %v3183_v28, %v7578_v50  ;;  %v3177_v36 = vsel %vm404_vm7, %v3176_v32, %v7577_v52  ;;  %v9589_v28 = vrot.slane %v3623_v54, %v8080_v31  ;;  %v3639_v32 = vcombine.low %v9558_v35, %v9561_v61 }
 0x368   :  { %v3190_v42 = vpop.permute.xlu0 %3189  ;;  %v9451_v33 = vpop.permute.xlu1 %3187  ;;  %v7264_v19 = vpack.c.bf16 %v3184_v1, %v2794_v44  ;;  %v7266_v38 = vpack.c.bf16 %v3177_v36, %v2787_v41  ;;  %v9611_v22 = vrot.slane %v3759_v9, %v8080_v31 }
 0x36a   :  { %7265 = vmatprep.subr.bf16.mxu0 %v7264_v19 }
 0x36b   :  { %7267 = vmatpush1.bf16.msra.mxu0 %v7266_v38 }
 0x36c   :  { %v9453_v39 = vpop.permute.xlu0 %3193  ;;  %v9455_v37 = vpop.permute.xlu1 %3191 }
 0x36d   :  { %v3233_v47 = vcombine.low %v9441_v30, %v9453_v39  ;;  %v3234_v55 = vcombine.high %v9441_v30, %v9453_v39 }
 0x36f   :  { %v3241_v58 = vrot.slane %v3233_v47, %v8080_v31  ;;  %v3248_v3 = vrot.slane %v3234_v55, %v8080_v31 }
 0x370   :  { %v3198_v5 = vpop.permute.xlu0 %3197  ;;  %v9457_v11 = vpop.permute.xlu1 %3195 }
 0x371   :  { %v3249_v26 = vcombine.low %v3190_v42, %v3198_v5  ;;  %v3250_v46 = vcombine.high %v3190_v42, %v3198_v5  ;;  %v3369_v1 = vcombine.low %v9451_v33, %v9457_v11 }
 0x373   :  { %v3257_v18 = vrot.slane %v3249_v26, %v8080_v31  ;;  %v9594_v44 = vrot.slane %v3250_v46, %v8080_v31  ;;  %v3775_v26 = vcombine.low %v9566_v14, %v9569_v57  ;;  %v9616_v62 = vrot.slane %v3369_v1, %v8080_v31 }
 0x374   :  { %v3202_v17 = vpop.permute.xlu0 %3201  ;;  %v9459_v12 = vpop.permute.xlu1 %3199  ;;  %v9636_v1 = vrot.slane %v3639_v32, %v8098_v43  ;;  %v3671_v32 = vcombine.low %v9579_v27, %v9589_v28 }
 0x375   :  { %v3297_v30 = vcombine.low %v3241_v58, %v3257_v18  ;;  %v3298_v42 = vcombine.high %v3241_v58, %v3257_v18  ;;  %v3385_v19 = vcombine.low %v9455_v37, %v9459_v12  ;;  %v3313_v46 = vcombine.low %v3248_v3, %v9594_v44 }
 0x377   :  { %v9620_v18 = vrot.slane %v3385_v19, %v8080_v31  ;;  %v3312_v55 = vrot.slane %v3298_v42, %v8098_v43 }
 0x378   :  { %v3206_v20 = vpop.permute.xlu0 %3205  ;;  %v9501_v60 = vpop.permute.xlu1 %3203 }
 0x37c   :  { %v3210_v53 = vpop.permute.xlu0 %3209  ;;  %v9555_v48 = vpop.permute.xlu1 %3207 }
 0x37d   :  { %v3265_v23 = vcombine.low %v3202_v17, %v3210_v53  ;;  %v3266_v8 = vcombine.high %v3202_v17, %v3210_v53 }
 0x37f   :  { %v3273_v39 = vrot.slane %v3265_v23, %v8080_v31  ;;  %v3280_v5 = vrot.slane %v3266_v8, %v8080_v31  ;;  %v9627_v23 = vrot.slane %v3297_v30, %v8098_v43 }
 0x380   :  { %v3214_v50 = vpop.permute.xlu0 %3213  ;;  %v9586_v52 = vpop.permute.xlu1 %3211 }
 0x381   :  { %v3281_v41 = vcombine.low %v3206_v20, %v3214_v50  ;;  %v3282_v36 = vcombine.high %v3206_v20, %v3214_v50  ;;  %v3401_v38 = vcombine.low %v9501_v60, %v9586_v52  ;;  %v9608_v20 = vrot.slane %v3743_v34, %v8080_v31 }
 0x383   :  { %v3289_v17 = vrot.slane %v3281_v41, %v8080_v31  ;;  %v3296_v51 = vrot.slane %v3282_v36, %v8080_v31  ;;  %v9623_v34 = vrot.slane %v3401_v38, %v8080_v31  ;;  %v3640_v41 = vcombine.high %v9558_v35, %v9561_v61 }
 0x384   :  { %v3216_v49 = vpop.permute.xlu1 %3215  ;;  %v3776_v36 = vcombine.high %v9566_v14, %v9569_v57  ;;  %v9651_v35 = vrot.slane %v3775_v26, %v8098_v43  ;;  %v3314_v61 = vcombine.high %v3248_v3, %v9594_v44  ;;  %v3321_v14 = vrot.slane %v3313_v46, %v8098_v43 }
 0x385   :  { %v3329_v47 = vcombine.low %v3273_v39, %v3289_v17  ;;  %v3330_v53 = vcombine.high %v3273_v39, %v3289_v17  ;;  %v3345_v54 = vcombine.low %v3280_v5, %v3296_v51  ;;  %v3417_v9 = vcombine.low %v9555_v48, %v3216_v49 }
 0x386   :  { %v3346_v30 = vcombine.high %v3280_v5, %v3296_v51  ;;  %v3433_v39 = vcombine.low %v9616_v62, %v9620_v18  ;;  %v3672_v57 = vcombine.high %v9579_v27, %v9589_v28  ;;  %v3402_v5 = vcombine.high %v9501_v60, %v9586_v52 }
 0x387   :  { %v9630_v8 = vrot.slane %v3329_v47, %v8098_v43  ;;  %v3344_v58 = vrot.slane %v3330_v53, %v8098_v43  ;;  %v3425_v50 = vrot.slane %v3417_v9, %v8080_v31  ;;  %v3353_v42 = vrot.slane %v3345_v54, %v8098_v43 }
 0x388   :  { %v3418_v51 = vcombine.high %v9555_v48, %v3216_v49  ;;  %v3807_v44 = vcombine.low %v9608_v20, %v9611_v22  ;;  %v3360_v53 = vrot.slane %v3346_v30, %v8098_v43  ;;  %v9671_v27 = vrot.slane %v3433_v39, %v8098_v43 }
 0x389   :  { %v3362_v19 = vcombine.high %v9627_v23, %v9630_v8  ;;  %v3363_v38 = vcombine.low %v3312_v55, %v3344_v58  ;;  %v3465_v17 = vcombine.low %v9623_v34, %v3425_v50  ;;  %v3364_v3 = vcombine.high %v3312_v55, %v3344_v58 }
 0x38a   :  { %v3365_v26 = vcombine.low %v3321_v14, %v3353_v42  ;;  %v3361_v54 = vcombine.low %v9627_v23, %v9630_v8  ;;  %v9674_v60 = vrot.slane %v3640_v41, %v8098_v43  ;;  %v9677_v48 = vrot.slane %v3776_v36, %v8098_v43 }
 0x38b   :  { %3506 = vrot.lane.b32.xlu0 %v3362_v19, %s7951_s20  ;;  %3510 = vrot.lane.b32.xlu1 %v3363_v38, %s7952_s21  ;;  %v9663_v47 = vrot.slane %v3465_v17, %v8098_v43  ;;  %v3808_v52 = vcombine.high %v9608_v20, %v9611_v22  ;;  %v3370_v28 = vcombine.high %v9451_v33, %v9457_v11 }
 0x38c   :  { %v3386_v49 = vcombine.high %v9455_v37, %v9459_v12  ;;  %v3328_v46 = vrot.slane %v3314_v61, %v8098_v43  ;;  %v3416_v9 = vrot.slane %v3402_v5, %v8080_v31  ;;  %v3608_v55 = vcombine.high %v9506_v0, %v9511_v16 }
 0x38d   :  { %v3624_v20 = vcombine.high %v9520_v24, %v9525_v2  ;;  %v3497_v33 = vcombine.low %v9671_v27, %v9663_v47  ;;  %v3432_v11 = vrot.slane %v3418_v51, %v8080_v31  ;;  %v3466_v37 = vcombine.high %v9623_v34, %v3425_v50 }
 0x38e   :  { %v3366_v12 = vcombine.high %v3321_v14, %v3353_v42  ;;  %v3367_v22 = vcombine.low %v3328_v46, %v3360_v53  ;;  %v3712_v58 = vcombine.high %v9469_v56, %v9494_v13  ;;  %v3728_v41 = vcombine.high %v9489_v4, %v9499_v40 }
 0x38f   :  { %3514 = vrot.lane.b32.xlu0 %v3364_v3, %s7950_s19  ;;  %3518 = vrot.lane.b32.xlu1 %v3365_v26, %s7953_s26  ;;  %v3744_v36 = vcombine.high %v9534_v7, %v9544_v6  ;;  %v3760_v30 = vcombine.high %v9539_v25, %v9549_v10  ;;  %v3384_v19 = vrot.slane %v3370_v28, %v8080_v31 }
 0x390   :  { %v3400_v38 = vrot.slane %v3386_v49, %v8080_v31  ;;  %v3434_v34 = vcombine.high %v9616_v62, %v9620_v18  ;;  %v9712_v50 = vrot.slane %v3671_v32, %v8098_v43  ;;  %v3590_v42 = vrot.slane %v3576_v59, %v8080_v31 }
 0x391   :  { %v3606_v39 = vrot.slane %v3592_v63, %v8080_v31  ;;  %v3622_v17 = vrot.slane %v3608_v55, %v8080_v31  ;;  %v3481_v62 = vcombine.low %v3416_v9, %v3432_v11  ;;  %v3368_v18 = vcombine.high %v3328_v46, %v3360_v53 }
 0x392   :  { %v3498_v61 = vcombine.high %v9671_v27, %v9663_v47  ;;  %v3480_v32 = vrot.slane %v3466_v37, %v8098_v43  ;;  %v3638_v14 = vrot.slane %v3624_v20, %v8080_v31  ;;  %v3726_v5 = vrot.slane %v3712_v58, %v8080_v31 }
 0x393   :  { %3522 = vrot.lane.b32.xlu0 %v3366_v12, %s7954_s27  ;;  %3526 = vrot.lane.b32.xlu1 %v3367_v22, %s7955_s7  ;;  %v3742_v59 = vrot.slane %v3728_v41, %v8080_v31  ;;  %v3758_v51 = vrot.slane %v3744_v36, %v8080_v31  ;;  %v3449_v3 = vcombine.low %v3384_v19, %v3400_v38 }
 0x394   :  { %v3448_v63 = vrot.slane %v3434_v34, %v8098_v43  ;;  %v3774_v26 = vrot.slane %v3760_v30, %v8080_v31  ;;  %v9735_v53 = vrot.slane %v3807_v44, %v8098_v43  ;;  %v3686_v28 = vrot.slane %v3672_v57, %v8098_v43 }
 0x395   :  { %v3822_v49 = vrot.slane %v3808_v52, %v8098_v43  ;;  %v3655_v46 = vcombine.low %v3590_v42, %v3606_v39  ;;  %v3482_v55 = vcombine.high %v3416_v9, %v3432_v11  ;;  %v3489_v12 = vrot.slane %v3481_v62, %v8098_v43 }
 0x396   :  { %v3499_v20 = vcombine.low %v3448_v63, %v3480_v32  ;;  %v3500_v37 = vcombine.high %v3448_v63, %v3480_v32  ;;  %v3704_v22 = vcombine.high %v9636_v1, %v9712_v50  ;;  %v3687_v58 = vcombine.low %v3622_v17, %v3638_v14 }
 0x397   :  { %3530 = vrot.lane.b32.xlu0 %v3368_v18, %s7956_s8  ;;  %3534 = vrot.lane.b32.xlu1 %v3498_v61, %s7951_s20  ;;  %v3791_v41 = vcombine.low %v3726_v5, %v3742_v59  ;;  %v3450_v36 = vcombine.high %v3384_v19, %v3400_v38  ;;  %v3457_v57 = vrot.slane %v3449_v3, %v8098_v43 }
 0x398   :  { %v3823_v44 = vcombine.low %v3758_v51, %v3774_v26  ;;  %v3840_v52 = vcombine.high %v9651_v35, %v9735_v53  ;;  %v3705_v9 = vcombine.low %v9674_v60, %v3686_v28  ;;  %v3841_v11 = vcombine.low %v9677_v48, %v3822_v49 }
 0x399   :  { %v3663_v30 = vrot.slane %v3655_v46, %v8098_v43  ;;  %v3501_v34 = vcombine.low %v3457_v57, %v3489_v12  ;;  %v3502_v62 = vcombine.high %v3457_v57, %v3489_v12  ;;  %v3496_v19 = vrot.slane %v3482_v55, %v8098_v43 }
 0x39a   :  { %v3656_v38 = vcombine.high %v3590_v42, %v3606_v39  ;;  %v3695_v18 = vrot.slane %v3687_v58, %v8098_v43  ;;  %v3799_v61 = vrot.slane %v3791_v41, %v8098_v43  ;;  %v3688_v32 = vcombine.high %v3622_v17, %v3638_v14 }
 0x39b   :  { %3538 = vrot.lane.b32.xlu0 %v3499_v20, %s7952_s21  ;;  %3542 = vrot.lane.b32.xlu1 %v3500_v37, %s7950_s19  ;;  %v3792_v3 = vcombine.high %v3726_v5, %v3742_v59  ;;  %v3464_v63 = vrot.slane %v3450_v36, %v8098_v43  ;;  %v3831_v20 = vrot.slane %v3823_v44, %v8098_v43 }
 0x39c   :  { %v3824_v46 = vcombine.high %v3758_v51, %v3774_v26  ;;  %v3706_v37 = vcombine.high %v9674_v60, %v3686_v28  ;;  %v7579_v42 = vpack.i.bf16 %v3840_v52, %v3704_v22  ;;  %v3842_v39 = vcombine.high %v9677_v48, %v3822_v49 }
 0x39d   :  { %v3503_v12 = vcombine.low %v3464_v63, %v3496_v19  ;;  %v3504_v55 = vcombine.high %v3464_v63, %v3496_v19  ;;  %v7584_v58 = vpack.i.bf16 %v3841_v11, %v3705_v9  ;;  %v3707_v41 = vcombine.low %v3663_v30, %v3695_v18 }
 0x39e   :  { %v3670_v17 = vrot.slane %v3656_v38, %v8098_v43  ;;  %v3702_v14 = vrot.slane %v3688_v32, %v8098_v43  ;;  %v3843_v5 = vcombine.low %v3799_v61, %v3831_v20  ;;  %v3806_v59 = vrot.slane %v3792_v3, %v8098_v43 }
 0x39f   :  { %3546 = vrot.lane.b32.xlu0 %v3501_v34, %s7953_s26  ;;  %3550 = vrot.lane.b32.xlu1 %v3502_v62, %s7954_s27  ;;  %v3838_v60 = vrot.slane %v3824_v46, %v8098_v43  ;;  %v7589_v51 = vpack.i.bf16 %v3842_v39, %v3706_v37  ;;  %v3708_v26 = vcombine.high %v3663_v30, %v3695_v18 }
 0x3a0   :  { %v3709_v28 = vcombine.low %v3670_v17, %v3702_v14  ;;  %v7594_v48 = vpack.i.bf16 %v3843_v5, %v3707_v41  ;;  %v3844_v49 = vcombine.high %v3799_v61, %v3831_v20  ;;  %v3710_v36 = vcombine.high %v3670_v17, %v3702_v14 }
 0x3a1   :  { %v3845_v22 = vcombine.low %v3806_v59, %v3838_v60  ;;  %v3846_v52 = vcombine.high %v3806_v59, %v3838_v60 }
 0x3a2   :  { %v7599_v57 = vpack.i.bf16 %v3844_v49, %v3708_v26 }
 0x3a3   :  { %3554 = vrot.lane.b32.xlu0 %v3503_v12, %s7955_s7  ;;  %3558 = vrot.lane.b32.xlu1 %v3504_v55, %s7956_s8  ;;  %v7604_v44 = vpack.i.bf16 %v3845_v22, %v3709_v28  ;;  %v7609_v9 = vpack.i.bf16 %v3846_v52, %v3710_v36 }
 0x3a7   :  { %7580 = vrot.lane.b32.xlu0 %v7579_v42, %s7951_s20  ;;  %7585 = vrot.lane.b32.xlu1 %v7584_v58, %s7952_s21 }
 0x3ab   :  { %7590 = vrot.lane.b32.xlu0 %v7589_v51, %s7950_s19  ;;  %7595 = vrot.lane.b32.xlu1 %v7594_v48, %s7953_s26 }
 0x3af   :  { %7600 = vrot.lane.b32.xlu0 %v7599_v57, %s7954_s27  ;;  %7605 = vrot.lane.b32.xlu1 %v7604_v44, %s7955_s7 }
 0x3b3   :  { %7610 = vrot.lane.b32.xlu0 %v7609_v9, %s7956_s8  ;;  %3933 = vrot.lane.b32.xlu1 %v9464_v15, %s7947_s18 }
 0x3b7   :  { %3935 = vrot.lane.b32.xlu0 %v9469_v56, %s7947_s18  ;;  %3937 = vrot.lane.b32.xlu1 %v9474_v21, %s7947_s18 }
 0x3bb   :  { %3939 = vrot.lane.b32.xlu0 %v9489_v4, %s7947_s18  ;;  %3941 = vrot.lane.b32.xlu1 %v9479_v45, %s7947_s18 }
 0x3bf   :  { %3943 = vrot.lane.b32.xlu0 %v9494_v13, %s7947_s18  ;;  %3945 = vrot.lane.b32.xlu1 %v9484_v29, %s7947_s18 }
 0x3c3   :  { %3947 = vrot.lane.b32.xlu0 %v9499_v40, %s7947_s18  ;;  %3949 = vrot.lane.b32.xlu1 %v9506_v0, %s7947_s18 }
 0x3c7   :  { %3951 = vrot.lane.b32.xlu0 %v9534_v7, %s7947_s18  ;;  %3953 = vrot.lane.b32.xlu1 %v9520_v24, %s7947_s18 }
 0x3cb   :  { %3955 = vrot.lane.b32.xlu0 %v9539_v25, %s7947_s18  ;;  %3957 = vrot.lane.b32.xlu1 %v9511_v16, %s7947_s18 }
 0x3cf   :  { %3959 = vrot.lane.b32.xlu0 %v9544_v6, %s7947_s18  ;;  %3961 = vrot.lane.b32.xlu1 %v9525_v2, %s7947_s18 }
 0x3d3   :  { %3963 = vrot.lane.b32.xlu0 %v9549_v10, %s7947_s18 }
 0x3fd   :  { %v3507_v11 = vpop.permute.xlu0 %3506  ;;  %v3511_v30 = vpop.permute.xlu1 %3510 }
 0x3fe   :  { %v3561_v32 = vsel %vm392_vm1, %v3361_v54, %v3507_v11 }
 0x3ff   :  { %v3562_v37 = vsel %vm394_vm2, %v3561_v32, %v3511_v30 }
 0x401   :  { %v3515_v34 = vpop.permute.xlu0 %3514  ;;  %v3519_v62 = vpop.permute.xlu1 %3518 }
 0x402   :  { %v3563_v12 = vsel %vm396_vm3, %v3562_v37, %v3515_v34 }
 0x403   :  { %v3564_v8 = vsel %vm398_vm4, %v3563_v12, %v3519_v62 }
 0x405   :  { %v3523_v19 = vpop.permute.xlu0 %3522  ;;  %v3527_v38 = vpop.permute.xlu1 %3526 }
 0x406   :  { %v3565_v47 = vsel %vm400_vm5, %v3564_v8, %v3523_v19 }
 0x407   :  { %v3566_v41 = vsel %vm402_vm6, %v3565_v47, %v3527_v38 }
 0x409   :  { %v3531_v18 = vpop.permute.xlu0 %3530  ;;  %v3535_v61 = vpop.permute.xlu1 %3534 }
 0x40a   :  { %v3568_v3 = vsel %vm392_vm1, %v3497_v33, %v3535_v61  ;;  %v3567_v14 = vsel %vm404_vm7, %v3566_v41, %v3531_v18 }
 0x40d   :  { %v3539_v63 = vpop.permute.xlu0 %3538  ;;  %v3543_v20 = vpop.permute.xlu1 %3542 }
 0x40e   :  { %v3569_v46 = vsel %vm394_vm2, %v3568_v3, %v3539_v63 }
 0x40f   :  { %v3570_v55 = vsel %vm396_vm3, %v3569_v46, %v3543_v20 }
 0x411   :  { %v3547_v42 = vpop.permute.xlu0 %3546  ;;  %v3551_v39 = vpop.permute.xlu1 %3550 }
 0x412   :  { %v3571_v23 = vsel %vm398_vm4, %v3570_v55, %v3547_v42 }
 0x413   :  { %v3572_v54 = vsel %vm400_vm5, %v3571_v23, %v3551_v39 }
 0x415   :  { %v3555_v27 = vpop.permute.xlu0 %3554  ;;  %v3559_v33 = vpop.permute.xlu1 %3558 }
 0x416   :  { %v3573_v58 = vsel %vm402_vm6, %v3572_v54, %v3555_v27 }
 0x417   :  { %v3574_v17 = vsel %vm404_vm7, %v3573_v58, %v3559_v33 }
 0x418   :  { %7103 = vmatprep.subr.mxu0 %v3574_v17 }
 0x419   :  { %v9824_v5 = vpop.permute.xlu0 %7580  ;;  %v9826_v59 = vpop.permute.xlu1 %7585  ;;  %7104 = vmatpush1.msra.mxu0 %v3567_v14 }
 0x41d   :  { %v9828_v60 = vpop.permute.xlu0 %7590  ;;  %v9830_v51 = vpop.permute.xlu1 %7595 }
 0x421   :  { %v9832_v26 = vpop.permute.xlu0 %7600  ;;  %v9834_v28 = vpop.permute.xlu1 %7605 }
 0x425   :  { %v9836_v48 = vpop.permute.xlu0 %7610  ;;  %v3934_v49 = vpop.permute.xlu1 %3933 }
 0x429   :  { %v3936_v22 = vpop.permute.xlu0 %3935  ;;  %v3938_v36 = vpop.permute.xlu1 %3937 }
 0x42d   :  { %v3940_v57 = vpop.permute.xlu0 %3939  ;;  %v3942_v44 = vpop.permute.xlu1 %3941 }
 0x42e   :  { %v3981_v38 = vcombine.low %v3934_v49, %v3942_v44  ;;  %v3982_v32 = vcombine.high %v3934_v49, %v3942_v44 }
 0x430   :  { %v3989_v37 = vrot.slane %v3981_v38, %v8080_v31  ;;  %v9841_v54 = vrot.slane %v3982_v32, %v8080_v31 }
 0x431   :  { %v3944_v52 = vpop.permute.xlu0 %3943  ;;  %v3946_v9 = vpop.permute.xlu1 %3945 }
 0x432   :  { %v3997_v19 = vcombine.low %v3938_v36, %v3946_v9  ;;  %v4117_v3 = vcombine.low %v3936_v22, %v3944_v52  ;;  %v4118_v12 = vcombine.high %v3936_v22, %v3944_v52  ;;  %v3998_v55 = vcombine.high %v3938_v36, %v3946_v9 }
 0x434   :  { %v4005_v63 = vrot.slane %v3997_v19, %v8080_v31  ;;  %v4125_v27 = vrot.slane %v4117_v3, %v8080_v31  ;;  %v4132_v49 = vrot.slane %v4118_v12, %v8080_v31  ;;  %v4012_v22 = vrot.slane %v3998_v55, %v8080_v31 }
 0x435   :  { %v3948_v11 = vpop.permute.xlu0 %3947  ;;  %v3950_v30 = vpop.permute.xlu1 %3949 }
 0x436   :  { %v4133_v20 = vcombine.low %v3940_v57, %v3948_v11  ;;  %v4134_v23 = vcombine.high %v3940_v57, %v3948_v11  ;;  %v4045_v33 = vcombine.low %v3989_v37, %v4005_v63  ;;  %v4046_v19 = vcombine.high %v3989_v37, %v4005_v63 }
 0x438   :  { %v4141_v58 = vrot.slane %v4133_v20, %v8080_v31  ;;  %v4148_v52 = vrot.slane %v4134_v23, %v8080_v31  ;;  %v4061_v23 = vcombine.low %v9841_v54, %v4012_v22 }
 0x439   :  { %v3952_v34 = vpop.permute.xlu0 %3951  ;;  %v3954_v62 = vpop.permute.xlu1 %3953 }
 0x43a   :  { %v4181_v32 = vcombine.low %v4125_v27, %v4141_v58  ;;  %v4182_v3 = vcombine.high %v4125_v27, %v4141_v58  ;;  %v4197_v37 = vcombine.low %v4132_v49, %v4148_v52 }
 0x43c   :  { %v9868_v58 = vrot.slane %v4181_v32, %v8098_v43 }
 0x43d   :  { %v3956_v18 = vpop.permute.xlu0 %3955  ;;  %v3958_v61 = vpop.permute.xlu1 %3957 }
 0x43e   :  { %v4013_v46 = vcombine.low %v3950_v30, %v3958_v61  ;;  %v4014_v41 = vcombine.high %v3950_v30, %v3958_v61  ;;  %v9852_v30 = vrot.slane %v4045_v33, %v8098_v43  ;;  %v4060_v33 = vrot.slane %v4046_v19, %v8098_v43 }
 0x440   :  { %v4021_v17 = vrot.slane %v4013_v46, %v8080_v31  ;;  %v4028_v20 = vrot.slane %v4014_v41, %v8080_v31  ;;  %v4198_v41 = vcombine.high %v4132_v49, %v4148_v52 }
 0x441   :  { %v3960_v42 = vpop.permute.xlu0 %3959  ;;  %v3962_v39 = vpop.permute.xlu1 %3961 }
 0x442   :  { %v4029_v8 = vcombine.low %v3954_v62, %v3962_v39  ;;  %v4030_v47 = vcombine.high %v3954_v62, %v3962_v39  ;;  %v4149_v36 = vcombine.low %v3952_v34, %v3960_v42  ;;  %v4150_v57 = vcombine.high %v3952_v34, %v3960_v42 }
 0x444   :  { %v4037_v14 = vrot.slane %v4029_v8, %v8080_v31  ;;  %v4044_v9 = vrot.slane %v4030_v47, %v8080_v31  ;;  %v4157_v34 = vrot.slane %v4149_v36, %v8080_v31  ;;  %v4164_v12 = vrot.slane %v4150_v57, %v8080_v31 }
 0x445   :  { %v3964_v44 = vpop.permute.xlu0 %3963 }
 0x446   :  { %v4077_v11 = vcombine.low %v4021_v17, %v4037_v14  ;;  %v4078_v62 = vcombine.high %v4021_v17, %v4037_v14  ;;  %v4165_v38 = vcombine.low %v3956_v18, %v3964_v44  ;;  %v4166_v61 = vcombine.high %v3956_v18, %v3964_v44 }
 0x447   :  { %v4093_v39 = vcombine.low %v4028_v20, %v4044_v9  ;;  %v4196_v14 = vrot.slane %v4182_v3, %v8098_v43  ;;  %v4062_v3 = vcombine.high %v9841_v54, %v4012_v22 }
 0x448   :  { %v9856_v46 = vrot.slane %v4077_v11, %v8098_v43  ;;  %v4173_v55 = vrot.slane %v4165_v38, %v8080_v31  ;;  %v4180_v63 = vrot.slane %v4166_v61, %v8080_v31  ;;  %v4092_v42 = vrot.slane %v4078_v62, %v8098_v43 }
 0x449   :  { %v4205_v11 = vrot.slane %v4197_v37, %v8098_v43  ;;  %v4094_v62 = vcombine.high %v4028_v20, %v4044_v9  ;;  %v4101_v38 = vrot.slane %v4093_v39, %v8098_v43  ;;  %v4212_v37 = vrot.slane %v4198_v41, %v8098_v43 }
 0x44a   :  { %v4213_v8 = vcombine.low %v4157_v34, %v4173_v55  ;;  %v4214_v47 = vcombine.high %v4157_v34, %v4173_v55  ;;  %v4229_v27 = vcombine.low %v4164_v12, %v4180_v63  ;;  %v4230_v17 = vcombine.high %v4164_v12, %v4180_v63 }
 0x44b   :  { %v4111_v19 = vcombine.low %v4060_v33, %v4092_v42  ;;  %v4110_v52 = vcombine.high %v9852_v30, %v9856_v46  ;;  %v4069_v34 = vrot.slane %v4061_v23, %v8098_v43  ;;  %v4108_v39 = vrot.slane %v4094_v62, %v8098_v43 }
 0x44c   :  { %v9872_v36 = vrot.slane %v4213_v8, %v8098_v43  ;;  %v4228_v57 = vrot.slane %v4214_v47, %v8098_v43  ;;  %v4237_v44 = vrot.slane %v4229_v27, %v8098_v43  ;;  %v4244_v12 = vrot.slane %v4230_v17, %v8098_v43 }
 0x44d   :  { %v4113_v8 = vcombine.low %v4069_v34, %v4101_v38  ;;  %v4112_v47 = vcombine.high %v4060_v33, %v4092_v42  ;;  %v4076_v54 = vrot.slane %v4062_v3, %v8098_v43  ;;  %v4114_v41 = vcombine.high %v4069_v34, %v4101_v38 }
 0x44e   :  { %v4247_v49 = vcombine.low %v4196_v14, %v4228_v57  ;;  %v4246_v32 = vcombine.high %v9868_v58, %v9872_v36  ;;  %v4249_v55 = vcombine.low %v4205_v11, %v4237_v44  ;;  %v4248_v63 = vcombine.high %v4196_v14, %v4228_v57 }
 0x44f   :  { %v4251_v27 = vcombine.low %v4212_v37, %v4244_v12  ;;  %v4250_v17 = vcombine.high %v4205_v11, %v4237_v44  ;;  %v4115_v14 = vcombine.low %v4076_v54, %v4108_v39  ;;  %v4116_v42 = vcombine.high %v4076_v54, %v4108_v39  ;;  %v9922_v44 = vld [vmem:[%s11816_s0 + $0xd0] sm:$0x3] }
 0x450   :  { %v7619_v9 = vpack.i.bf16 %v4247_v49, %v4111_v19  ;;  %v7614_v20 = vpack.i.bf16 %v4246_v32, %v4110_v52  ;;  %v7629_v22 = vpack.i.bf16 %v4249_v55, %v4113_v8  ;;  %v7624_v23 = vpack.i.bf16 %v4248_v63, %v4112_v47  ;;  %v9933_v49 = vld [vmem:[%s11816_s0 + $0x100] sm:$0x3]  ;;  %v9938_v52 = vld [vmem:[%s11816_s0 + $0xe8] sm:$0x3]  ;;  %v9959_v55 = vld [vmem:[%s11816_s0 + $0x118] sm:$0x3] }
 0x451   :  { %v7639_v57 = vpack.i.bf16 %v4251_v27, %v4115_v14  ;;  %v7634_v62 = vpack.i.bf16 %v4250_v17, %v4114_v41  ;;  %v4252_v19 = vcombine.high %v4212_v37, %v4244_v12  ;;  %v4722_v11 = vrot.slane %v9469_v56, 1 }
 0x452   :  { %7620 = vrot.lane.b32.xlu0 %v7619_v9, %s7952_s21  ;;  %7615 = vrot.lane.b32.xlu1 %v7614_v20, %s7951_s20  ;;  %v4724_v38 = vrot.slane %v9922_v44, 1  ;;  %v4732_v3 = vrot.slane %v9494_v13, 1  ;;  %v4734_v34 = vrot.slane %v9933_v49, 1  ;;  %v4727_v12 = vrot.slane %v9489_v4, 1  ;;  %v9954_v20 = vld [vmem:[%s11816_s0 + $0x130] sm:$0x3] }
 0x453   :  { %v7644_v33 = vpack.i.bf16 %v4252_v19, %v4116_v42  ;;  %v4729_v9 = vrot.slane %v9938_v52, 1  ;;  %v4742_v63 = vrot.slane %v9534_v7, 1  ;;  %v4744_v37 = vrot.slane %v9954_v20, 1  ;;  %v10002_v19 = vld [vmem:[%s11816_s0 + $0x178] sm:$0x3] }
 0x454   :  { %v9945_v32 = vsel %vm1217_vm0, %v4722_v11, %v4724_v38  ;;  %v9968_v39 = vsel %vm1217_vm0, %v4732_v3, %v4734_v34  ;;  %v4737_v47 = vrot.slane %v9499_v40, 1  ;;  %v4739_v54 = vrot.slane %v9959_v55, 1 }
 0x455   :  { %v9971_v8 = vsel %vm1217_vm0, %v4727_v12, %v4729_v9  ;;  %v9990_v27 = vsel %vm1217_vm0, %v4742_v63, %v4744_v37  ;;  %v4752_v17 = vrot.slane %v9544_v6, 1  ;;  %v4757_v38 = vrot.slane %v9549_v10, 1 }
 0x456   :  { %7630 = vrot.lane.b32.xlu0 %v7629_v22, %s7953_s26  ;;  %7625 = vrot.lane.b32.xlu1 %v7624_v23, %s7950_s19  ;;  %v9978_v22 = vld [vmem:[%s11816_s0 + $0x160] sm:$0x3]  ;;  %v9983_v23 = vld [vmem:[%s11816_s0 + $0x148] sm:$0x3]  ;;  %v9994_v14 = vsel %vm1217_vm0, %v4737_v47, %v4739_v54  ;;  %v4759_v34 = vrot.slane %v10002_v19, 1  ;;  %v4721_v37 = vrot.slane %v9464_v15, 1 }
 0x457   :  { %v4754_v41 = vrot.slane %v9978_v22, 1  ;;  %v4741_v61 = vrot.slane %v9506_v0, 1 }
 0x458   :  { %v10021_v9 = vsel %vm1217_vm0, %v4757_v38, %v4759_v34  ;;  %v10041_v54 = vsel %vm1217_vm0, %v4721_v37, %v4722_v11  ;;  %v4736_v11 = vrot.slane %v9484_v29, 1  ;;  %v5905_v37 = vrot.slane %v9489_v4, 2 }
 0x459   :  { %v10009_v42 = vsel %vm1217_vm0, %v4752_v17, %v4754_v41  ;;  %v4731_v41 = vrot.slane %v9479_v45, 1 }
 0x45a   :  { %7640 = vrot.lane.b32.xlu0 %v7639_v57, %s7955_s7  ;;  %7635 = vrot.lane.b32.xlu1 %v7634_v62, %s7954_s27  ;;  %v4747_v57 = vrot.slane %v9539_v25, 1  ;;  %v4749_v62 = vrot.slane %v9983_v23, 1 }
 0x45b   :  { %v10050_v34 = vsel %vm1217_vm0, %v4731_v41, %v4732_v3  ;;  %v4751_v3 = vrot.slane %v9511_v16, 1  ;;  %v7592_v41 = vunpack.i.l.bf16 %v9828_v60 }
 0x45e   :  { %4325 = vrot.lane.b32.xlu0 %v9469_v56, %s7957_s15  ;;  %7645 = vrot.lane.b32.xlu1 %v7644_v33, %s7956_s8  ;;  %v10012_v33 = vsel %vm1217_vm0, %v4747_v57, %v4749_v62  ;;  %v4726_v62 = vrot.slane %v9474_v21, 1 }
 0x460   :  { %v10053_v18 = vsel %vm1217_vm0, %v4726_v62, %v4727_v12  ;;  %v4746_v12 = vrot.slane %v9520_v24, 1 }
 0x462   :  { %4333 = vrot.lane.b32.xlu0 %v9494_v13, %s7957_s15  ;;  %4329 = vrot.lane.b32.xlu1 %v9489_v4, %s7957_s15 }
 0x466   :  { %4341 = vrot.lane.b32.xlu0 %v9534_v7, %s7957_s15  ;;  %4337 = vrot.lane.b32.xlu1 %v9499_v40, %s7957_s15 }
 0x46a   :  { %4349 = vrot.lane.b32.xlu0 %v9544_v6, %s7957_s15  ;;  %4345 = vrot.lane.b32.xlu1 %v9539_v25, %s7957_s15 }
 0x46e   :  { %4323 = vrot.lane.b32.xlu0 %v9464_v15, %s7957_s15  ;;  %4353 = vrot.lane.b32.xlu1 %v9549_v10, %s7957_s15 }
 0x472   :  { %4331 = vrot.lane.b32.xlu0 %v9479_v45, %s7957_s15  ;;  %4327 = vrot.lane.b32.xlu1 %v9474_v21, %s7957_s15  ;;  %v10062_v21 = vsel %vm1217_vm0, %v4741_v61, %v4742_v63  ;;  %v10065_v45 = vsel %vm1217_vm0, %v4736_v11, %v4737_v47  ;;  %v4756_v61 = vrot.slane %v9525_v2, 1  ;;  %v3703_v63 = vcombine.low %v9636_v1, %v9712_v50 }
 0x473   :  { %v3839_v47 = vcombine.low %v9651_v35, %v9735_v53  ;;  %v5907_v1 = vrot.slane %v9938_v52, 2  ;;  %v7587_v50 = vunpack.i.l.bf16 %v9826_v59  ;;  %v5920_v11 = vrot.slane %v9534_v7, 2 }
 0x476   :  { %4339 = vrot.lane.b32.xlu0 %v9506_v0, %s7957_s15  ;;  %4335 = vrot.lane.b32.xlu1 %v9484_v29, %s7957_s15  ;;  %v10074_v29 = vsel %vm1217_vm0, %v4751_v3, %v4752_v17  ;;  %v10077_v0 = vsel %vm1217_vm0, %v4746_v12, %v4747_v57  ;;  %v7583_v17 = vunpack.i.h.bf16 %v9824_v5  ;;  %v7582_v57 = vunpack.i.l.bf16 %v9824_v5 }
 0x477   :  { %v7588_v5 = vunpack.i.h.bf16 %v9826_v59  ;;  %v10138_v59 = vsel %vm2396_vm8, %v5905_v37, %v5907_v1  ;;  %v5915_v3 = vrot.slane %v9499_v40, 2  ;;  %v5917_v12 = vrot.slane %v9959_v55, 2 }
 0x478   :  { %v3903_v53 = vsel %vm392_vm1, %v3703_v63, %v7582_v57  ;;  %v3910_v62 = vsel %vm392_vm1, %v3839_v47, %v7583_v17  ;;  %v7598_v17 = vunpack.i.h.bf16 %v9830_v51  ;;  %v5932_v55 = vrot.slane %v9978_v22, 2 }
 0x479   :  { %v3911_v63 = vsel %vm394_vm2, %v3910_v62, %v7588_v5  ;;  %v11839_v1 = vrot.slane %v9539_v25, 2 }
 0x47a   :  { %4347 = vrot.lane.b32.xlu0 %v9511_v16, %s7957_s15  ;;  %4343 = vrot.lane.b32.xlu1 %v9520_v24, %s7957_s15  ;;  %v10085_v16 = vsel %vm1217_vm0, %v4756_v61, %v4757_v38  ;;  %v5900_v24 = vrot.slane %v9469_v56, 2  ;;  %v5910_v38 = vrot.slane %v9494_v13, 2  ;;  %v3904_v61 = vsel %vm394_vm2, %v3903_v53, %v7587_v50 }
 0x47b   :  { %v3905_v47 = vsel %vm396_vm3, %v3904_v61, %v7592_v41  ;;  %v5927_v50 = vrot.slane %v9983_v23, 2 }
 0x47e   :  { %5121 = vrot.lane.b32.xlu0 %v9945_v32, %s7947_s18  ;;  %4351 = vrot.lane.b32.xlu1 %v9525_v2, %s7957_s15  ;;  %v5902_v2 = vrot.slane %v9922_v44, 2  ;;  %v5912_v44 = vrot.slane %v9933_v49, 2  ;;  %v7593_v49 = vunpack.i.h.bf16 %v9828_v60  ;;  %v5922_v60 = vrot.slane %v9954_v20, 2 }
 0x47f   :  { %v5930_v20 = vrot.slane %v9544_v6, 2 }
 0x480   :  { %v10118_v35 = vsel %vm2396_vm8, %v5900_v24, %v5902_v2  ;;  %v10133_v52 = vsel %vm2396_vm8, %v5910_v38, %v5912_v44  ;;  %v7597_v2 = vunpack.i.l.bf16 %v9830_v51  ;;  %v3912_v57 = vsel %vm396_vm3, %v3911_v63, %v7593_v49 }
 0x481   :  { %v10159_v44 = vsel %vm2396_vm8, %v5920_v11, %v5922_v60  ;;  %v10164_v51 = vsel %vm2396_vm8, %v5915_v3, %v5917_v12  ;;  %v5899_v49 = vrot.slane %v9464_v15, 2  ;;  %v3913_v60 = vsel %vm398_vm4, %v3912_v57, %v7598_v17 }
 0x482   :  { %5129 = vrot.lane.b32.xlu0 %v9968_v39, %s7947_s18  ;;  %5125 = vrot.lane.b32.xlu1 %v9971_v8, %s7947_s18  ;;  %11947 = vst [vmem:[#allocation13_spill] sm:$0xff] %v10159_v44  ;;  %v3906_v53 = vsel %vm398_vm4, %v3905_v47, %v7597_v2  ;;  %v10178_v23 = vsel %vm2396_vm8, %v5930_v20, %v5932_v55  ;;  %v11840_v12 = vrot.slane %v9549_v10, 2  ;;  %v5937_v55 = vrot.slane %v10002_v19, 2  ;;  %v7916_v19 = vld [vmem:[%s11816_s0 + $0xf0] sm:$0xff] }
 0x483   :  { %11948 = vst [vmem:[#allocation11_spill] sm:$0xff] %v10178_v23  ;;  %v11949_v15 = vcombine.low %v9868_v58, %v9872_v36  ;;  %v11950_v47 = vcombine.low %v9852_v30, %v9856_v46  ;;  %v10192_v57 = vsel %vm2396_vm8, %v11839_v1, %v5927_v50  ;;  %v7608_v58 = vunpack.i.h.bf16 %v9834_v28 }
 0x484   :  { %11951 = vst [vmem:[#allocation12_spill] sm:$0xff] %v10192_v57  ;;  %v7607_v36 = vunpack.i.l.bf16 %v9834_v28  ;;  %v5909_v50 = vrot.slane %v7916_v19, 2 }
 0x486   :  { %5137 = vrot.lane.b32.xlu0 %v9990_v27, %s7947_s18  ;;  %5133 = vrot.lane.b32.xlu1 %v9994_v14, %s7947_s18 }
 0x48a   :  { %5145 = vrot.lane.b32.xlu0 %v10009_v42, %s7947_s18  ;;  %5141 = vrot.lane.b32.xlu1 %v10012_v33, %s7947_s18 }
 0x48e   :  { %5511 = vrot.lane.b32.xlu0 %v9945_v32, %s7957_s15  ;;  %5149 = vrot.lane.b32.xlu1 %v10021_v9, %s7947_s18 }
 0x492   :  { %5519 = vrot.lane.b32.xlu0 %v9968_v39, %s7957_s15  ;;  %5515 = vrot.lane.b32.xlu1 %v9971_v8, %s7957_s15 }
 0x496   :  { %5527 = vrot.lane.b32.xlu0 %v9990_v27, %s7957_s15  ;;  %5523 = vrot.lane.b32.xlu1 %v9994_v14, %s7957_s15 }
 0x49a   :  { %5535 = vrot.lane.b32.xlu0 %v10009_v42, %s7957_s15  ;;  %5531 = vrot.lane.b32.xlu1 %v10012_v33, %s7957_s15 }
 0x49e   :  { %5119 = vrot.lane.b32.xlu0 %v10041_v54, %s7947_s18  ;;  %5539 = vrot.lane.b32.xlu1 %v10021_v9, %s7957_s15 }
 0x4a2   :  { %5127 = vrot.lane.b32.xlu0 %v10050_v34, %s7947_s18  ;;  %5123 = vrot.lane.b32.xlu1 %v10053_v18, %s7947_s18 }
 0x4a6   :  { %5135 = vrot.lane.b32.xlu0 %v10062_v21, %s7947_s18  ;;  %5131 = vrot.lane.b32.xlu1 %v10065_v45, %s7947_s18 }
 0x4aa   :  { %5143 = vrot.lane.b32.xlu0 %v10074_v29, %s7947_s18  ;;  %5139 = vrot.lane.b32.xlu1 %v10077_v0, %s7947_s18 }
 0x4ae   :  { %5509 = vrot.lane.b32.xlu0 %v10041_v54, %s7957_s15  ;;  %5147 = vrot.lane.b32.xlu1 %v10085_v16, %s7947_s18 }
 0x4b2   :  { %5517 = vrot.lane.b32.xlu0 %v10050_v34, %s7957_s15  ;;  %5513 = vrot.lane.b32.xlu1 %v10053_v18, %s7957_s15 }
 0x4b6   :  { %5525 = vrot.lane.b32.xlu0 %v10062_v21, %s7957_s15  ;;  %5521 = vrot.lane.b32.xlu1 %v10065_v45, %s7957_s15 }
 0x4ba   :  { %5533 = vrot.lane.b32.xlu0 %v10074_v29, %s7957_s15  ;;  %5529 = vrot.lane.b32.xlu1 %v10077_v0, %s7957_s15 }
 0x4be   :  { %6299 = vrot.lane.b32.xlu0 %v10118_v35, %s7947_s18  ;;  %5537 = vrot.lane.b32.xlu1 %v10085_v16, %s7957_s15 }
 0x4c2   :  { %6307 = vrot.lane.b32.xlu0 %v10133_v52, %s7947_s18  ;;  %6303 = vrot.lane.b32.xlu1 %v10138_v59, %s7947_s18 }
 0x4c4   :  { %v7621_v5 = vpop.permute.xlu0 %7620  ;;  %v7616_v41 = vpop.permute.xlu1 %7615 }
 0x4c5   :  { %v7618_v62 = vunpack.i.h.bf16 %v7616_v41  ;;  %v7617_v22 = vunpack.i.l.bf16 %v7616_v41  ;;  %v7623_v61 = vunpack.i.h.bf16 %v7621_v5  ;;  %v7622_v63 = vunpack.i.l.bf16 %v7621_v5 }
 0x4c6   :  { %6315 = vrot.lane.b32.xlu0 %v10159_v44, %s7947_s18  ;;  %6311 = vrot.lane.b32.xlu1 %v10164_v51, %s7947_s18  ;;  %v7603_v5 = vunpack.i.h.bf16 %v9832_v26  ;;  %v7602_v41 = vunpack.i.l.bf16 %v9832_v26 }
 0x4c7   :  { %v4316_v2 = vsel %vm392_vm1, %v11949_v15, %v7618_v62  ;;  %v4309_v17 = vsel %vm392_vm1, %v11950_v47, %v7617_v22  ;;  %v10202_v22 = vsel %vm2396_vm8, %v5899_v49, %v5900_v24  ;;  %v10218_v49 = vsel %vm2396_vm8, %v11840_v12, %v5937_v55 }
 0x4c8   :  { %v7631_v62 = vpop.permute.xlu0 %7630  ;;  %v7626_v15 = vpop.permute.xlu1 %7625  ;;  %11952 = vst [vmem:[#allocation9_spill] sm:$0xff] %v10202_v22  ;;  %v4310_v1 = vsel %vm394_vm2, %v4309_v17, %v7622_v63  ;;  %v4317_v28 = vsel %vm394_vm2, %v4316_v2, %v7623_v61  ;;  %11953 = vst [vmem:[#allocation5_spill] sm:$0xff] %v10218_v49  ;;  %v7917_v63 = vld [vmem:[%s11816_s0 + $0xd8] sm:$0xff]  ;;  %v7613_v2 = vunpack.i.h.bf16 %v9836_v48  ;;  %v7612_v17 = vunpack.i.l.bf16 %v9836_v48 }
 0x4c9   :  { %v7628_v30 = vunpack.i.h.bf16 %v7626_v15  ;;  %v7627_v46 = vunpack.i.l.bf16 %v7626_v15  ;;  %v7633_v47 = vunpack.i.h.bf16 %v7631_v62  ;;  %v7632_v26 = vunpack.i.l.bf16 %v7631_v62 }
 0x4ca   :  { %6323 = vrot.lane.b32.xlu0 %v10178_v23, %s7947_s18  ;;  %6319 = vrot.lane.b32.xlu1 %v10192_v57, %s7947_s18  ;;  %v5904_v61 = vrot.slane %v7917_v63, 2  ;;  %v10230_v55 = vsel %vm2396_vm8, %v5909_v50, %v5910_v38 }
 0x4cb   :  { %v4311_v56 = vsel %vm396_vm3, %v4310_v1, %v7627_v46  ;;  %v4318_v24 = vsel %vm396_vm3, %v4317_v28, %v7628_v30  ;;  %v3914_v1 = vsel %vm400_vm5, %v3913_v60, %v7603_v5  ;;  %v3907_v30 = vsel %vm400_vm5, %v3906_v53, %v7602_v41  ;;  %11954 = vst [vmem:[#allocation14_spill] sm:$0xff] %v10230_v55  ;;  %v7918_v28 = vld [vmem:[%s11816_s0 + $0x120] sm:$0xff]  ;;  %v7919_v60 = vld [vmem:[%s11816_s0 + $0x108] sm:$0xff] }
 0x4cc   :  { %v7641_v62 = vpop.permute.xlu0 %7640  ;;  %v7636_v15 = vpop.permute.xlu1 %7635  ;;  %v5919_v63 = vrot.slane %v7918_v28, 2  ;;  %v4319_v53 = vsel %vm398_vm4, %v4318_v24, %v7633_v47  ;;  %v4312_v13 = vsel %vm398_vm4, %v4311_v56, %v7632_v26  ;;  %v10244_v38 = vsel %vm2396_vm8, %v5904_v61, %v5905_v37 }
 0x4cd   :  { %v7638_v46 = vunpack.i.h.bf16 %v7636_v15  ;;  %v7637_v19 = vunpack.i.l.bf16 %v7636_v15  ;;  %v7643_v12 = vunpack.i.h.bf16 %v7641_v62  ;;  %v7642_v48 = vunpack.i.l.bf16 %v7641_v62  ;;  %11955 = vst [vmem:[#allocation10_spill] sm:$0xff] %v10244_v38 }
 0x4ce   :  { %6297 = vrot.lane.b32.xlu0 %v10202_v22, %s7947_s18  ;;  %6327 = vrot.lane.b32.xlu1 %v10218_v49, %s7947_s18  ;;  %v5914_v5 = vrot.slane %v7919_v60, 2  ;;  %v3915_v47 = vsel %vm402_vm6, %v3914_v1, %v7608_v58  ;;  %v3908_v26 = vsel %vm402_vm6, %v3907_v30, %v7607_v36  ;;  %v10264_v61 = vsel %vm2396_vm8, %v5919_v63, %v5920_v11  ;;  %v7921_v11 = vld [vmem:[%s11816_s0 + $0x138] sm:$0xff] }
 0x4cf   :  { %v4320_v41 = vsel %vm400_vm5, %v4319_v53, %v7638_v46  ;;  %v4313_v50 = vsel %vm400_vm5, %v4312_v13, %v7637_v19  ;;  %v3916_v37 = vsel %vm404_vm7, %v3915_v47, %v7613_v2  ;;  %v3909_v24 = vsel %vm404_vm7, %v3908_v26, %v7612_v17  ;;  %v7920_v2 = vld [vmem:[%s11816_s0 + $0x150] sm:$0xff]  ;;  %v7922_v53 = vld [vmem:[%s11816_s0 + $0x168] sm:$0xff] }
 0x4d0   :  { %v10251_v62 = vpop.permute.xlu0 %4325  ;;  %v7646_v15 = vpop.permute.xlu1 %7645  ;;  %v4321_v58 = vsel %vm402_vm6, %v4320_v41, %v7643_v12  ;;  %v4314_v36 = vsel %vm402_vm6, %v4313_v50, %v7642_v48  ;;  %v5929_v17 = vrot.slane %v7920_v2, 2  ;;  %v10274_v1 = vsel %vm2396_vm8, %v5914_v5, %v5915_v3 }
 0x4d1   :  { %v7648_v4 = vunpack.i.h.bf16 %v7646_v15  ;;  %v7647_v56 = vunpack.i.l.bf16 %v7646_v15  ;;  %v5924_v12 = vrot.slane %v7921_v11, 2  ;;  %v11956_v3 = vrot.slane %v9539_v25, 2 }
 0x4d2   :  { %6305 = vrot.lane.b32.xlu0 %v10230_v55, %s7947_s18  ;;  %6301 = vrot.lane.b32.xlu1 %v10244_v38, %s7947_s18  ;;  %v10292_v40 = vsel %vm2396_vm8, %v5929_v17, %v5930_v20  ;;  %v5934_v13 = vrot.slane %v7922_v53, 2  ;;  %v11957_v25 = vrot.slane %v9549_v10, 2  ;;  %v4913_v20 = vcombine.low %v9945_v32, %v9968_v39 }
 0x4d3   :  { %v4322_v30 = vsel %vm404_vm7, %v4321_v58, %v7648_v4  ;;  %v4315_v7 = vsel %vm404_vm7, %v4314_v36, %v7647_v56  ;;  %v10297_v48 = vsel %vm2396_vm8, %v5924_v12, %v11956_v3  ;;  %v4929_v41 = vcombine.low %v9971_v8, %v9994_v14 }
 0x4d4   :  { %v10281_v46 = vpop.permute.xlu0 %4333  ;;  %v10283_v19 = vpop.permute.xlu1 %4329  ;;  %v7268_v28 = vpack.c.bf16 %v4322_v30, %v3916_v37  ;;  %v7270_v63 = vpack.c.bf16 %v4315_v7, %v3909_v24  ;;  %v10313_v6 = vsel %vm2396_vm8, %v5934_v13, %v11957_v25  ;;  %v4945_v47 = vcombine.low %v9990_v27, %v10009_v42 }
 0x4d5   :  { %v4961_v26 = vcombine.low %v10012_v33, %v10021_v9  ;;  %v4914_v10 = vcombine.high %v9945_v32, %v9968_v39  ;;  %v10334_v4 = vrot.slane %v4913_v20, %v8080_v31  ;;  %v4930_v56 = vcombine.high %v9971_v8, %v9994_v14 }
 0x4d6   :  { %6313 = vrot.lane.b32.xlu0 %v10264_v61, %s7947_s18  ;;  %6309 = vrot.lane.b32.xlu1 %v10274_v1, %s7947_s18  ;;  %v10339_v37 = vrot.slane %v4929_v41, %v8080_v31  ;;  %v4946_v36 = vcombine.high %v9990_v27, %v10009_v42  ;;  %v4953_v32 = vrot.slane %v4945_v47, %v8080_v31 }
 0x4d7   :  { %7269 = vmatprep.subr.bf16.mxu1 %v7268_v28  ;;  %v4962_v39 = vcombine.high %v10012_v33, %v10021_v9  ;;  %v4969_v8 = vrot.slane %v4961_v26, %v8080_v31  ;;  %v10358_v14 = vrot.slane %v4914_v10, %v8080_v31  ;;  %v10365_v17 = vrot.slane %v4930_v56, %v8080_v31 }
 0x4d8   :  { %7271 = vmatpush1.bf16.msra.mxu1 %v7270_v63  ;;  %v10302_v60 = vpop.permute.xlu0 %4341  ;;  %v10304_v5 = vpop.permute.xlu1 %4337  ;;  %v4977_v33 = vcombine.low %v10334_v4, %v10339_v37  ;;  %v4777_v9 = vcombine.low %v10041_v54, %v10050_v34  ;;  %v4793_v30 = vcombine.low %v10053_v18, %v10065_v45  ;;  %v4778_v12 = vcombine.high %v10041_v54, %v10050_v34 }
 0x4d9   :  { %v4523_v27 = vcombine.low %v10283_v19, %v10304_v5  ;;  %v4794_v28 = vcombine.high %v10053_v18, %v10065_v45  ;;  %v4507_v63 = vcombine.low %v10251_v62, %v10281_v46  ;;  %v10387_v53 = vrot.slane %v4946_v36, %v8080_v31 }
 0x4da   :  { %6321 = vrot.lane.b32.xlu0 %v10292_v40, %s7947_s18  ;;  %6317 = vrot.lane.b32.xlu1 %v10297_v48, %s7947_s18  ;;  %v10390_v13 = vrot.slane %v4962_v39, %v8080_v31  ;;  %v5009_v25 = vcombine.low %v4953_v32, %v4969_v8  ;;  %v4809_v18 = vcombine.low %v10062_v21, %v10074_v29 }
 0x4db   :  { %v4825_v54 = vcombine.low %v10077_v0, %v10085_v16  ;;  %v10401_v34 = vrot.slane %v4523_v27, %v8080_v31  ;;  %v10407_v20 = vrot.slane %v4777_v9, %v8080_v31  ;;  %v10410_v41 = vrot.slane %v4793_v30, %v8080_v31 }
 0x4dc   :  { %v10319_v50 = vpop.permute.xlu0 %4349  ;;  %v10321_v15 = vpop.permute.xlu1 %4345  ;;  %v4810_v47 = vcombine.high %v10062_v21, %v10074_v29  ;;  %v4826_v26 = vcombine.high %v10077_v0, %v10085_v16  ;;  %v10421_v36 = vrot.slane %v4778_v12, %v8080_v31  ;;  %v10427_v39 = vrot.slane %v4507_v63, %v8080_v31 }
 0x4dd   :  { %v4539_v42 = vcombine.low %v10302_v60, %v10319_v50  ;;  %v4978_v21 = vcombine.high %v10334_v4, %v10339_v37  ;;  %v4993_v29 = vcombine.low %v10358_v14, %v10365_v17  ;;  %v5010_v0 = vcombine.high %v4953_v32, %v4969_v8 }
 0x4de   :  { %6689 = vrot.lane.b32.xlu0 %v10118_v35, %s7957_s15  ;;  %6325 = vrot.lane.b32.xlu1 %v10313_v6, %s7947_s18  ;;  %v5025_v16 = vcombine.low %v10387_v53, %v10390_v13  ;;  %v4833_v9 = vrot.slane %v4825_v54, %v8080_v31  ;;  %v4571_v4 = vcombine.low %v10427_v39, %v10401_v34 }
 0x4df   :  { %v10404_v45 = vrot.slane %v4539_v42, %v8080_v31  ;;  %v4817_v42 = vrot.slane %v4809_v18, %v8080_v31  ;;  %v4841_v37 = vcombine.low %v10407_v20, %v10410_v41  ;;  %v4842_v32 = vcombine.high %v10407_v20, %v10410_v41 }
 0x4e0   :  { %v10341_v24 = vpop.permute.xlu0 %4323  ;;  %v10343_v58 = vpop.permute.xlu1 %4353  ;;  %v10450_v8 = vrot.slane %v4810_v47, %v8080_v31  ;;  %v10453_v30 = vrot.slane %v4826_v26, %v8080_v31  ;;  %v10465_v54 = vrot.slane %v4977_v33, %v8098_v43  ;;  %v10468_v20 = vrot.slane %v5009_v25, %v8098_v43 }
 0x4e1   :  { %v4555_v2 = vcombine.low %v10321_v15, %v10343_v58  ;;  %v10477_v47 = vrot.slane %v4978_v21, %v8098_v43  ;;  %v10480_v26 = vrot.slane %v5010_v0, %v8098_v43  ;;  %v4873_v33 = vcombine.low %v4817_v42, %v4833_v9 }
 0x4e2   :  { %6697 = vrot.lane.b32.xlu0 %v10133_v52, %s7957_s15  ;;  %6693 = vrot.lane.b32.xlu1 %v10138_v59, %s7957_s15  ;;  %11959 = vst [vmem:[#allocation7_spill] sm:$0xff] %v10465_v54  ;;  %11960 = vst [vmem:[#allocation8_spill] sm:$0xff] %v10468_v20  ;;  %v10483_v25 = vrot.slane %v4571_v4, %v8098_v43  ;;  %v10494_v0 = vrot.slane %v4993_v29, %v8098_v43 }
 0x4e3   :  { %v10384_v3 = vrot.slane %v4555_v2, %v8080_v31  ;;  %v10424_v2 = vrot.slane %v4794_v28, %v8080_v31  ;;  %v5043_v29 = vcombine.low %v10477_v47, %v10480_v26 }
 0x4e4   :  { %v10373_v7 = vpop.permute.xlu0 %4331  ;;  %v10375_v11 = vpop.permute.xlu1 %4327  ;;  %11961 = vst [vmem:[#allocation15_spill] sm:$0xff] %v10483_v25 }
 0x4e5   :  { %v4603_v27 = vcombine.low %v10404_v45, %v10384_v3 }
 0x4e6   :  { %6705 = vrot.lane.b32.xlu0 %v10159_v44, %s7957_s15  ;;  %6701 = vrot.lane.b32.xlu1 %v10164_v51, %s7957_s15 }
 0x4e7   :  { %v10462_v18 = vrot.slane %v4603_v27, %v8098_v43  ;;  %v4874_v27 = vcombine.high %v4817_v42, %v4833_v9  ;;  %v10497_v42 = vrot.slane %v5025_v16, %v8098_v43  ;;  %v4556_v9 = vcombine.high %v10321_v15, %v10343_v58 }
 0x4e8   :  { %v10416_v10 = vpop.permute.xlu0 %4339  ;;  %v10418_v56 = vpop.permute.xlu1 %4335  ;;  %v4540_v58 = vcombine.high %v10302_v60, %v10319_v50  ;;  %v4604_v16 = vcombine.high %v10404_v45, %v10384_v3  ;;  %v10529_v15 = vrot.slane %v4841_v37, %v8098_v43  ;;  %v4572_v50 = vcombine.high %v10427_v39, %v10401_v34 }
 0x4e9   :  { %11958 = vst [vmem:[#allocation6_spill] sm:$0xff] %v10462_v18  ;;  %v4387_v41 = vcombine.low %v10375_v11, %v10418_v56  ;;  %v10536_v3 = vrot.slane %v4556_v9, %v8080_v31  ;;  %v10549_v37 = vrot.slane %v4874_v27, %v8098_v43  ;;  %v4508_v34 = vcombine.high %v10251_v62, %v10281_v46 }
 0x4ea   :  { %6713 = vrot.lane.b32.xlu0 %v10178_v23, %s7957_s15  ;;  %6709 = vrot.lane.b32.xlu1 %v10192_v57, %s7957_s15  ;;  %v4371_v57 = vcombine.low %v10341_v24, %v10373_v7  ;;  %11965 = vst [vmem:[#allocation19_spill] sm:$0xff] %v10529_v15  ;;  %v10554_v39 = vrot.slane %v4540_v58, %v8080_v31 }
 0x4eb   :  { %v4395_v23 = vrot.slane %v4387_v41, %v8080_v31  ;;  %v4636_v62 = vcombine.high %v10483_v25, %v10462_v18  ;;  %v4586_v46 = vrot.slane %v4572_v50, %v8098_v43 }
 0x4ec   :  { %v10455_v12 = vpop.permute.xlu0 %4347  ;;  %v10457_v28 = vpop.permute.xlu1 %4343  ;;  %v4619_v58 = vcombine.low %v10554_v39, %v10536_v3 }
 0x4ed   :  { %v4403_v63 = vcombine.low %v10416_v10, %v10455_v12 }
 0x4ee   :  { %6687 = vrot.lane.b32.xlu0 %v10202_v22, %s7957_s15  ;;  %6717 = vrot.lane.b32.xlu1 %v10218_v49, %s7957_s15  ;;  %v5042_v22 = vcombine.high %v10465_v54, %v10468_v20  ;;  %v4524_v54 = vcombine.high %v10283_v19, %v10304_v5  ;;  %v4379_v20 = vrot.slane %v4371_v57, %v8080_v31 }
 0x4ef   :  { %v4411_v41 = vrot.slane %v4403_v63, %v8080_v31  ;;  %v10539_v19 = vrot.slane %v4873_v33, %v8098_v43  ;;  %v10546_v5 = vrot.slane %v4842_v32, %v8098_v43  ;;  %v4618_v63 = vrot.slane %v4604_v16, %v8098_v43 }
 0x4f0   :  { %v10491_v49 = vpop.permute.xlu0 %5121  ;;  %v4352_v21 = vpop.permute.xlu1 %4351  ;;  %v4435_v57 = vcombine.low %v4379_v20, %v4395_v23  ;;  %v10559_v9 = vrot.slane %v4524_v54, %v8080_v31  ;;  %v4388_v54 = vcombine.high %v10375_v11, %v10418_v56 }
 0x4f1   :  { %11962 = vst [vmem:[#allocation16_spill] sm:$0xff] %v10491_v49  ;;  %v4419_v4 = vcombine.low %v10457_v28, %v4352_v21  ;;  %11966 = vst [vmem:[#allocation20_spill] sm:$0xff] %v10539_v19  ;;  %v4420_v33 = vcombine.high %v10457_v28, %v4352_v21  ;;  %v4372_v28 = vcombine.high %v10341_v24, %v10373_v7 }
 0x4f2   :  { %6695 = vrot.lane.b32.xlu0 %v10230_v55, %s7957_s15  ;;  %6691 = vrot.lane.b32.xlu1 %v10244_v38, %s7957_s15  ;;  %v4436_v21 = vcombine.high %v4379_v20, %v4395_v23  ;;  %v10580_v16 = vrot.slane %v4435_v57, %v8098_v43  ;;  %v4637_v7 = vcombine.low %v4586_v46, %v4618_v63 }
 0x4f3   :  { %v4427_v44 = vrot.slane %v4419_v4, %v8080_v31  ;;  %v10590_v24 = vrot.slane %v4420_v33, %v8080_v31  ;;  %v4906_v11 = vcombine.high %v10529_v15, %v10539_v19  ;;  %v4907_v50 = vcombine.low %v10546_v5, %v10549_v37 }
 0x4f4   :  { %v10524_v38 = vpop.permute.xlu0 %5129  ;;  %v10526_v55 = vpop.permute.xlu1 %5125  ;;  %11970 = vst [vmem:[#allocation24_spill] sm:$0xff] %v10580_v16  ;;  %v4627_v57 = vrot.slane %v4619_v58, %v8098_v43  ;;  %v4638_v15 = vcombine.high %v4586_v46, %v4618_v63  ;;  %v11974_v46 = vcombine.low %v10450_v8, %v10453_v30 }
 0x4f5   :  { %11963 = vst [vmem:[#allocation17_spill] sm:$0xff] %v10524_v38  ;;  %11964 = vst [vmem:[#allocation18_spill] sm:$0xff] %v10526_v55  ;;  %v4467_v45 = vcombine.low %v4411_v41, %v4427_v44  ;;  %v4468_v4 = vcombine.high %v4411_v41, %v4427_v44  ;;  %v4404_v44 = vcombine.high %v10416_v10, %v10455_v12 }
 0x4f6   :  { %6703 = vrot.lane.b32.xlu0 %v10264_v61, %s7957_s15  ;;  %6699 = vrot.lane.b32.xlu1 %v10274_v1, %s7957_s15  ;;  %v10587_v41 = vrot.slane %v4508_v34, %v8080_v31  ;;  %v7649_v12 = vpack.i.bf16 %v5042_v22, %v4636_v62  ;;  %v10607_v34 = vrot.slane %v4372_v28, %v8080_v31 }
 0x4f7   :  { %v10562_v32 = vrot.slane %v4467_v45, %v8098_v43  ;;  %v4482_v23 = vrot.slane %v4468_v4, %v8098_v43  ;;  %v10610_v33 = vrot.slane %v4404_v44, %v8080_v31  ;;  %v10613_v4 = vrot.slane %v4388_v54, %v8080_v31 }
 0x4f8   :  { %v10564_v60 = vpop.permute.xlu0 %5137  ;;  %v10566_v27 = vpop.permute.xlu1 %5133  ;;  %v4587_v45 = vcombine.low %v10587_v41, %v10559_v9  ;;  %v4450_v22 = vrot.slane %v4436_v21, %v8098_v43  ;;  %v7659_v44 = vpack.i.bf16 %v5043_v29, %v4637_v7  ;;  %v5303_v54 = vcombine.low %v10491_v49, %v10524_v38 }
 0x4f9   :  { %11967 = vst [vmem:[#allocation21_spill] sm:$0xff] %v10562_v32  ;;  %11968 = vst [vmem:[#allocation22_spill] sm:$0xff] %v10564_v60  ;;  %v4500_v20 = vcombine.high %v10580_v16, %v10562_v32  ;;  %v5319_v62 = vcombine.low %v10526_v55, %v10566_v27  ;;  %v4483_v58 = vcombine.low %v10610_v33, %v10590_v24 }
 0x4fa   :  { %11969 = vst [vmem:[#allocation23_spill] sm:$0xff] %v10566_v27  ;;  %6711 = vrot.lane.b32.xlu0 %v10292_v40, %s7957_s15  ;;  %6707 = vrot.lane.b32.xlu1 %v10297_v48, %s7957_s15  ;;  %v4501_v25 = vcombine.low %v4450_v22, %v4482_v23  ;;  %v4595_v55 = vrot.slane %v4587_v45, %v8098_v43 }
 0x4fb   :  { %v7654_v18 = vpack.i.bf16 %v4906_v11, %v4500_v20  ;;  %v11973_v29 = vcombine.low %v10421_v36, %v10424_v2  ;;  %v4897_v7 = vrot.slane %v11974_v46, %v8098_v43  ;;  %v4451_v11 = vcombine.low %v10607_v34, %v10613_v4 }
 0x4fc   :  { %v10595_v10 = vpop.permute.xlu0 %5145  ;;  %v10597_v56 = vpop.permute.xlu1 %5141  ;;  %v10647_v20 = vrot.slane %v5319_v62, %v8080_v31  ;;  %v4908_v45 = vcombine.high %v10546_v5, %v10549_v37  ;;  %v11975_v46 = vcombine.high %v10477_v47, %v10480_v26  ;;  %v4639_v16 = vcombine.low %v4595_v55, %v4627_v57 }
 0x4fd   :  { %11971 = vst [vmem:[#allocation25_spill] sm:$0xff] %v10595_v10  ;;  %v5335_v28 = vcombine.low %v10564_v60, %v10595_v10  ;;  %v4865_v63 = vrot.slane %v11973_v29, %v8098_v43  ;;  %v4491_v62 = vrot.slane %v4483_v58, %v8098_v43  ;;  %v7664_v5 = vpack.i.bf16 %v4907_v50, %v4501_v25 }
 0x4fe   :  { %6715 = vrot.lane.b32.xlu1 %v10313_v6, %s7957_s15  ;;  %7650 = vrot.lane.b32.xlu0 %v7649_v12, %s7951_s20  ;;  %v7669_v32 = vpack.i.bf16 %v11975_v46, %v4638_v15  ;;  %v4502_v37 = vcombine.high %v4450_v22, %v4482_v23  ;;  %v4640_v26 = vcombine.high %v4595_v55, %v4627_v57 }
 0x4ff   :  { %v10654_v29 = vrot.slane %v5335_v28, %v8080_v31  ;;  %v4459_v28 = vrot.slane %v4451_v11, %v8098_v43  ;;  %v5046_v15 = vcombine.high %v10494_v0, %v10497_v42  ;;  %v4909_v58 = vcombine.low %v4865_v63, %v4897_v7 }
 0x500   :  { %v10627_v21 = vpop.permute.xlu0 %5511  ;;  %v10629_v19 = vpop.permute.xlu1 %5149  ;;  %v11978_v22 = vcombine.low %v10494_v0, %v10497_v42  ;;  %v7674_v11 = vpack.i.bf16 %v4908_v45, %v4502_v37  ;;  %v4910_v57 = vcombine.high %v4865_v63, %v4897_v7 }
 0x501   :  { %11972 = vst [vmem:[#allocation26_spill] sm:$0xff] %v10627_v21  ;;  %v5351_v27 = vcombine.low %v10597_v56, %v10629_v19  ;;  %v7689_v38 = vpack.i.bf16 %v5046_v15, %v4640_v26  ;;  %v4504_v42 = vcombine.high %v4459_v28, %v4491_v62  ;;  %v4994_v15 = vcombine.high %v10358_v14, %v10365_v17  ;;  %v11980_v17 = vld [vmem:[#allocation11_spill] sm:$0xff] }
 0x502   :  { %7660 = vrot.lane.b32.xlu0 %v7659_v44, %s7952_s21  ;;  %7655 = vrot.lane.b32.xlu1 %v7654_v18, %s7951_s20  ;;  %v10664_v44 = vrot.slane %v5303_v54, %v8080_v31  ;;  %v7679_v54 = vpack.i.bf16 %v11978_v22, %v4639_v16  ;;  %v4620_v22 = vcombine.high %v10554_v39, %v10536_v3 }
 0x503   :  { %v10657_v12 = vrot.slane %v5351_v27, %v8080_v31  ;;  %v6108_v14 = vcombine.high %v10138_v59, %v10164_v51  ;;  %v4588_v3 = vcombine.high %v10587_v41, %v10559_v9  ;;  %v10754_v9 = vrot.slane %v4994_v15, %v8098_v43 }
 0x504   :  { %v10666_v18 = vpop.permute.xlu0 %5519  ;;  %v10668_v49 = vpop.permute.xlu1 %5515  ;;  %v5367_v47 = vcombine.low %v10664_v44, %v10647_v20 }
 0x505   :  { %11976 = vst [vmem:[#allocation27_spill] sm:$0xff] %v10666_v18  ;;  %v5399_v27 = vcombine.low %v10654_v29, %v10657_v12  ;;  %v5693_v45 = vcombine.low %v10627_v21, %v10666_v18  ;;  %v11990_v21 = vld [vmem:[#allocation9_spill] sm:$0xff] }
 0x506   :  { %7670 = vrot.lane.b32.xlu0 %v7669_v32, %s7950_s19  ;;  %7665 = vrot.lane.b32.xlu1 %v7664_v5, %s7952_s21  ;;  %v4503_v32 = vcombine.low %v4459_v28, %v4491_v62  ;;  %v10690_v46 = vrot.slane %v5367_v47, %v8098_v43  ;;  %v7699_v62 = vpack.i.bf16 %v4910_v57, %v4504_v42 }
 0x507   :  { %v10680_v25 = vrot.slane %v5399_v27, %v8098_v43  ;;  %v6091_v28 = vcombine.low %v10118_v35, %v10133_v52  ;;  %v5701_v26 = vrot.slane %v5693_v45, %v8080_v31  ;;  %v6107_v57 = vcombine.low %v10138_v59, %v10164_v51 }
 0x508   :  { %v10682_v23 = vpop.permute.xlu0 %5527  ;;  %v10684_v50 = vpop.permute.xlu1 %5523  ;;  %11979 = vst [vmem:[#allocation29_spill] sm:$0xff] %v10690_v46  ;;  %v7684_v0 = vpack.i.bf16 %v4909_v58, %v4503_v32  ;;  %v5026_v58 = vcombine.high %v10387_v53, %v10390_v13  ;;  %v11981_v53 = vld [vmem:[#allocation13_spill] sm:$0xff]  ;;  %v10751_v45 = vrot.slane %v4620_v22, %v8098_v43  ;;  %v10772_v22 = vrot.slane %v6108_v14, %v8080_v31 }
 0x509   :  { %11977 = vst [vmem:[#allocation28_spill] sm:$0xff] %v10680_v25  ;;  %v5709_v55 = vcombine.low %v10668_v49, %v10684_v50  ;;  %v6123_v13 = vcombine.low %v11981_v53, %v11980_v17  ;;  %v10746_v42 = vrot.slane %v6091_v28, %v8080_v31  ;;  %v6124_v51 = vcombine.high %v11981_v53, %v11980_v17 }
 0x50a   :  { %7680 = vrot.lane.b32.xlu0 %v7679_v54, %s7953_s26  ;;  %7675 = vrot.lane.b32.xlu1 %v7674_v11, %s7950_s19  ;;  %v6092_v54 = vcombine.high %v10118_v35, %v10133_v52  ;;  %v10757_v41 = vrot.slane %v5026_v58, %v8098_v43  ;;  %v10769_v17 = vrot.slane %v6107_v57, %v8080_v31 }
 0x50b   :  { %v5717_v37 = vrot.slane %v5709_v55, %v8080_v31  ;;  %11985 = vst [vmem:[#allocation31_spill] sm:$0xff] %v10772_v22  ;;  %v10775_v15 = vrot.slane %v6123_v13, %v8080_v31  ;;  %v10778_v58 = vrot.slane %v4588_v3, %v8098_v43  ;;  %v5432_v57 = vcombine.high %v10690_v46, %v10680_v25  ;;  %v11987_v13 = vld [vmem:[#allocation5_spill] sm:$0xff]  ;;  %v11988_v3 = vld [vmem:[#allocation12_spill] sm:$0xff] }
 0x50c   :  { %v10696_v5 = vpop.permute.xlu0 %5535  ;;  %v10698_v27 = vpop.permute.xlu1 %5531  ;;  %v10791_v53 = vrot.slane %v6124_v51, %v8080_v31  ;;  %v6140_v46 = vcombine.high %v11988_v3, %v11987_v13  ;;  %v5988_v51 = vcombine.high %v10264_v61, %v10292_v40 }
 0x50d   :  { %v5725_v63 = vcombine.low %v10682_v23, %v10696_v5  ;;  %v5757_v11 = vcombine.low %v5701_v26, %v5717_v37  ;;  %v4641_v16 = vcombine.low %v10778_v58, %v10751_v45 }
 0x50e   :  { %7690 = vrot.lane.b32.xlu0 %v7689_v38, %s7954_s27  ;;  %7685 = vrot.lane.b32.xlu1 %v7684_v0, %s7953_s26  ;;  %11986 = vst [vmem:[#allocation32_spill] sm:$0xff] %v10791_v53  ;;  %v5047_v0 = vcombine.low %v10754_v9, %v10757_v41 }
 0x50f   :  { %v5733_v32 = vrot.slane %v5725_v63, %v8080_v31  ;;  %v10760_v63 = vrot.slane %v6092_v54, %v8080_v31 }
 0x510   :  { %v10709_v7 = vpop.permute.xlu0 %5119  ;;  %v10711_v47 = vpop.permute.xlu1 %5539  ;;  %v7704_v25 = vpack.i.bf16 %v5047_v0, %v4641_v16 }
 0x511   :  { %v5741_v38 = vcombine.low %v10698_v27, %v10711_v47  ;;  %11982 = vst [vmem:[#allocation11_spill] sm:$0xff] %v10760_v63  ;;  %v4642_v63 = vcombine.high %v10778_v58, %v10751_v45 }
 0x512   :  { %7700 = vrot.lane.b32.xlu0 %v7699_v62, %s7954_s27  ;;  %v10763_v62 = vrot.slane %v5757_v11, %v8098_v43 }
 0x513   :  { %v5749_v55 = vrot.slane %v5741_v38, %v8080_v31 }
 0x514   :  { %v10737_v39 = vpop.permute.xlu0 %5127  ;;  %v10739_v35 = vpop.permute.xlu1 %5123  ;;  %11983 = vst [vmem:[#allocation13_spill] sm:$0xff] %v10763_v62 }
 0x515   :  { %v5789_v59 = vcombine.low %v5733_v32, %v5749_v55  ;;  %v5790_v28 = vcombine.high %v5733_v32, %v5749_v55  ;;  %v5400_v32 = vcombine.high %v10654_v29, %v10657_v12  ;;  %v5758_v55 = vcombine.high %v5701_v26, %v5717_v37 }
 0x516   :  { %v5368_v12 = vcombine.high %v10664_v44, %v10647_v20  ;;  %v5167_v52 = vcombine.low %v10709_v7, %v10737_v39 }
 0x517   :  { %v10766_v38 = vrot.slane %v5789_v59, %v8098_v43  ;;  %v6139_v59 = vcombine.low %v11988_v3, %v11987_v13  ;;  %v10802_v29 = vrot.slane %v5790_v28, %v8098_v43  ;;  %v11989_v28 = vld [vmem:[#allocation14_spill] sm:$0xff] }
 0x518   :  { %v10780_v54 = vpop.permute.xlu0 %5135  ;;  %v10782_v11 = vpop.permute.xlu1 %5131  ;;  %v5955_v18 = vcombine.low %v11990_v21, %v11989_v28  ;;  %v5956_v3 = vcombine.high %v11990_v21, %v11989_v28  ;;  %v11992_v21 = vld [vmem:[#allocation10_spill] sm:$0xff] }
 0x519   :  { %11984 = vst [vmem:[#allocation30_spill] sm:$0xff] %v10766_v38  ;;  %v5822_v14 = vcombine.high %v10763_v62, %v10766_v38  ;;  %v5183_v37 = vcombine.low %v10739_v35, %v10782_v11  ;;  %v10830_v13 = vrot.slane %v6139_v59, %v8080_v31  ;;  %v10845_v59 = vrot.slane %v6140_v46, %v8080_v31 }
 0x51a   :  { %v5971_v16 = vcombine.low %v11992_v21, %v10274_v1  ;;  %v5972_v0 = vcombine.high %v11992_v21, %v10274_v1  ;;  %v10860_v38 = vrot.slane %v5167_v52, %v8080_v31  ;;  %v6003_v21 = vcombine.low %v10297_v48, %v10313_v6 }
 0x51b   :  { %v7694_v26 = vpack.i.bf16 %v5822_v14, %v5432_v57  ;;  %v10821_v57 = vrot.slane %v5400_v32, %v8098_v43  ;;  %v10824_v14 = vrot.slane %v5758_v55, %v8098_v43  ;;  %v5382_v32 = vrot.slane %v5368_v12, %v8098_v43  ;;  %11991 = vst [vmem:[#allocation5_spill] sm:$0xff] %v10845_v59 }
 0x51c   :  { %v10814_v20 = vpop.permute.xlu0 %5143  ;;  %v10816_v44 = vpop.permute.xlu1 %5139  ;;  %v10838_v55 = vrot.slane %v5183_v37, %v8080_v31  ;;  %v5987_v12 = vcombine.low %v10264_v61, %v10292_v40  ;;  %v6004_v62 = vcombine.high %v10297_v48, %v10313_v6  ;;  %v5048_v61 = vcombine.high %v10754_v9, %v10757_v41 }
 0x51d   :  { %7695 = vrot.lane.b32.xlu1 %v7694_v26, %s7951_s20  ;;  %v5199_v22 = vcombine.low %v10780_v54, %v10814_v20  ;;  %v5823_v26 = vcombine.low %v10824_v14, %v10802_v29  ;;  %v5433_v1 = vcombine.low %v5382_v32, %v10821_v57  ;;  %v6187_v10 = vcombine.low %v10775_v15, %v10830_v13 }
 0x51e   :  { %v5231_v40 = vcombine.low %v10860_v38, %v10838_v55  ;;  %v10885_v48 = vrot.slane %v5955_v18, %v8080_v31  ;;  %v10888_v6 = vrot.slane %v5956_v3, %v8080_v31  ;;  %v10891_v45 = vrot.slane %v5971_v16, %v8080_v31 }
 0x51f   :  { %v10877_v52 = vrot.slane %v5199_v22, %v8080_v31  ;;  %v7714_v60 = vpack.i.bf16 %v5823_v26, %v5433_v1  ;;  %v10896_v22 = vrot.slane %v5972_v0, %v8080_v31  ;;  %v10899_v58 = vrot.slane %v5987_v12, %v8080_v31 }
 0x520   :  { %v10853_v37 = vpop.permute.xlu0 %5509  ;;  %v10855_v28 = vpop.permute.xlu1 %5147  ;;  %v10902_v26 = vrot.slane %v5988_v51, %v8080_v31  ;;  %v10908_v3 = vrot.slane %v6003_v21, %v8080_v31  ;;  %v10911_v16 = vrot.slane %v6004_v62, %v8080_v31  ;;  %v11993_v0 = vcombine.high %v10421_v36, %v10424_v2 }
 0x521   :  { %v5215_v46 = vcombine.low %v10816_v44, %v10855_v28  ;;  %7705 = vrot.lane.b32.xlu1 %v7704_v25, %s7955_s7  ;;  %v11994_v51 = vcombine.high %v10450_v8, %v10453_v30  ;;  %v7724_v62 = vpack.i.bf16 %v5048_v61, %v4642_v63  ;;  %v5824_v21 = vcombine.high %v10824_v14, %v10802_v29 }
 0x522   :  { %v10917_v12 = vrot.slane %v11993_v0, %v8098_v43  ;;  %v5434_v61 = vcombine.high %v5382_v32, %v10821_v57  ;;  %v4452_v2 = vcombine.high %v10607_v34, %v10613_v4  ;;  %v5184_v32 = vcombine.high %v10739_v35, %v10782_v11 }
 0x523   :  { %v10880_v25 = vrot.slane %v5215_v46, %v8080_v31  ;;  %v10923_v46 = vrot.slane %v11994_v51, %v8098_v43  ;;  %v10977_v35 = vrot.slane %v6187_v10, %v8098_v43  ;;  %v12000_v11 = vcombine.high %v10746_v42, %v10769_v17 }
 0x524   :  { %v10893_v9 = vpop.permute.xlu0 %5517  ;;  %v5514_v41 = vpop.permute.xlu1 %5513  ;;  %v7734_v30 = vpack.i.bf16 %v5824_v21, %v5434_v61  ;;  %v11997_v21 = vcombine.low %v10746_v42, %v10769_v17  ;;  %v4484_v10 = vcombine.high %v10610_v33, %v10590_v24  ;;  %v5232_v24 = vcombine.high %v10860_v38, %v10838_v55 }
 0x525   :  { %v5263_v18 = vcombine.low %v10877_v52, %v10880_v25  ;;  %7715 = vrot.lane.b32.xlu1 %v7714_v60, %s7952_s21  ;;  %v10926_v60 = vrot.slane %v5231_v40, %v8098_v43  ;;  %v5557_v34 = vcombine.low %v10853_v37, %v10893_v9  ;;  %11999 = vst [vmem:[#allocation10_spill] sm:$0xff] %v10977_v35 }
 0x526   :  { %v10974_v61 = vrot.slane %v11997_v21, %v8098_v43  ;;  %v5168_v21 = vcombine.high %v10709_v7, %v10737_v39 }
 0x527   :  { %11995 = vst [vmem:[#allocation12_spill] sm:$0xff] %v10926_v60  ;;  %v10929_v1 = vrot.slane %v5263_v18, %v8098_v43 }
 0x528   :  { %v5526_v40 = vpop.permute.xlu0 %5525  ;;  %v5522_v0 = vpop.permute.xlu1 %5521  ;;  %11998 = vst [vmem:[#allocation9_spill] sm:$0xff] %v10974_v61 }
 0x529   :  { %11996 = vst [vmem:[#allocation14_spill] sm:$0xff] %v10929_v1  ;;  %7725 = vrot.lane.b32.xlu1 %v7724_v62, %s7956_s8  ;;  %v5573_v63 = vcombine.low %v5514_v41, %v5522_v0  ;;  %v5216_v62 = vcombine.high %v10816_v44, %v10855_v28  ;;  %v5574_v18 = vcombine.high %v5514_v41, %v5522_v0 }
 0x52a   :  { %v10983_v44 = vrot.slane %v12000_v11, %v8098_v43  ;;  %v10986_v28 = vrot.slane %v4452_v2, %v8098_v43  ;;  %v5200_v41 = vcombine.high %v10780_v54, %v10814_v20  ;;  %v10998_v11 = vrot.slane %v5184_v32, %v8080_v31 }
 0x52b   :  { %v5581_v0 = vrot.slane %v5573_v63, %v8080_v31  ;;  %v11001_v2 = vrot.slane %v5216_v62, %v8080_v31  ;;  %v5264_v54 = vcombine.high %v10877_v52, %v10880_v25  ;;  %v5565_v20 = vrot.slane %v5557_v34, %v8080_v31 }
 0x52c   :  { %v5534_v4 = vpop.permute.xlu0 %5533  ;;  %v5530_v51 = vpop.permute.xlu1 %5529  ;;  %v11011_v33 = vrot.slane %v5574_v18, %v8080_v31  ;;  %v11028_v18 = vrot.slane %v4484_v10, %v8098_v43 }
 0x52d   :  { %7735 = vrot.lane.b32.xlu1 %v7734_v30, %s7950_s19  ;;  %v5558_v30 = vcombine.high %v10853_v37, %v10893_v9  ;;  %v5589_v42 = vcombine.low %v5526_v40, %v5534_v4  ;;  %v5590_v17 = vcombine.high %v5526_v40, %v5534_v4  ;;  %v11014_v40 = vrot.slane %v5200_v41, %v8080_v31 }
 0x52e   :  { %v5621_v52 = vcombine.low %v5565_v20, %v5581_v0  ;;  %v5622_v25 = vcombine.high %v5565_v20, %v5581_v0  ;;  %v11034_v34 = vrot.slane %v5264_v54, %v8098_v43  ;;  %v12004_v20 = vld [vmem:[#allocation18_spill] sm:$0xff]  ;;  %v11049_v54 = vrot.slane %v5232_v24, %v8098_v43 }
 0x52f   :  { %v11017_v63 = vrot.slane %v5558_v30, %v8080_v31  ;;  %v5597_v32 = vrot.slane %v5589_v42, %v8080_v31  ;;  %v11021_v62 = vrot.slane %v5590_v17, %v8080_v31  ;;  %v5279_v4 = vcombine.low %v11014_v40, %v11001_v2 }
 0x530   :  { %v11006_v37 = vpop.permute.xlu0 %6299  ;;  %v5538_v9 = vpop.permute.xlu1 %5537  ;;  %v11057_v14 = vrot.slane %v5622_v25, %v8098_v43  ;;  %v5352_v24 = vcombine.high %v10597_v56, %v10629_v19  ;;  %v5298_v19 = vcombine.high %v11049_v54, %v11034_v34 }
 0x531   :  { %v5605_v7 = vcombine.low %v5530_v51, %v5538_v9  ;;  %v5606_v39 = vcombine.high %v5530_v51, %v5538_v9  ;;  %v11031_v51 = vrot.slane %v5168_v21, %v8080_v31  ;;  %v5637_v0 = vcombine.low %v11017_v63, %v11011_v33  ;;  %v12003_v21 = vld [vmem:[#allocation23_spill] sm:$0xff] }
 0x532   :  { %v5320_v9 = vcombine.high %v12004_v20, %v12003_v21  ;;  %v5742_v20 = vcombine.high %v10698_v27, %v10711_v47  ;;  %v5710_v27 = vcombine.high %v10668_v49, %v10684_v50  ;;  %v5726_v47 = vcombine.high %v10682_v23, %v10696_v5  ;;  %v12008_v49 = vld [vmem:[#allocation25_spill] sm:$0xff]  ;;  %v12009_v50 = vld [vmem:[#allocation22_spill] sm:$0xff]  ;;  %v12010_v23 = vld [vmem:[#allocation27_spill] sm:$0xff] }
 0x533   :  { %v5613_v38 = vrot.slane %v5605_v7, %v8080_v31  ;;  %v11025_v55 = vrot.slane %v5606_v39, %v8080_v31  ;;  %12001 = vst [vmem:[#allocation33_spill] sm:$0xff] %v11031_v51  ;;  %v5247_v7 = vcombine.low %v11031_v51, %v10998_v11  ;;  %v11054_v39 = vrot.slane %v5621_v52, %v8098_v43  ;;  %v12011_v5 = vld [vmem:[#allocation26_spill] sm:$0xff]  ;;  %v12014_v51 = vld [vmem:[#allocation16_spill] sm:$0xff] }
 0x534   :  { %v11038_v41 = vpop.permute.xlu0 %6307  ;;  %v11040_v30 = vpop.permute.xlu1 %6303  ;;  %v11073_v52 = vrot.slane %v5279_v4, %v8098_v43  ;;  %v5296_v4 = vcombine.high %v10926_v60, %v10929_v1  ;;  %v5336_v59 = vcombine.high %v12009_v50, %v12008_v49  ;;  %v5694_v53 = vcombine.high %v12011_v5, %v12010_v23 }
 0x535   :  { %12002 = vst [vmem:[#allocation34_spill] sm:$0xff] %v11040_v30  ;;  %v5653_v42 = vcombine.low %v5597_v32, %v5613_v38  ;;  %v5654_v17 = vcombine.high %v5597_v32, %v5613_v38  ;;  %v5669_v10 = vcombine.low %v11021_v62, %v11025_v55  ;;  %12005 = vst [vmem:[#allocation23_spill] sm:$0xff] %v11054_v39 }
 0x536   :  { %v5756_v1 = vrot.slane %v5742_v20, %v8080_v31  ;;  %v12015_v20 = vcombine.high %v10775_v15, %v10830_v13  ;;  %v11128_v50 = vrot.slane %v5320_v9, %v8080_v31  ;;  %v12016_v13 = vcombine.low %v10917_v12, %v10923_v46 }
 0x537   :  { %v11060_v32 = vrot.slane %v5653_v42, %v8098_v43  ;;  %v11063_v38 = vrot.slane %v5654_v17, %v8098_v43  ;;  %v11066_v21 = vrot.slane %v5669_v10, %v8098_v43  ;;  %v4505_v42 = vcombine.low %v10986_v28, %v11028_v18 }
 0x538   :  { %v11075_v25 = vpop.permute.xlu0 %6315  ;;  %v11077_v29 = vpop.permute.xlu1 %6311  ;;  %v11082_v17 = vrot.slane %v5637_v0, %v8098_v43  ;;  %v11099_v10 = vrot.slane %v5247_v7, %v8098_v43  ;;  %v11125_v49 = vrot.slane %v12015_v20, %v8098_v43  ;;  %v5350_v23 = vrot.slane %v5336_v59, %v8080_v31 }
 0x539   :  { %12006 = vst [vmem:[#allocation18_spill] sm:$0xff] %v11060_v32  ;;  %12007 = vst [vmem:[#allocation35_spill] sm:$0xff] %v11075_v25  ;;  %v5688_v56 = vcombine.high %v11057_v14, %v11063_v38  ;;  %v5686_v0 = vcombine.high %v11054_v39, %v11060_v32  ;;  %v6497_v8 = vcombine.low %v11040_v30, %v11077_v29  ;;  %v12013_v39 = vld [vmem:[#allocation17_spill] sm:$0xff] }
 0x53a   :  { %v5689_v36 = vcombine.low %v11082_v17, %v11066_v21  ;;  %v5304_v30 = vcombine.high %v12014_v51, %v12013_v39  ;;  %v5724_v51 = vrot.slane %v5710_v27, %v8080_v31  ;;  %v5740_v39 = vrot.slane %v5726_v47, %v8080_v31 }
 0x53b   :  { %v7744_v57 = vpack.i.bf16 %v5688_v56, %v5298_v19  ;;  %v7709_v7 = vpack.i.bf16 %v5686_v0, %v5296_v4  ;;  %v6481_v19 = vcombine.low %v11006_v37, %v11038_v41  ;;  %v5299_v56 = vcombine.low %v11099_v10, %v11073_v52 }
 0x53c   :  { %v11110_v60 = vpop.permute.xlu0 %6323  ;;  %v11112_v32 = vpop.permute.xlu1 %6319  ;;  %v5366_v4 = vrot.slane %v5352_v24, %v8080_v31  ;;  %v7719_v9 = vpack.i.bf16 %v12016_v13, %v4505_v42  ;;  %v5708_v24 = vrot.slane %v5694_v53, %v8080_v31  ;;  %v5805_v27 = vcombine.low %v5740_v39, %v5756_v1  ;;  %v12017_v53 = vld [vmem:[#allocation11_spill] sm:$0xff] }
 0x53d   :  { %12012 = vst [vmem:[#allocation25_spill] sm:$0xff] %v11110_v60  ;;  %7745 = vrot.lane.b32.xlu1 %v7744_v57, %s7950_s19  ;;  %7710 = vrot.lane.b32.xlu0 %v7709_v7, %s7951_s20  ;;  %v11135_v57 = vrot.slane %v6497_v8, %v8080_v31  ;;  %v6513_v0 = vcombine.low %v11075_v25, %v11110_v60  ;;  %v12018_v42 = vld [vmem:[#allocation31_spill] sm:$0xff] }
 0x53e   :  { %v7754_v15 = vpack.i.bf16 %v5689_v36, %v5299_v56  ;;  %v5687_v8 = vcombine.low %v11057_v14, %v11063_v38  ;;  %v6489_v7 = vrot.slane %v6481_v19, %v8080_v31  ;;  %v6220_v59 = vcombine.high %v10974_v61, %v10977_v35 }
 0x53f   :  { %v12019_v56 = vcombine.low %v12017_v53, %v12018_v42  ;;  %v5318_v13 = vrot.slane %v5304_v30, %v8080_v31  ;;  %v5415_v25 = vcombine.low %v5350_v23, %v5366_v4  ;;  %v5773_v14 = vcombine.low %v5708_v24, %v5724_v51 }
 0x540   :  { %v11144_v5 = vpop.permute.xlu0 %6297  ;;  %v11146_v47 = vpop.permute.xlu1 %6327  ;;  %v5297_v38 = vcombine.low %v11049_v54, %v11034_v34  ;;  %v5806_v19 = vcombine.high %v5740_v39, %v5756_v1  ;;  %v6521_v61 = vrot.slane %v6513_v0, %v8080_v31  ;;  %v5416_v34 = vcombine.high %v5350_v23, %v5366_v4 }
 0x541   :  { %v6529_v36 = vcombine.low %v11112_v32, %v11146_v47  ;;  %7755 = vrot.lane.b32.xlu1 %v7754_v15, %s7953_s26  ;;  %v11160_v20 = vrot.slane %v12019_v56, %v8098_v43  ;;  %7720 = vrot.lane.b32.xlu0 %v7719_v9, %s7955_s7  ;;  %v6545_v15 = vcombine.low %v6489_v7, %v11135_v57 }
 0x542   :  { %v5383_v53 = vcombine.low %v5318_v13, %v11128_v50  ;;  %v5813_v56 = vrot.slane %v5805_v27, %v8098_v43  ;;  %v7729_v42 = vpack.i.bf16 %v5687_v8, %v5297_v38  ;;  %v4506_v9 = vcombine.high %v10986_v28, %v11028_v18 }
 0x543   :  { %12020 = vst [vmem:[#allocation22_spill] sm:$0xff] %v11160_v20  ;;  %v6537_v35 = vrot.slane %v6529_v36, %v8080_v31  ;;  %v5774_v1 = vcombine.high %v5708_v24, %v5724_v51  ;;  %v12021_v39 = vcombine.low %v10885_v48, %v10891_v45  ;;  %v5423_v36 = vrot.slane %v5415_v25, %v8098_v43 }
 0x544   :  { %v11171_v20 = vpop.permute.xlu0 %6305  ;;  %v11173_v30 = vpop.permute.xlu1 %6301  ;;  %v5781_v27 = vrot.slane %v5773_v14, %v8098_v43  ;;  %v12022_v28 = vcombine.low %v10899_v58, %v10908_v3  ;;  %v5384_v4 = vcombine.high %v5318_v13, %v11128_v50  ;;  %v11194_v51 = vrot.slane %v5806_v19, %v8098_v43 }
 0x545   :  { %v6577_v54 = vcombine.low %v6521_v61, %v6537_v35  ;;  %v11181_v0 = vrot.slane %v12021_v39, %v8098_v43  ;;  %v6578_v60 = vcombine.high %v6521_v61, %v6537_v35  ;;  %7730 = vrot.lane.b32.xlu0 %v7729_v42, %s7952_s21  ;;  %v11197_v23 = vrot.slane %v6545_v15, %v8098_v43 }
 0x546   :  { %v11190_v18 = vrot.slane %v12022_v28, %v8098_v43  ;;  %v5391_v61 = vrot.slane %v5383_v53, %v8098_v43  ;;  %v6546_v35 = vcombine.high %v6489_v7, %v11135_v57  ;;  %v12024_v42 = vcombine.high %v10917_v12, %v10923_v46 }
 0x547   :  { %v11200_v25 = vrot.slane %v6577_v54, %v8098_v43  ;;  %v5825_v13 = vcombine.low %v5781_v27, %v5813_v56  ;;  %v11210_v14 = vrot.slane %v5416_v34, %v8098_v43  ;;  %v11213_v38 = vrot.slane %v5774_v1, %v8098_v43 }
 0x548   :  { %v11204_v24 = vpop.permute.xlu0 %6313  ;;  %v6310_v8 = vpop.permute.xlu1 %6309  ;;  %v7739_v50 = vpack.i.bf16 %v12024_v42, %v4506_v9  ;;  %v11220_v7 = vrot.slane %v6578_v60, %v8098_v43  ;;  %v5435_v12 = vcombine.low %v5391_v61, %v5423_v36  ;;  %v12025_v46 = vcombine.high %v10885_v48, %v10891_v45 }
 0x549   :  { %12023 = vst [vmem:[#allocation27_spill] sm:$0xff] %v11200_v25  ;;  %v6610_v57 = vcombine.high %v11197_v23, %v11200_v25  ;;  %v12026_v15 = vcombine.high %v10899_v58, %v10908_v3  ;;  %v5398_v34 = vrot.slane %v5384_v4, %v8098_v43  ;;  %v6361_v60 = vcombine.low %v11173_v30, %v6310_v8 }
 0x54a   :  { %7740 = vrot.lane.b32.xlu0 %v7739_v50, %s7956_s8  ;;  %v11227_v53 = vrot.slane %v12025_v46, %v8098_v43  ;;  %v5827_v54 = vcombine.low %v11213_v38, %v11194_v51  ;;  %v11240_v39 = vrot.slane %v6546_v35, %v8098_v43  ;;  %v7749_v28 = vpack.i.bf16 %v5825_v13, %v5435_v12 }
 0x54b   :  { %v11233_v9 = vrot.slane %v12026_v15, %v8098_v43  ;;  %v7764_v1 = vpack.i.bf16 %v6610_v57, %v6220_v59  ;;  %v5826_v42 = vcombine.high %v5781_v27, %v5813_v56  ;;  %v6221_v58 = vcombine.low %v10983_v44, %v11125_v49 }
 0x54c   :  { %v6322_v48 = vpop.permute.xlu0 %6321  ;;  %v6318_v45 = vpop.permute.xlu1 %6317  ;;  %v6345_v3 = vcombine.low %v11144_v5, %v11171_v20  ;;  %v5437_v59 = vcombine.low %v5398_v34, %v11210_v14  ;;  %v12027_v35 = vcombine.low %v10888_v6, %v10896_v22  ;;  %v5436_v56 = vcombine.high %v5391_v61, %v5423_v36 }
 0x54d   :  { %7765 = vrot.lane.b32.xlu1 %v7764_v1, %s7951_s20  ;;  %v6611_v27 = vcombine.low %v11240_v39, %v11220_v7  ;;  %v12028_v57 = vcombine.low %v10902_v26, %v10911_v16  ;;  %v6369_v46 = vrot.slane %v6361_v60, %v8080_v31  ;;  %v6377_v15 = vcombine.low %v11204_v24, %v6322_v48 }
 0x54e   :  { %v11254_v50 = vrot.slane %v12027_v35, %v8098_v43  ;;  %7750 = vrot.lane.b32.xlu0 %v7749_v28, %s7953_s26  ;;  %v7774_v1 = vpack.i.bf16 %v5827_v54, %v5437_v59  ;;  %v6086_v36 = vcombine.high %v11227_v53, %v11233_v9  ;;  %v6362_v61 = vcombine.high %v11173_v30, %v6310_v8 }
 0x54f   :  { %v11265_v12 = vrot.slane %v12028_v57, %v8098_v43  ;;  %v7759_v19 = vpack.i.bf16 %v5826_v42, %v5436_v56  ;;  %v5690_v13 = vcombine.high %v11082_v17, %v11066_v21  ;;  %v5438_v57 = vcombine.high %v5398_v34, %v11210_v14 }
 0x550   :  { %v11272_v28 = vpop.permute.xlu0 %6689  ;;  %v6326_v35 = vpop.permute.xlu1 %6325  ;;  %v6353_v4 = vrot.slane %v6345_v3, %v8080_v31  ;;  %v6378_v60 = vcombine.high %v11204_v24, %v6322_v48  ;;  %v6346_v30 = vcombine.high %v11144_v5, %v11171_v20  ;;  %v5300_v8 = vcombine.high %v11099_v10, %v11073_v52 }
 0x551   :  { %v6393_v25 = vcombine.low %v6318_v45, %v6326_v35  ;;  %v6394_v54 = vcombine.high %v6318_v45, %v6326_v35  ;;  %7775 = vrot.lane.b32.xlu1 %v7774_v1, %s7955_s7  ;;  %v7784_v42 = vpack.i.bf16 %v6611_v27, %v6221_v58  ;;  %v5828_v21 = vcombine.high %v11213_v38, %v11194_v51 }
 0x552   :  { %7760 = vrot.lane.b32.xlu0 %v7759_v19, %s7954_s27  ;;  %v6409_v17 = vcombine.low %v6353_v4, %v6369_v46  ;;  %v6385_v14 = vrot.slane %v6377_v15, %v8080_v31  ;;  %v5280_v5 = vcombine.high %v11014_v40, %v11001_v2  ;;  %v5670_v20 = vcombine.high %v11021_v62, %v11025_v55 }
 0x553   :  { %v6401_v24 = vrot.slane %v6393_v25, %v8080_v31  ;;  %v11290_v34 = vrot.slane %v6394_v54, %v8080_v31  ;;  %v11297_v52 = vrot.slane %v6362_v61, %v8080_v31  ;;  %v7769_v38 = vpack.i.bf16 %v5690_v13, %v5300_v8 }
 0x554   :  { %v11299_v10 = vpop.permute.xlu0 %6697  ;;  %v11301_v51 = vpop.permute.xlu1 %6693  ;;  %v6410_v19 = vcombine.high %v6353_v4, %v6369_v46  ;;  %v11304_v25 = vrot.slane %v6378_v60, %v8080_v31  ;;  %v5638_v2 = vcombine.high %v11017_v63, %v11011_v33  ;;  %v11310_v40 = vrot.slane %v6346_v30, %v8080_v31  ;;  %v12029_v63 = vld [vmem:[#allocation33_spill] sm:$0xff]  ;;  %v12032_v60 = vld [vmem:[#allocation35_spill] sm:$0xff] }
 0x555   :  { %v6441_v48 = vcombine.low %v6385_v14, %v6401_v24  ;;  %v6442_v45 = vcombine.high %v6385_v14, %v6401_v24  ;;  %7785 = vrot.lane.b32.xlu1 %v7784_v42, %s7952_s21  ;;  %v7794_v62 = vpack.i.bf16 %v5828_v21, %v5438_v57  ;;  %v6612_v55 = vcombine.high %v11240_v39, %v11220_v7  ;;  %v12031_v57 = vld [vmem:[#allocation25_spill] sm:$0xff] }
 0x556   :  { %7770 = vrot.lane.b32.xlu0 %v7769_v38, %s7954_s27  ;;  %v11316_v58 = vrot.slane %v6409_v17, %v8098_v43  ;;  %v6457_v33 = vcombine.low %v11304_v25, %v11290_v34  ;;  %v5248_v4 = vcombine.high %v12029_v63, %v10998_v11  ;;  %v11329_v56 = vrot.slane %v5280_v5, %v8098_v43 }
 0x557   :  { %v11319_v3 = vrot.slane %v6441_v48, %v8098_v43  ;;  %v11322_v59 = vrot.slane %v6442_v45, %v8098_v43  ;;  %v11332_v7 = vrot.slane %v5670_v20, %v8098_v43  ;;  %v6530_v39 = vcombine.high %v11112_v32, %v11146_v47  ;;  %v12030_v47 = vld [vmem:[#allocation34_spill] sm:$0xff] }
 0x558   :  { %v11336_v27 = vpop.permute.xlu0 %6705  ;;  %v11338_v13 = vpop.permute.xlu1 %6701  ;;  %v6424_v46 = vrot.slane %v6410_v19, %v8098_v43  ;;  %v6425_v15 = vcombine.low %v11310_v40, %v11297_v52  ;;  %v11349_v61 = vrot.slane %v5638_v2, %v8098_v43  ;;  %v6482_v32 = vcombine.high %v11006_v37, %v11038_v41 }
 0x559   :  { %v6473_v11 = vcombine.low %v11316_v58, %v11319_v3  ;;  %7795 = vrot.lane.b32.xlu1 %v7794_v62, %s7956_s8  ;;  %v6474_v1 = vcombine.high %v11316_v58, %v11319_v3  ;;  %v6498_v35 = vcombine.high %v12030_v47, %v11077_v29  ;;  %v6514_v54 = vcombine.high %v12032_v60, %v12031_v57 }
 0x55a   :  { %v11358_v30 = vrot.slane %v6457_v33, %v8098_v43  ;;  %v12033_v8 = vcombine.high %v10983_v44, %v11125_v49  ;;  %v12034_v21 = vcombine.high %v11181_v0, %v11190_v18  ;;  %v6476_v14 = vcombine.high %v6424_v46, %v11322_v59 }
 0x55b   :  { %v11368_v37 = vrot.slane %v5248_v4, %v8098_v43  ;;  %v11371_v29 = vrot.slane %v6530_v39, %v8080_v31  ;;  %v5691_v44 = vcombine.low %v11349_v61, %v11332_v7  ;;  %v6085_v49 = vcombine.low %v11227_v53, %v11233_v9 }
 0x55c   :  { %v7804_v42 = vpack.i.bf16 %v6612_v55, %v12033_v8  ;;  %v7779_v17 = vpack.i.bf16 %v6474_v1, %v12034_v21  ;;  %v11373_v41 = vpop.permute.xlu0 %6713  ;;  %v11375_v24 = vpop.permute.xlu1 %6709  ;;  %v6433_v5 = vrot.slane %v6425_v15, %v8098_v43  ;;  %v6871_v20 = vcombine.low %v11272_v28, %v11299_v10  ;;  %v12038_v21 = vld [vmem:[#allocation5_spill] sm:$0xff] }
 0x55d   :  { %v6887_v38 = vcombine.low %v11301_v51, %v11338_v13  ;;  %v6087_v19 = vcombine.low %v11254_v50, %v11265_v12  ;;  %v11390_v48 = vrot.slane %v6498_v35, %v8080_v31  ;;  %v6528_v45 = vrot.slane %v6514_v54, %v8080_v31 }
 0x55e   :  { %7805 = vrot.lane.b32.xlu1 %v7804_v42, %s7950_s19  ;;  %v6903_v2 = vcombine.low %v11336_v27, %v11373_v41  ;;  %7780 = vrot.lane.b32.xlu0 %v7779_v17, %s7951_s20  ;;  %v5301_v62 = vcombine.low %v11368_v37, %v11329_v56  ;;  %v11399_v55 = vrot.slane %v6482_v32, %v8080_v31 }
 0x55f   :  { %v6458_v33 = vcombine.high %v11304_v25, %v11290_v34  ;;  %v7814_v63 = vpack.i.bf16 %v6476_v14, %v6086_v36  ;;  %v6477_v4 = vcombine.low %v6433_v5, %v11358_v30  ;;  %v6593_v39 = vcombine.low %v6528_v45, %v11371_v29 }
 0x560   :  { %v6426_v15 = vcombine.high %v11310_v40, %v11297_v52  ;;  %v11410_v1 = vpop.permute.xlu0 %6687  ;;  %v11412_v47 = vpop.permute.xlu1 %6717  ;;  %v7789_v32 = vpack.i.bf16 %v5691_v44, %v5301_v62  ;;  %v6475_v35 = vcombine.low %v6424_v46, %v11322_v59  ;;  %v11416_v34 = vrot.slane %v6871_v20, %v8080_v31  ;;  %v12040_v44 = vld [vmem:[#allocation31_spill] sm:$0xff] }
 0x561   :  { %v11419_v53 = vrot.slane %v6887_v38, %v8080_v31  ;;  %v11422_v9 = vrot.slane %v6903_v2, %v8080_v31  ;;  %v6919_v36 = vcombine.low %v11375_v24, %v11412_v47  ;;  %v6561_v52 = vcombine.low %v11399_v55, %v11390_v48  ;;  %v12041_v20 = vld [vmem:[#allocation11_spill] sm:$0xff] }
 0x562   :  { %7815 = vrot.lane.b32.xlu1 %v7814_v63, %s7950_s19  ;;  %7790 = vrot.lane.b32.xlu0 %v7789_v32, %s7955_s7  ;;  %v6088_v25 = vcombine.high %v11254_v50, %v11265_v12  ;;  %v12035_v40 = vcombine.high %v10888_v6, %v10896_v22  ;;  %v12036_v46 = vcombine.high %v10902_v26, %v10911_v16  ;;  %v12037_v16 = vld [vmem:[#allocation32_spill] sm:$0xff] }
 0x563   :  { %v11445_v60 = vrot.slane %v6458_v33, %v8098_v43  ;;  %v11448_v54 = vrot.slane %v6919_v36, %v8080_v31  ;;  %v7824_v8 = vpack.i.bf16 %v6477_v4, %v6087_v19  ;;  %v6478_v50 = vcombine.high %v6433_v5, %v11358_v30 }
 0x564   :  { %v11436_v59 = vrot.slane %v12035_v40, %v8098_v43  ;;  %v11442_v57 = vrot.slane %v12036_v46, %v8098_v43  ;;  %v6601_v12 = vrot.slane %v6593_v39, %v8098_v43  ;;  %v11452_v6 = vpop.permute.xlu0 %6695  ;;  %v11454_v22 = vpop.permute.xlu1 %6691  ;;  %v7799_v42 = vpack.i.bf16 %v6475_v35, %v6085_v49  ;;  %v12042_v35 = vld [vmem:[#allocation22_spill] sm:$0xff] }
 0x565   :  { %v5692_v26 = vcombine.high %v11349_v61, %v11332_v7  ;;  %v12039_v17 = vcombine.low %v12037_v16, %v12038_v21  ;;  %v6172_v38 = vcombine.high %v12041_v20, %v12040_v44  ;;  %v11465_v30 = vrot.slane %v6426_v15, %v8098_v43 }
 0x566   :  { %v6935_v5 = vcombine.low %v11416_v34, %v11419_v53  ;;  %v6967_v49 = vcombine.low %v11422_v9, %v11448_v54  ;;  %7825 = vrot.lane.b32.xlu1 %v7824_v8, %s7953_s26  ;;  %v6204_v7 = vcombine.high %v12037_v16, %v12038_v21  ;;  %v6569_v61 = vrot.slane %v6561_v52, %v8098_v43 }
 0x567   :  { %v6211_v14 = vrot.slane %v12039_v17, %v8098_v43  ;;  %7800 = vrot.lane.b32.xlu0 %v7799_v42, %s7952_s21  ;;  %v5302_v19 = vcombine.high %v11368_v37, %v11329_v56  ;;  %v6089_v2 = vcombine.low %v11436_v59, %v11442_v57  ;;  %v6594_v62 = vcombine.high %v6528_v45, %v11371_v29 }
 0x568   :  { %v11482_v33 = vrot.slane %v6967_v49, %v8098_v43  ;;  %v7834_v63 = vpack.i.bf16 %v6478_v50, %v6088_v25  ;;  %v6479_v4 = vcombine.low %v11465_v30, %v11445_v60  ;;  %v6704_v39 = vpop.permute.xlu0 %6703  ;;  %v11486_v15 = vpop.permute.xlu1 %6699  ;;  %v6613_v52 = vcombine.low %v6569_v61, %v6601_v12 }
 0x569   :  { %v7809_v32 = vpack.i.bf16 %v5692_v26, %v5302_v19  ;;  %v6223_v36 = vcombine.low %v12042_v35, %v6211_v14  ;;  %v11490_v56 = vrot.slane %v6935_v5, %v8098_v43  ;;  %v6562_v37 = vcombine.high %v11399_v55, %v11390_v48 }
 0x56a   :  { %7835 = vrot.lane.b32.xlu1 %v7834_v63, %s7954_s27  ;;  %v6224_v29 = vcombine.high %v12042_v35, %v6211_v14  ;;  %v6186_v45 = vrot.slane %v6172_v38, %v8098_v43  ;;  %v6608_v25 = vrot.slane %v6594_v62, %v8098_v43  ;;  %v7844_v40 = vpack.i.bf16 %v6479_v4, %v6089_v2 }
 0x56b   :  { %7810 = vrot.lane.b32.xlu0 %v7809_v32, %s7956_s8  ;;  %v6218_v46 = vrot.slane %v6204_v7, %v8098_v43  ;;  %v6999_v8 = vcombine.low %v11490_v56, %v11482_v33  ;;  %v6735_v50 = vcombine.low %v11410_v1, %v11452_v6  ;;  %v6751_v48 = vcombine.low %v11454_v22, %v11486_v15 }
 0x56c   :  { %v6708_v55 = vpop.permute.xlu1 %6707  ;;  %v7819_v42 = vpack.i.bf16 %v6613_v52, %v6223_v36  ;;  %v6614_v26 = vcombine.high %v6569_v61, %v6601_v12  ;;  %v6712_v16 = vpop.permute.xlu0 %6711  ;;  %v6576_v21 = vrot.slane %v6562_v37, %v8098_v43  ;;  %v7000_v14 = vcombine.high %v11490_v56, %v11482_v33 }
 0x56d   :  { %v6767_v17 = vcombine.low %v6704_v39, %v6712_v16  ;;  %v6225_v44 = vcombine.low %v6186_v45, %v6218_v46  ;;  %v6743_v20 = vrot.slane %v6735_v50, %v8080_v31  ;;  %v6759_v38 = vrot.slane %v6751_v48, %v8080_v31 }
 0x56e   :  { %7845 = vrot.lane.b32.xlu1 %v7844_v40, %s7955_s7  ;;  %v7829_v49 = vpack.i.bf16 %v6614_v26, %v6224_v29  ;;  %v6615_v7 = vcombine.low %v6576_v21, %v6608_v25  ;;  %v6226_v19 = vcombine.high %v6186_v45, %v6218_v46  ;;  %v6616_v2 = vcombine.high %v6576_v21, %v6608_v25 }
 0x56f   :  { %7820 = vrot.lane.b32.xlu0 %v7819_v42, %s7953_s26  ;;  %v6775_v12 = vrot.slane %v6767_v17, %v8080_v31  ;;  %v6799_v63 = vcombine.low %v6743_v20, %v6759_v38  ;;  %v6090_v36 = vcombine.high %v11436_v59, %v11442_v57  ;;  %v6904_v52 = vcombine.high %v11336_v27, %v11373_v41 }
 0x570   :  { %v6716_v5 = vpop.permute.xlu1 %6715  ;;  %v7839_v4 = vpack.i.bf16 %v6615_v7, %v6225_v44  ;;  %v7849_v35 = vpack.i.bf16 %v6616_v2, %v6226_v19  ;;  %v6768_v37 = vcombine.high %v6704_v39, %v6712_v16  ;;  %v6920_v45 = vcombine.high %v11375_v24, %v11412_v47  ;;  %v11562_v48 = vpop.permute.xlu0 %7650 }
 0x571   :  { %v6783_v61 = vcombine.low %v6708_v55, %v6716_v5  ;;  %v6784_v29 = vcombine.high %v6708_v55, %v6716_v5  ;;  %v6968_v25 = vcombine.high %v11422_v9, %v11448_v54  ;;  %v6480_v59 = vcombine.high %v11465_v30, %v11445_v60 }
 0x572   :  { %7036 = vrot.lane.b32.xlu1 %v7000_v14, %s7951_s20  ;;  %v6736_v27 = vcombine.high %v11410_v1, %v11452_v6  ;;  %v6752_v41 = vcombine.high %v11454_v22, %v11486_v15  ;;  %v6800_v57 = vcombine.high %v6743_v20, %v6759_v38  ;;  %v11536_v39 = vrot.slane %v6799_v63, %v8098_v43 }
 0x573   :  { %7830 = vrot.lane.b32.xlu0 %v7829_v49, %s7954_s27  ;;  %v6791_v62 = vrot.slane %v6783_v61, %v8080_v31  ;;  %v6872_v24 = vcombine.high %v11272_v28, %v11299_v10  ;;  %v6888_v47 = vcombine.high %v11301_v51, %v11338_v13  ;;  %v6936_v9 = vcombine.high %v11416_v34, %v11419_v53 }
 0x574   :  { %v11544_v60 = vpop.permute.xlu1 %7655  ;;  %v6782_v1 = vrot.slane %v6768_v37, %v8080_v31  ;;  %v6798_v54 = vrot.slane %v6784_v29, %v8080_v31  ;;  %v6918_v28 = vrot.slane %v6904_v52, %v8080_v31  ;;  %v6934_v10 = vrot.slane %v6920_v45, %v8080_v31 }
 0x575   :  { %v6831_v32 = vcombine.low %v6775_v12, %v6791_v62  ;;  %v6832_v40 = vcombine.high %v6775_v12, %v6791_v62  ;;  %v6982_v51 = vrot.slane %v6968_v25, %v8098_v43  ;;  %v7854_v13 = vpack.i.bf16 %v6480_v59, %v6090_v36 }
 0x576   :  { %v6750_v34 = vrot.slane %v6736_v27, %v8080_v31  ;;  %v6766_v53 = vrot.slane %v6752_v41, %v8080_v31  ;;  %v6814_v30 = vrot.slane %v6800_v57, %v8098_v43  ;;  %v6886_v50 = vrot.slane %v6872_v24, %v8080_v31 }
 0x577   :  { %7840 = vrot.lane.b32.xlu0 %v7839_v4, %s7955_s7  ;;  %v11527_v46 = vrot.slane %v6831_v32, %v8098_v43  ;;  %v6846_v6 = vrot.slane %v6832_v40, %v8098_v43  ;;  %v6902_v55 = vrot.slane %v6888_v47, %v8080_v31  ;;  %v6950_v42 = vrot.slane %v6936_v9, %v8098_v43  ;;  %v11572_v31 = vpop.permute.xlu0 %7660  ;;  %v11587_v40 = vld [vmem:[%s11817_s1] sm:$0xff] }
 0x578   :  { %v6847_v26 = vcombine.low %v6782_v1, %v6798_v54  ;;  %v11567_v21 = vpop.permute.xlu1 %7665  ;;  %v6983_v17 = vcombine.low %v6918_v28, %v6934_v10  ;;  %v6815_v14 = vcombine.low %v6750_v34, %v6766_v53  ;;  %v6848_v2 = vcombine.high %v6782_v1, %v6798_v54 }
 0x579   :  { %v6864_v22 = vcombine.high %v11536_v39, %v11527_v46  ;;  %v6863_v15 = vcombine.low %v11536_v39, %v11527_v46  ;;  %v6865_v16 = vcombine.low %v6814_v30, %v6846_v6  ;;  %v7001_v44 = vcombine.low %v6950_v42, %v6982_v51 }
 0x57a   :  { %v6951_v20 = vcombine.low %v6886_v50, %v6902_v55  ;;  %v6855_v38 = vrot.slane %v6847_v26, %v8098_v43  ;;  %v6866_v5 = vcombine.high %v6814_v30, %v6846_v6  ;;  %v6991_v49 = vrot.slane %v6983_v17, %v8098_v43 }
 0x57b   :  { %7850 = vrot.lane.b32.xlu0 %v7849_v35, %s7956_s8  ;;  %7008 = vrot.lane.b32.xlu1 %v6864_v22, %s7951_s20  ;;  %v6823_v7 = vrot.slane %v6815_v14, %v8098_v43  ;;  %v7002_v12 = vcombine.high %v6950_v42, %v6982_v51  ;;  %v6984_v63 = vcombine.high %v6918_v28, %v6934_v10  ;;  %v7671_v35 = vpop.permute.xlu0 %7670  ;;  %v7958_v36 = vmov 0.0   ;;  %v12043_v22 = vld [vmem:[#allocation8_spill] sm:$0xff]  ;;  %v12044_v28 = vld [vmem:[#allocation7_spill] sm:$0xff] }
 0x57c   :  { %v11577_v61 = vpop.permute.xlu1 %7675  ;;  %v6959_v19 = vrot.slane %v6951_v20, %v8098_v43  ;;  %v6816_v4 = vcombine.high %v6750_v34, %v6766_v53  ;;  %7151 = vmatprep.mubr.f32.mxu0 %v7958_v36  ;;  %7222 = vmatprep.mubr.f32.mxu1 %v7958_v36  ;;  %v6952_v52 = vcombine.high %v6886_v50, %v6902_v55  ;;  %v7959_v41 = vmov 0   ;;  %v12045_v14 = vld [vmem:[#allocation15_spill] sm:$0xff] }
 0x57d   :  { %v6867_v62 = vcombine.low %v6823_v7, %v6855_v38  ;;  %v6862_v37 = vrot.slane %v6848_v2, %v8098_v43  ;;  %v6868_v29 = vcombine.high %v6823_v7, %v6855_v38  ;;  %7250 = vmatmul.mubr.msk.f32.vlgmr.msra.gmra.mrb[0].mxu0 %vm7083_vm9, %v11587_v40  ;;  %v6998_v25 = vrot.slane %v6984_v63, %v8098_v43 }
 0x57e   :  { %v7003_v32 = vcombine.low %v6959_v19, %v6991_v49  ;;  %v6830_v59 = vrot.slane %v6816_v4, %v8098_v43  ;;  %v7004_v27 = vcombine.high %v6959_v19, %v6991_v49  ;;  %7859 = vset.pattern.permute.xlu0 %v7959_v41  ;;  %v6966_v57 = vrot.slane %v6952_v52, %v8098_v43 }
 0x57f   :  { %7855 = vrot.lane.b32.xlu0 %v7854_v13, %s7956_s8  ;;  %7012 = vrot.lane.b32.xlu1 %v6865_v16, %s7952_s21  ;;  %v7681_v47 = vpop.permute.xlu0 %7680  ;;  %v5041_v10 = vcombine.low %v12044_v28, %v12043_v22  ;;  %v7653_v51 = vunpack.i.h.bf16 %v11562_v48  ;;  %v7652_v43 = vunpack.i.l.bf16 %v11562_v48  ;;  %v7663_v34 = vunpack.i.h.bf16 %v11572_v31  ;;  %v7077_v48 = vld [vmem:[%s11818_s2] sm:$0xff]  ;;  %s7960_s2 = smov [#allocation2]  }
 0x580   :  { %v11589_v45 = vpop.permute.xlu1 %7685  ;;  %v6869_v24 = vcombine.low %v6830_v59, %v6862_v37  ;;  %v7005_v1 = vcombine.low %v6966_v57, %v6998_v25  ;;  %v6870_v54 = vcombine.high %v6830_v59, %v6862_v37  ;;  %v7006_v13 = vcombine.high %v6966_v57, %v6998_v25 }
 0x581   :  { %v7662_v53 = vunpack.i.l.bf16 %v11572_v31  ;;  %v7673_v50 = vunpack.i.h.bf16 %v7671_v35  ;;  %v7672_v55 = vunpack.i.l.bf16 %v7671_v35  ;;  %v7683_v42 = vunpack.i.h.bf16 %v7681_v47 }
 0x582   :  { %v7682_v26 = vunpack.i.l.bf16 %v7681_v47  ;;  %v5112_v17 = vsel %vm392_vm1, %v5041_v10, %v7653_v51  ;;  %v7658_v28 = vunpack.i.h.bf16 %v11544_v60  ;;  %v7657_v10 = vunpack.i.l.bf16 %v11544_v60  ;;  %v12051_v60 = vld [vmem:[#allocation21_spill] sm:$0xff] }
 0x583   :  { %7040 = vrot.lane.b32.xlu0 %v7001_v44, %s7952_s21  ;;  %7016 = vrot.lane.b32.xlu1 %v6866_v5, %s7950_s19  ;;  %v7691_v30 = vpop.permute.xlu0 %7690  ;;  %v12046_v44 = vld [vmem:[#allocation6_spill] sm:$0xff]  ;;  %v5113_v7 = vsel %vm394_vm2, %v5112_v17, %v7663_v34  ;;  %v7678_v34 = vunpack.i.h.bf16 %v11577_v61  ;;  %s7239_s21 = sshll.u32 %s7960_s2, 4  ;;  %s7240_s21 = int_to_ptr.vmem [resolvable:$true] %s7239_s21 }
 0x584   :  { %v12047_v20 = vcombine.low %v12045_v14, %v12046_v44  ;;  %v7693_v5 = vunpack.i.h.bf16 %v7691_v30  ;;  %v7692_v31 = vunpack.i.l.bf16 %v7691_v30  ;;  %v7688_v30 = vunpack.i.h.bf16 %v11589_v45  ;;  %p7928_p1 = scmp.lt.s32.totalorder %s7240_s21, %s7240_s21 }
 0x586   :  { %v4706_v38 = vsel %vm392_vm1, %v12047_v20, %v7652_v43  ;;  %v7668_v43 = vunpack.i.h.bf16 %v11567_v21 }
 0x587   :  { %7044 = vrot.lane.b32.xlu0 %v7002_v12, %s7950_s19  ;;  %7020 = vrot.lane.b32.xlu1 %v6867_v62, %s7953_s26  ;;  %v4707_v49 = vsel %vm394_vm2, %v4706_v38, %v7662_v53  ;;  %v5114_v62 = vsel %vm396_vm3, %v5113_v7, %v7673_v50  ;;  %v7701_v57 = vpop.permute.xlu0 %7700  ;;  %v7677_v53 = vunpack.i.l.bf16 %v11577_v61  ;;  %v7687_v50 = vunpack.i.l.bf16 %v11589_v45 }
 0x588   :  { %v4708_v2 = vsel %vm396_vm3, %v4707_v49, %v7672_v55  ;;  %v5115_v4 = vsel %vm398_vm4, %v5114_v62, %v7683_v42  ;;  %v7703_v14 = vunpack.i.h.bf16 %v7701_v57  ;;  %v7702_v44 = vunpack.i.l.bf16 %v7701_v57 }
 0x589   :  { %v4709_v63 = vsel %vm398_vm4, %v4708_v2, %v7682_v26  ;;  %v5116_v36 = vsel %vm400_vm5, %v5115_v4, %v7693_v5  ;;  %v12050_v26 = vld [vmem:[#allocation24_spill] sm:$0xff] }
 0x58a   :  { %v4710_v35 = vsel %vm400_vm5, %v4709_v63, %v7692_v31 }
 0x58b   :  { %7048 = vrot.lane.b32.xlu0 %v7003_v32, %s7953_s26  ;;  %7024 = vrot.lane.b32.xlu1 %v6868_v29, %s7954_s27  ;;  %s7923_s26 = scalar_lea.vmem %s7240_s21, 512 }
 0x58c   :  { %p7924_p0 = scmp.ne.s32.totalorder %s7240_s21, %s7923_s26  ;;  %p7929_p2 = scmp.lt.s32.totalorder %s7923_s26, %s7923_s26 }
 0x58e   :  { %p7930_p3 = por %p7929_p2, %p7928_p1 }
 0x58f   :  { %7052 = vrot.lane.b32.xlu0 %v7004_v27, %s7954_s27  ;;  %v11598_v9 = vpop.permute.xlu1 %7695  ;;  %7028 = vrot.lane.b32.xlu1 %v6869_v24, %s7955_s7 }
 0x590   :  { %p7931_p4 = pnand %p7930_p3, %p7924_p0 }
 0x593   :  { %7056 = vrot.lane.b32.xlu0 %v7005_v1, %s7955_s7  ;;  %v7706_v6 = vpop.permute.xlu1 %7705  ;;  %7032 = vrot.lane.b32.xlu1 %v6870_v54, %s7956_s8  ;;  %v12048_v54 = vld [vmem:[#allocation20_spill] sm:$0xff] }
 0x594   :  { %v7708_v12 = vunpack.i.h.bf16 %v7706_v6  ;;  %v7707_v19 = vunpack.i.l.bf16 %v7706_v6  ;;  %v12049_v6 = vld [vmem:[#allocation19_spill] sm:$0xff] }
 0x595   :  { %v4905_v22 = vcombine.low %v12049_v6, %v12048_v54 }
 0x596   :  { %v5117_v29 = vsel %vm402_vm6, %v5116_v36, %v7708_v12  ;;  %v4711_v25 = vsel %vm402_vm6, %v4710_v35, %v7707_v19 }
 0x597   :  { %7060 = vrot.lane.b32.xlu0 %v7006_v13, %s7956_s8  ;;  %v11610_v16 = vpop.permute.xlu1 %7715  ;;  %v7667_v13 = vunpack.i.l.bf16 %v11567_v21  ;;  %v5105_v42 = vsel %vm392_vm1, %v4905_v22, %v7658_v28 }
 0x598   :  { %v5106_v20 = vsel %vm394_vm2, %v5105_v42, %v7668_v43  ;;  %v12054_v43 = vld [vmem:[#allocation30_spill] sm:$0xff] }
 0x599   :  { %v5107_v45 = vsel %vm396_vm3, %v5106_v20, %v7678_v34 }
 0x59a   :  { %v5108_v7 = vsel %vm398_vm4, %v5107_v45, %v7688_v30  ;;  %v12057_v30 = vld [vmem:[#allocation28_spill] sm:$0xff] }
 0x59b   :  { %7080 = vperm.xlu0 %7859, %v7077_v48   ;;  %v7726_v32 = vpop.permute.xlu1 %7725  ;;  %v12052_v48 = vcombine.low %v12050_v26, %v12051_v60  ;;  %v5109_v2 = vsel %vm400_vm5, %v5108_v7, %v7703_v14 }
 0x59c   :  { %v7728_v52 = vunpack.i.h.bf16 %v7726_v32  ;;  %v7727_v37 = vunpack.i.l.bf16 %v7726_v32 }
 0x59d   :  { %v4699_v17 = vsel %vm392_vm1, %v12052_v48, %v7657_v10  ;;  %v12053_v10 = vld [vmem:[#allocation13_spill] sm:$0xff] }
 0x59e   :  { %v4712_v59 = vsel %vm404_vm7, %v4711_v25, %v7727_v37  ;;  %v5118_v27 = vsel %vm404_vm7, %v5117_v29, %v7728_v52  ;;  %v4700_v21 = vsel %vm394_vm2, %v4699_v17, %v7667_v13  ;;  %v7698_v25 = vunpack.i.h.bf16 %v11598_v9 }
 0x59f   :  { %v7272_v41 = vpack.c.bf16 %v5118_v27, %v4712_v59  ;;  %v7736_v47 = vpop.permute.xlu1 %7735  ;;  %v4701_v5 = vsel %vm396_vm3, %v4700_v21, %v7677_v53  ;;  %v7697_v59 = vunpack.i.l.bf16 %v11598_v9  ;;  %v7718_v27 = vunpack.i.h.bf16 %v11610_v16  ;;  %v12056_v53 = vld [vmem:[#allocation29_spill] sm:$0xff] }
 0x5a0   :  { %v4702_v49 = vsel %vm398_vm4, %v4701_v5, %v7687_v50  ;;  %v7737_v54 = vunpack.i.l.bf16 %v7736_v47  ;;  %v12055_v13 = vcombine.low %v12053_v10, %v12054_v43  ;;  %v12058_v50 = vcombine.low %v12056_v53, %v12057_v30 }
 0x5a1   :  { %7273 = vmatprep.subr.bf16.mxu1 %v7272_v41  ;;  %v4703_v19 = vsel %vm400_vm5, %v4702_v49, %v7702_v44  ;;  %v7717_v41 = vunpack.i.l.bf16 %v11610_v16 }
 0x5a2   :  { %v5892_v34 = vsel %vm392_vm1, %v12055_v13, %v7698_v25  ;;  %v5502_v9 = vsel %vm392_vm1, %v12058_v50, %v7697_v59 }
 0x5a3   :  { %v5503_v16 = vsel %vm394_vm2, %v5502_v9, %v7717_v41  ;;  %v5893_v60 = vsel %vm394_vm2, %v5892_v34, %v7718_v27  ;;  %v12059_v27 = vld [vmem:[#allocation12_spill] sm:$0xff]  ;;  %v12060_v41 = vld [vmem:[#allocation14_spill] sm:$0xff] }
 0x5a4   :  { %v5504_v48 = vsel %vm396_vm3, %v5503_v16, %v7737_v54  ;;  %v12062_v54 = vld [vmem:[#allocation23_spill] sm:$0xff] }
 0x5af   :  { %v11632_v24 = vpop.permute.xlu0 %7710  ;;  %v11638_v51 = vpop.permute.xlu1 %7745 }
 0x5b0   :  { %v7748_v43 = vunpack.i.h.bf16 %v11638_v51 }
 0x5b3   :  { %v7721_v1 = vpop.permute.xlu0 %7720  ;;  %v11657_v31 = vpop.permute.xlu1 %7755 }
 0x5b4   :  { %v7723_v61 = vunpack.i.h.bf16 %v7721_v1  ;;  %v7722_v38 = vunpack.i.l.bf16 %v7721_v1  ;;  %v7738_v1 = vunpack.i.h.bf16 %v7736_v47 }
 0x5b6   :  { %v4704_v4 = vsel %vm402_vm6, %v4703_v19, %v7722_v38  ;;  %v5110_v32 = vsel %vm402_vm6, %v5109_v2, %v7723_v61  ;;  %v5894_v17 = vsel %vm396_vm3, %v5893_v60, %v7738_v1 }
 0x5b7   :  { %v11646_v55 = vpop.permute.xlu0 %7730 }
 0x5bc   :  { %v7741_v12 = vpop.permute.xlu0 %7740 }
 0x5bd   :  { %v7743_v62 = vunpack.i.h.bf16 %v7741_v12  ;;  %v7742_v63 = vunpack.i.l.bf16 %v7741_v12 }
 0x5bf   :  { %v11665_v35 = vpop.permute.xlu1 %7765  ;;  %v4705_v36 = vsel %vm404_vm7, %v4704_v4, %v7742_v63  ;;  %v5111_v52 = vsel %vm404_vm7, %v5110_v32, %v7743_v62 }
 0x5c0   :  { %v7751_v37 = vpop.permute.xlu0 %7750  ;;  %v7274_v29 = vpack.c.bf16 %v5111_v52, %v4705_v36  ;;  %v7713_v36 = vunpack.i.h.bf16 %v11632_v24  ;;  %v7712_v52 = vunpack.i.l.bf16 %v11632_v24 }
 0x5c1   :  { %v7753_v22 = vunpack.i.h.bf16 %v7751_v37  ;;  %v7752_v28 = vunpack.i.l.bf16 %v7751_v37  ;;  %v7733_v37 = vunpack.i.h.bf16 %v11646_v55 }
 0x5c2   :  { %7275 = vmatpush1.bf16.msra.mxu1 %v7274_v29  ;;  %v7732_v29 = vunpack.i.l.bf16 %v11646_v55  ;;  %v7747_v55 = vunpack.i.l.bf16 %v11638_v51 }
 0x5c3   :  { %v7776_v57 = vpop.permute.xlu1 %7775  ;;  %v5505_v14 = vsel %vm398_vm4, %v5504_v48, %v7752_v28  ;;  %v5895_v44 = vsel %vm398_vm4, %v5894_v17, %v7753_v22 }
 0x5c4   :  { %v7761_v6 = vpop.permute.xlu0 %7760  ;;  %v7778_v21 = vunpack.i.h.bf16 %v7776_v57  ;;  %v7777_v20 = vunpack.i.l.bf16 %v7776_v57  ;;  %v12061_v57 = vcombine.low %v12059_v27, %v12060_v41 }
 0x5c5   :  { %v7763_v42 = vunpack.i.h.bf16 %v7761_v6  ;;  %v7762_v26 = vunpack.i.l.bf16 %v7761_v6  ;;  %v12063_v6 = vld [vmem:[#allocation18_spill] sm:$0xff] }
 0x5c6   :  { %v5495_v1 = vsel %vm392_vm1, %v12061_v57, %v7712_v52  ;;  %v12064_v22 = vcombine.low %v12062_v54, %v12063_v6  ;;  %v7768_v52 = vunpack.i.h.bf16 %v11665_v35 }
 0x5c7   :  { %v11683_v47 = vpop.permute.xlu1 %7785  ;;  %v5506_v61 = vsel %vm400_vm5, %v5505_v14, %v7762_v26  ;;  %v5896_v38 = vsel %vm400_vm5, %v5895_v44, %v7763_v42  ;;  %v5496_v24 = vsel %vm394_vm2, %v5495_v1, %v7732_v29  ;;  %v7758_v42 = vunpack.i.h.bf16 %v11657_v31 }
 0x5c8   :  { %v7771_v45 = vpop.permute.xlu0 %7770  ;;  %v5507_v12 = vsel %vm402_vm6, %v5506_v61, %v7777_v20  ;;  %v5897_v19 = vsel %vm402_vm6, %v5896_v38, %v7778_v21  ;;  %v5885_v28 = vsel %vm392_vm1, %v12064_v22, %v7713_v36  ;;  %v5497_v53 = vsel %vm396_vm3, %v5496_v24, %v7747_v55 }
 0x5c9   :  { %v5886_v10 = vsel %vm394_vm2, %v5885_v28, %v7733_v37  ;;  %v7773_v50 = vunpack.i.h.bf16 %v7771_v45  ;;  %v7772_v9 = vunpack.i.l.bf16 %v7771_v45  ;;  %v7757_v26 = vunpack.i.l.bf16 %v11657_v31 }
 0x5ca   :  { %v5887_v30 = vsel %vm396_vm3, %v5886_v10, %v7748_v43  ;;  %v7767_v37 = vunpack.i.l.bf16 %v11665_v35  ;;  %v7788_v27 = vunpack.i.h.bf16 %v11683_v47  ;;  %v7787_v41 = vunpack.i.l.bf16 %v11683_v47 }
 0x5cb   :  { %v7796_v5 = vpop.permute.xlu1 %7795  ;;  %v5498_v48 = vsel %vm398_vm4, %v5497_v53, %v7757_v26  ;;  %v5888_v17 = vsel %vm398_vm4, %v5887_v30, %v7758_v42 }
 0x5cc   :  { %v7798_v49 = vunpack.i.h.bf16 %v7796_v5  ;;  %v7797_v7 = vunpack.i.l.bf16 %v7796_v5  ;;  %v5499_v14 = vsel %vm400_vm5, %v5498_v48, %v7772_v9  ;;  %v5889_v44 = vsel %vm400_vm5, %v5888_v17, %v7773_v50 }
 0x5ce   :  { %v5508_v2 = vsel %vm404_vm7, %v5507_v12, %v7797_v7  ;;  %v5898_v62 = vsel %vm404_vm7, %v5897_v19, %v7798_v49  ;;  %v12065_v12 = vld [vmem:[#allocation10_spill] sm:$0xff]  ;;  %v12066_v19 = vld [vmem:[#allocation9_spill] sm:$0xff] }
 0x5cf   :  { %v7276_v4 = vpack.c.bf16 %v5898_v62, %v5508_v2  ;;  %v6219_v2 = vcombine.low %v12066_v19, %v12065_v12  ;;  %v6083_v62 = vcombine.low %v11181_v0, %v11190_v18  ;;  %v12067_v18 = vld [vmem:[#allocation27_spill] sm:$0xff] }
 0x5d0   :  { %v11695_v63 = vpop.permute.xlu1 %7805  ;;  %v7781_v32 = vpop.permute.xlu0 %7780 }
 0x5d1   :  { %7277 = vmatprep.subr.bf16.mxu1 %v7276_v4  ;;  %v7783_v4 = vunpack.i.h.bf16 %v7781_v32  ;;  %v7782_v36 = vunpack.i.l.bf16 %v7781_v32  ;;  %v12068_v32 = vcombine.low %v11197_v23, %v12067_v18  ;;  %v6290_v6 = vsel %vm392_vm1, %v6219_v2, %v7767_v37 }
 0x5d2   :  { %v7808_v28 = vunpack.i.h.bf16 %v11695_v63  ;;  %v7807_v24 = vunpack.i.l.bf16 %v11695_v63  ;;  %v6291_v3 = vsel %vm394_vm2, %v6290_v6, %v7787_v41 }
 0x5d3   :  { %v6283_v54 = vsel %vm392_vm1, %v6083_v62, %v7782_v36  ;;  %v6673_v0 = vsel %vm392_vm1, %v6473_v11, %v7783_v4  ;;  %v6680_v35 = vsel %vm392_vm1, %v12068_v32, %v7768_v52 }
 0x5d4   :  { %v11701_v25 = vpop.permute.xlu1 %7815  ;;  %v7791_v59 = vpop.permute.xlu0 %7790  ;;  %v6681_v23 = vsel %vm394_vm2, %v6680_v35, %v7788_v27 }
 0x5d5   :  { %v7793_v16 = vunpack.i.h.bf16 %v7791_v59  ;;  %v7792_v60 = vunpack.i.l.bf16 %v7791_v59  ;;  %v7818_v10 = vunpack.i.h.bf16 %v11701_v25  ;;  %v7817_v58 = vunpack.i.l.bf16 %v11701_v25 }
 0x5d7   :  { %v5500_v61 = vsel %vm402_vm6, %v5499_v14, %v7792_v60  ;;  %v5890_v38 = vsel %vm402_vm6, %v5889_v44, %v7793_v16  ;;  %v6292_v16 = vsel %vm396_vm3, %v6291_v3, %v7807_v24  ;;  %v6682_v60 = vsel %vm396_vm3, %v6681_v23, %v7808_v28 }
 0x5d8   :  { %v11715_v34 = vpop.permute.xlu1 %7825 }
 0x5d9   :  { %v7801_v13 = vpop.permute.xlu0 %7800  ;;  %v7828_v9 = vunpack.i.h.bf16 %v11715_v34  ;;  %v7827_v63 = vunpack.i.l.bf16 %v11715_v34 }
 0x5da   :  { %v7803_v29 = vunpack.i.h.bf16 %v7801_v13  ;;  %v7802_v59 = vunpack.i.l.bf16 %v7801_v13 }
 0x5dc   :  { %v11727_v5 = vpop.permute.xlu1 %7835  ;;  %v6284_v22 = vsel %vm394_vm2, %v6283_v54, %v7802_v59  ;;  %v6674_v47 = vsel %vm394_vm2, %v6673_v0, %v7803_v29 }
 0x5dd   :  { %v7811_v51 = vpop.permute.xlu0 %7810  ;;  %v6285_v13 = vsel %vm396_vm3, %v6284_v22, %v7817_v58  ;;  %v6675_v53 = vsel %vm396_vm3, %v6674_v47, %v7818_v10  ;;  %v7838_v48 = vunpack.i.h.bf16 %v11727_v5  ;;  %v7837_v17 = vunpack.i.l.bf16 %v11727_v5 }
 0x5de   :  { %v7813_v21 = vunpack.i.h.bf16 %v7811_v51  ;;  %v7812_v20 = vunpack.i.l.bf16 %v7811_v51  ;;  %v6286_v51 = vsel %vm398_vm4, %v6285_v13, %v7827_v63  ;;  %v6676_v14 = vsel %vm398_vm4, %v6675_v53, %v7828_v9 }
 0x5df   :  { %v6287_v36 = vsel %vm400_vm5, %v6286_v51, %v7837_v17  ;;  %v6677_v52 = vsel %vm400_vm5, %v6676_v14, %v7838_v48 }
 0x5e0   :  { %v5501_v31 = vsel %vm404_vm7, %v5500_v61, %v7812_v20  ;;  %v5891_v45 = vsel %vm404_vm7, %v5890_v38, %v7813_v21  ;;  %v7846_v57 = vpop.permute.xlu1 %7845 }
 0x5e1   :  { %v7821_v49 = vpop.permute.xlu0 %7820  ;;  %v7278_v7 = vpack.c.bf16 %v5891_v45, %v5501_v31  ;;  %v7848_v45 = vunpack.i.h.bf16 %v7846_v57 }
 0x5e2   :  { %v7823_v11 = vunpack.i.h.bf16 %v7821_v49  ;;  %v7822_v43 = vunpack.i.l.bf16 %v7821_v49  ;;  %v7847_v49 = vunpack.i.l.bf16 %v7846_v57 }
 0x5e3   :  { %7279 = vmatpush1.bf16.msra.mxu1 %v7278_v7  ;;  %v6678_v27 = vsel %vm402_vm6, %v6677_v52, %v7848_v45 }
 0x5e4   :  { %v7037_v42 = vpop.permute.xlu1 %7036  ;;  %v6293_v44 = vsel %vm398_vm4, %v6292_v16, %v7822_v43  ;;  %v6683_v21 = vsel %vm398_vm4, %v6682_v60, %v7823_v11  ;;  %v6288_v59 = vsel %vm402_vm6, %v6287_v36, %v7847_v49 }
 0x5e5   :  { %v7831_v1 = vpop.permute.xlu0 %7830  ;;  %v7070_v24 = vsel %vm392_vm1, %v6999_v8, %v7037_v42 }
 0x5e6   :  { %v7833_v30 = vunpack.i.h.bf16 %v7831_v1  ;;  %v7832_v50 = vunpack.i.l.bf16 %v7831_v1 }
 0x5e8   :  { %v6294_v20 = vsel %vm400_vm5, %v6293_v44, %v7832_v50  ;;  %v6684_v61 = vsel %vm400_vm5, %v6683_v21, %v7833_v30 }
 0x5e9   :  { %v7841_v55 = vpop.permute.xlu0 %7840 }
 0x5ea   :  { %v7843_v26 = vunpack.i.h.bf16 %v7841_v55  ;;  %v7842_v25 = vunpack.i.l.bf16 %v7841_v55 }
 0x5ec   :  { %v6295_v7 = vsel %vm402_vm6, %v6294_v20, %v7842_v25  ;;  %v6685_v5 = vsel %vm402_vm6, %v6684_v61, %v7843_v26 }
 0x5ed   :  { %v7851_v34 = vpop.permute.xlu0 %7850  ;;  %v7009_v12 = vpop.permute.xlu1 %7008 }
 0x5ee   :  { %v7853_v38 = vunpack.i.h.bf16 %v7851_v34  ;;  %v7852_v31 = vunpack.i.l.bf16 %v7851_v34  ;;  %v7063_v10 = vsel %vm392_vm1, %v6863_v15, %v7009_v12 }
 0x5f0   :  { %v6296_v19 = vsel %vm404_vm7, %v6295_v7, %v7852_v31  ;;  %v6686_v2 = vsel %vm404_vm7, %v6685_v5, %v7853_v38 }
 0x5f1   :  { %v7856_v62 = vpop.permute.xlu0 %7855  ;;  %v7280_v4 = vpack.c.bf16 %v6686_v2, %v6296_v19  ;;  %v7013_v41 = vpop.permute.xlu1 %7012 }
 0x5f2   :  { %v7858_v37 = vunpack.i.h.bf16 %v7856_v62  ;;  %v7857_v29 = vunpack.i.l.bf16 %v7856_v62  ;;  %v7064_v23 = vsel %vm394_vm2, %v7063_v10, %v7013_v41 }
 0x5f3   :  { %7281 = vmatprep.subr.bf16.mxu1 %v7280_v4 }
 0x5f4   :  { %v6289_v57 = vsel %vm404_vm7, %v6288_v59, %v7857_v29  ;;  %v6679_v1 = vsel %vm404_vm7, %v6678_v27, %v7858_v37 }
 0x5f5   :  { %v7041_v54 = vpop.permute.xlu0 %7040  ;;  %v7282_v0 = vpack.c.bf16 %v6679_v1, %v6289_v57  ;;  %v7017_v18 = vpop.permute.xlu1 %7016 }
 0x5f6   :  { %v7071_v58 = vsel %vm394_vm2, %v7070_v24, %v7041_v54  ;;  %v7065_v43 = vsel %vm396_vm3, %v7064_v23, %v7017_v18 }
 0x5f7   :  { %7283 = vmatpush1.bf16.msra.mxu1 %v7282_v0 }
 0x5f9   :  { %v7045_v32 = vpop.permute.xlu0 %7044  ;;  %v7021_v35 = vpop.permute.xlu1 %7020 }
 0x5fa   :  { %v7072_v11 = vsel %vm396_vm3, %v7071_v58, %v7045_v32  ;;  %v7066_v33 = vsel %vm398_vm4, %v7065_v43, %v7021_v35 }
 0x5fd   :  { %v7049_v6 = vpop.permute.xlu0 %7048  ;;  %v7025_v22 = vpop.permute.xlu1 %7024 }
 0x5fe   :  { %v7073_v55 = vsel %vm398_vm4, %v7072_v11, %v7049_v6  ;;  %v7067_v46 = vsel %vm400_vm5, %v7066_v33, %v7025_v22 }
 0x601   :  { %v7053_v47 = vpop.permute.xlu0 %7052  ;;  %v7029_v28 = vpop.permute.xlu1 %7028 }
 0x602   :  { %v7074_v56 = vsel %vm400_vm5, %v7073_v55, %v7053_v47  ;;  %v7068_v13 = vsel %vm402_vm6, %v7067_v46, %v7029_v28 }
 0x605   :  { %v7057_v3 = vpop.permute.xlu0 %7056  ;;  %v7033_v8 = vpop.permute.xlu1 %7032 }
 0x606   :  { %v7075_v39 = vsel %vm402_vm6, %v7074_v56, %v7057_v3  ;;  %v7069_v30 = vsel %vm404_vm7, %v7068_v13, %v7033_v8 }
 0x609   :  { %v7061_v15 = vpop.permute.xlu0 %7060 }
 0x60a   :  { %v7076_v53 = vsel %vm404_vm7, %v7075_v39, %v7061_v15 }
 0x60b   :  { %7174 = vmatprep.subr.mxu1 %v7076_v53 }
 0x60c   :  { %7175 = vmatpush1.msra.mxu1 %v7069_v30 }
 0x60d   :  { %7251 = vmatmul.mubr.msk.f32.vlgmr.msra.gmra.mrb[0].mxu1 %vm7083_vm9, %v11587_v40 }
 0x61a   :  { %v7081_v50 = vpop.permute.xlu0 %7080 }
 0x650   :  { %v7153_v9 = vpop.f32.mrb[0].mxu0 }
 0x651   :  { %v7154_v63 = vadd.f32 %v7153_v9, %v7081_v50  ;;  %v7155_v42 = vpop.f32.mrb[1].mxu0 }
 0x652   :  { %v7156_v26 = vadd.f32 %v7155_v42, %v7081_v50 }
 0x653   :  { %7229 = vst [vmem:[#allocation2] sm:$0xff] %v7154_v63 }
 0x654   :  { %7230 = vst [vmem:[#allocation2 + $0x8] sm:$0xff] %v7156_v26 }
 0x6e0   :  { %v7224_v25 = vpop.f32.mrb[0].mxu1 }
 0x6e1   :  { %v7225_v16 = vadd.f32 %v7224_v25, %v7081_v50  ;;  %v7226_v60 = vpop.f32.mrb[1].mxu1 }
 0x6e2   :  { %v7227_v48 = vadd.f32 %v7226_v60, %v7081_v50 }
 0x6e3   :  { %7232 = vst [vmem:[#allocation2 + $0x10] sm:$0xff] %v7225_v16 }
 0x6e4   :  { %7233 = vst [vmem:[#allocation2 + $0x18] sm:$0xff] %v7227_v48 }
 0x6e5   :  { %7934 = shalt.err (!%p7931_p4)
}
 0x6e6   :  { %s7935_s8 = scalar_lea.hbm %s11819_s3, 512 }
 0x6e7   :  { %p7936_p5 = scmp.ne.s32.totalorder %s11819_s3, %s7935_s8  ;;  %p7939_p6 = scmp.lt.u32.totalorder %s7935_s8, %s11819_s3 }
 0x6e9   :  { %p7941_p7 = pnand %p7939_p6, %p7936_p5 }
 0x6eb   :  { %7944 = shalt.err (!%p7941_p7)
}
 0x6ec   :  { %s7961_s25 = smov 256  }
 0x6ed   :  { %7245 = dma.vmem_to_hbm [thread:$0]  %s7240_s21, 512, %s11819_s3, [#allocation3], %s7961_s25, %s7961_s25, %s7951_s20  }
 0x6ee   :  { %7945 = dma.done.wait [#allocation3], 512  }
 0x6ef   :  { %7946 = vsyncadd [#allocation3], 4294966784 }
 0x6f0   :  { %7249 = vsyncpa [#allocation3], 1 }

</bundles_post_ra>
